<compile_context>
chip_gen: v6e
topology: v6e:2x2x1
jax: 0.10.0
libtpu: 0.0.40
codegen_flags: <defaults>
</compile_context>

<pallas_src>
import functools
import math

import jax
import jax.numpy as jnp
from jax.experimental import pallas as pl
from jax.experimental.pallas import tpu as pltpu

_LN_EPS = 1e-5        # PyTorch layer_norm_eps default
_NEG_INF = -1e30      # additive mask value; exp() underflows cleanly to 0.0


# ---------------------------------------------------------------------------
# In-kernel building blocks (pure functions on 2-D f32 arrays; rows = N*L)
# ---------------------------------------------------------------------------
def _layer_norm(z, gamma, beta):
    mean = jnp.mean(z, axis=-1, keepdims=True)
    var = jnp.mean(jnp.square(z - mean), axis=-1, keepdims=True)
    return (z - mean) * jax.lax.rsqrt(var + _LN_EPS) * gamma + beta


def _ffn(x, w1, b1, w2, b2):
    h = jnp.maximum(jnp.dot(x, w1, preferred_element_type=jnp.float32) + b1, 0.0)
    return jnp.dot(h, w2, preferred_element_type=jnp.float32) + b2


def _mha(q_src, kv_src, w_in, b_in, wo, bo, bias, n_heads):
    """Multi-head attention on flattened rows.

    q_src: (Rq, E).  kv_src: (Rk, E) or None for self-attention (single fused
    (E, 3E) in-projection).  `bias` is an additive (Rq, Rk) mask: 0 where
    attention is allowed (same attention-batch element), -1e30 elsewhere.
    Heads are summed directly through the output projection, avoiding any
    concatenate / per-head materialization.
    """
    rq, e = q_src.shape
    hd = e // n_heads
    scale = 1.0 / math.sqrt(hd)

    if kv_src is None:
        qkv = jnp.dot(q_src, w_in, preferred_element_type=jnp.float32) + b_in
        q, k, v = qkv[:, :e], qkv[:, e:2 * e], qkv[:, 2 * e:]
    else:
        q = jnp.dot(q_src, w_in[:, :e], preferred_element_type=jnp.float32) + b_in[:, :e]
        kv = jnp.dot(kv_src, w_in[:, e:], preferred_element_type=jnp.float32) + b_in[:, e:]
        k, v = kv[:, :e], kv[:, e:]

    out = jnp.zeros((rq, e), jnp.float32)
    for h in range(n_heads):                       # static unroll over heads
        sl = slice(h * hd, (h + 1) * hd)
        s = jax.lax.dot_general(q[:, sl], k[:, sl], (((1,), (1,)), ((), ())),
                                preferred_element_type=jnp.float32) * scale + bias
        s = s - jnp.max(s, axis=-1, keepdims=True)
        p = jnp.exp(s)
        p = p * pl.reciprocal(jnp.sum(p, axis=-1, keepdims=True), approx=True)
        ctx = jnp.dot(p, v[:, sl], preferred_element_type=jnp.float32)     # (Rq, hd)
        out = out + jnp.dot(ctx, wo[sl, :], preferred_element_type=jnp.float32)
    return out + bo


# ---------------------------------------------------------------------------
# Fused kernels: whole encoder stack / whole decoder stack (+ vocab projection)
# ---------------------------------------------------------------------------
def encoder_kernel(x_ref, bias_ref,
                   w_in_ref, b_in_ref, wo_ref, bo_ref, g1_ref, be1_ref,
                   w1_ref, b1_ref, w2_ref, b2_ref, g2_ref, be2_ref,
                   o_ref, *, n_heads, num_layers):
    x = x_ref[...]                       # (R, E), R = seq*batch rows
    bias = bias_ref[...]                 # (R, R) block-diagonal additive mask
    for li in range(num_layers):         # static unroll; params stacked on axis 0
        sa = _mha(x, None, w_in_ref[li], b_in_ref[li], wo_ref[li], bo_ref[li],
                  bias, n_heads)
        x = _layer_norm(x + sa, g1_ref[li], be1_ref[li])
        ff = _ffn(x, w1_ref[li], b1_ref[li], w2_ref[li], b2_ref[li])
        x = _layer_norm(x + ff, g2_ref[li], be2_ref[li])
    o_ref[...] = x


def decoder_kernel(y_ref, mem_ref, bias_ref,
                   sw_ref, sb_ref, swo_ref, sbo_ref, g1_ref, be1_ref,
                   cw_ref, cb_ref, cwo_ref, cbo_ref, g2_ref, be2_ref,
                   w1_ref, b1_ref, w2_ref, b2_ref, g3_ref, be3_ref,
                   fcw_ref, fcb_ref, o_ref, *, n_heads, num_layers):
    y = y_ref[...]                       # (R, E)
    mem = mem_ref[...]                   # (R, E) encoder memory
    bias = bias_ref[...]
    for li in range(num_layers):
        # Decoder self-attention: no causal mask, matching the PyTorch module
        # (no tgt_mask is passed) — intentional-by-spec.
        sa = _mha(y, None, sw_ref[li], sb_ref[li], swo_ref[li], sbo_ref[li],
                  bias, n_heads)
        y = _layer_norm(y + sa, g1_ref[li], be1_ref[li])
        ca = _mha(y, mem, cw_ref[li], cb_ref[li], cwo_ref[li], cbo_ref[li],
                  bias, n_heads)
        y = _layer_norm(y + ca, g2_ref[li], be2_ref[li])
        ff = _ffn(y, w1_ref[li], b1_ref[li], w2_ref[li], b2_ref[li])
        y = _layer_norm(y + ff, g3_ref[li], be3_ref[li])
    # Fused vocab projection. fc weights are pre-padded to a 128-lane multiple,
    # so the only HBM store of this kernel is lane-dense (no vst.msk tail).
    o_ref[...] = (jnp.dot(y, fcw_ref[...], preferred_element_type=jnp.float32)
                  + fcb_ref[...])


# ---------------------------------------------------------------------------
# pallas_call wrappers (no grid: whole problem in one invocation, all in VMEM)
# ---------------------------------------------------------------------------
def _vmem():
    return pl.BlockSpec(memory_space=pltpu.MemorySpace.VMEM)


_ENC_KEYS = ("w_in", "b_in", "wo", "bo", "g1", "be1",
             "w1", "b1", "w2", "b2", "g2", "be2")
_DEC_KEYS = ("s_w_in", "s_b_in", "s_wo", "s_bo", "g1", "be1",
             "c_w_in", "c_b_in", "c_wo", "c_bo", "g2", "be2",
             "w1", "b1", "w2", "b2", "g3", "be3")


def run_encoder(x2, bias, enc, n_heads, num_layers):
    r, e = x2.shape
    args = (x2, bias) + tuple(enc[k] for k in _ENC_KEYS)
    return pl.pallas_call(
        functools.partial(encoder_kernel, n_heads=n_heads, num_layers=num_layers),
        out_shape=jax.ShapeDtypeStruct((r, e), jnp.float32),
        in_specs=[_vmem() for _ in args],
        out_specs=_vmem(),
    )(*args)


def run_decoder(y2, mem2, bias, dec, fc_w, fc_b, n_heads, num_layers):
    r, e = y2.shape
    v = fc_w.shape[1]
    v_pad = ((v + 127) // 128) * 128
    fc_w_p = jnp.pad(fc_w, ((0, 0), (0, v_pad - v)))   # lane-dense output store
    fc_b_p = jnp.pad(fc_b, ((0, 0), (0, v_pad - v)))
    args = (y2, mem2, bias) + tuple(dec[k] for k in _DEC_KEYS) + (fc_w_p, fc_b_p)
    out = pl.pallas_call(
        functools.partial(decoder_kernel, n_heads=n_heads, num_layers=num_layers),
        out_shape=jax.ShapeDtypeStruct((r, v_pad), jnp.float32),
        in_specs=[_vmem() for _ in args],
        out_specs=_vmem(),
    )(*args)
    return out[:, :v]


# ---------------------------------------------------------------------------
# Full forward (glue: embedding gather, layout flatten, final transpose)
# ---------------------------------------------------------------------------
def transformer_poem_forward(params, src, tgt):
    n_heads = params["n_heads"]
    num_layers = params["num_layers"]
    b, s_len = src.shape
    _, t_len = tgt.shape
    # batch_first=False cross-attention requires matching attention-batch dims.
    assert s_len == t_len, "literal PyTorch semantics require equal src/tgt lengths"

    emb = params["embedding"]          # (V, E)
    pos = params["pos_embedding"]      # (max_len, E)
    e = emb.shape[1]
    # TODO(synk): token-id embedding gather has no clean in-kernel Pallas
    # equivalent at this scale; done with a JAX gather outside the kernels.
    src_embed = emb[src] + pos[:s_len][None, :, :]     # (B, S, E)
    tgt_embed = emb[tgt] + pos[:t_len][None, :, :]     # (B, T, E)

    # batch_first=False reproduced literally: attention (softmax) axis is the
    # batch axis B, independently per sequence position. Flatten (seq, batch)
    # into rows so in-kernel matmuls have M = seq*batch.
    x2 = jnp.transpose(src_embed, (1, 0, 2)).reshape(s_len * b, e)   # row = (s, b)
    y2 = jnp.transpose(tgt_embed, (1, 0, 2)).reshape(t_len * b, e)   # row = (t, b)

    # Additive mask: row i attends to row j iff same attention-batch element
    # (same seq position, i.e. row // B matches). Softmax stays over the batch
    # axis exactly as in the original module.
    grp = jnp.arange(s_len * b, dtype=jnp.int32) // b
    bias = jnp.where(grp[:, None] == grp[None, :], 0.0, _NEG_INF).astype(jnp.float32)

    memory = run_encoder(x2, bias, params["encoder"], n_heads, num_layers)
    logits2 = run_decoder(y2, memory, bias, params["decoder"],
                          params["fc_w"], params["fc_b"], n_heads, num_layers)
    v = params["fc_w"].shape[1]
    return jnp.transpose(logits2.reshape(t_len, b, v), (1, 0, 2))    # (B, T, V)


# ---------------------------------------------------------------------------
# Deterministic parameter init (mirrors init_weights / MHA defaults),
# per-layer weights stacked along a leading layer axis.
# ---------------------------------------------------------------------------
def init_params(key, vocab_size, d_model, n_heads, num_layers, max_len, dim_ff):
    keys = iter(jax.random.split(key, 1024))

    def nxt():
        return next(keys)

    def xavier(shape):                      # weights stored (fan_in, fan_out)
        fan_in, fan_out = shape
        bound = math.sqrt(6.0 / (fan_in + fan_out))
        return jax.random.uniform(nxt(), shape, jnp.float32, -bound, bound)

    def sx(shape):                          # stacked xavier, one per layer
        return jnp.stack([xavier(shape) for _ in range(num_layers)])

    def sz(shape):
        return jnp.zeros((num_layers,) + shape, jnp.float32)

    def so(shape):
        return jnp.ones((num_layers,) + shape, jnp.float32)

    e, f = d_model, dim_ff
    encoder = dict(
        w_in=sx((e, 3 * e)), b_in=sz((1, 3 * e)),
        wo=sx((e, e)), bo=sz((1, e)),
        g1=so((1, e)), be1=sz((1, e)),
        w1=sx((e, f)), b1=sz((1, f)),
        w2=sx((f, e)), b2=sz((1, e)),
        g2=so((1, e)), be2=sz((1, e)),
    )
    decoder = dict(
        s_w_in=sx((e, 3 * e)), s_b_in=sz((1, 3 * e)),
        s_wo=sx((e, e)), s_bo=sz((1, e)),
        g1=so((1, e)), be1=sz((1, e)),
        c_w_in=sx((e, 3 * e)), c_b_in=sz((1, 3 * e)),
        c_wo=sx((e, e)), c_bo=sz((1, e)),
        g2=so((1, e)), be2=sz((1, e)),
        w1=sx((e, f)), b1=sz((1, f)),
        w2=sx((f, e)), b2=sz((1, e)),
        g3=so((1, e)), be3=sz((1, e)),
    )
    return dict(
        embedding=0.02 * jax.random.normal(nxt(), (vocab_size, d_model), jnp.float32),
        pos_embedding=0.02 * jax.random.normal(nxt(), (max_len, d_model), jnp.float32),
        encoder=encoder,
        decoder=decoder,
        fc_w=xavier((d_model, vocab_size)),
        fc_b=jnp.zeros((1, vocab_size), jnp.float32),
        n_heads=n_heads,
        num_layers=num_layers,
    )


# ---------------------------------------------------------------------------
if __name__ == "__main__":
    VOCAB = 64
    D_MODEL = 32
    N_HEADS = 4
    NUM_LAYERS = 2
    MAX_LEN = 16
    DIM_FF = 64
    BATCH = 2
    SEQ = 8

    root = jax.random.PRNGKey(0)
    k_params, k_src, k_tgt = jax.random.split(root, 3)
    params = init_params(k_params, VOCAB, D_MODEL, N_HEADS, NUM_LAYERS,
                         MAX_LEN, DIM_FF)

    src = jax.random.randint(k_src, (BATCH, SEQ), 0, VOCAB, dtype=jnp.int32)
    tgt = jax.random.randint(k_tgt, (BATCH, SEQ), 0, VOCAB, dtype=jnp.int32)

    fwd = jax.jit(lambda s, t: transformer_poem_forward(params, s, t))
    out = jax.block_until_ready(fwd(src, tgt))

    assert out.shape == (BATCH, SEQ, VOCAB), out.shape
    assert out.dtype == jnp.float32
    assert bool(jnp.all(jnp.isfinite(out)))
    print("KERNEL_OK")
</pallas_src>

<mosaic_0001>
module attributes {stable_mosaic.version = 11 : i64} {
  func.func @encoder_kernel(%arg0: memref<16x32xf32, #tpu.memory_space<vmem>>, %arg1: memref<16x16xf32, #tpu.memory_space<vmem>>, %arg2: memref<2x32x96xf32, #tpu.memory_space<vmem>>, %arg3: memref<2x1x96xf32, #tpu.memory_space<vmem>>, %arg4: memref<2x32x32xf32, #tpu.memory_space<vmem>>, %arg5: memref<2x1x32xf32, #tpu.memory_space<vmem>>, %arg6: memref<2x1x32xf32, #tpu.memory_space<vmem>>, %arg7: memref<2x1x32xf32, #tpu.memory_space<vmem>>, %arg8: memref<2x32x64xf32, #tpu.memory_space<vmem>>, %arg9: memref<2x1x64xf32, #tpu.memory_space<vmem>>, %arg10: memref<2x64x32xf32, #tpu.memory_space<vmem>>, %arg11: memref<2x1x32xf32, #tpu.memory_space<vmem>>, %arg12: memref<2x1x32xf32, #tpu.memory_space<vmem>>, %arg13: memref<2x1x32xf32, #tpu.memory_space<vmem>>, %arg14: memref<16x32xf32, #tpu.memory_space<vmem>>) attributes {dimension_semantics = [], scalar_prefetch = 0 : i64, scratch_operands = 0 : i64, tpu.core_type = #tpu.core_type<tc>} {
    %c0 = arith.constant 0 : index
    %c0_0 = arith.constant 0 : index
    %0 = vector.load %arg0[%c0, %c0_0] : memref<16x32xf32, #tpu.memory_space<vmem>>, vector<16x32xf32>
    %c0_1 = arith.constant 0 : index
    %c0_2 = arith.constant 0 : index
    %1 = vector.load %arg1[%c0_1, %c0_2] : memref<16x16xf32, #tpu.memory_space<vmem>>, vector<16x16xf32>
    %c0_3 = arith.constant 0 : index
    %c0_4 = arith.constant 0 : index
    %c0_5 = arith.constant 0 : index
    %2 = vector.load %arg2[%c0_3, %c0_4, %c0_5] : memref<2x32x96xf32, #tpu.memory_space<vmem>>, vector<1x32x96xf32>
    %3 = vector.shape_cast %2 : vector<1x32x96xf32> to vector<32x96xf32>
    %c0_6 = arith.constant 0 : index
    %c0_7 = arith.constant 0 : index
    %c0_8 = arith.constant 0 : index
    %4 = vector.load %arg3[%c0_6, %c0_7, %c0_8] : memref<2x1x96xf32, #tpu.memory_space<vmem>>, vector<1x1x96xf32>
    %5 = vector.shape_cast %4 : vector<1x1x96xf32> to vector<1x96xf32>
    %c0_9 = arith.constant 0 : index
    %c0_10 = arith.constant 0 : index
    %c0_11 = arith.constant 0 : index
    %6 = vector.load %arg4[%c0_9, %c0_10, %c0_11] : memref<2x32x32xf32, #tpu.memory_space<vmem>>, vector<1x32x32xf32>
    %7 = vector.shape_cast %6 : vector<1x32x32xf32> to vector<32x32xf32>
    %c0_12 = arith.constant 0 : index
    %c0_13 = arith.constant 0 : index
    %c0_14 = arith.constant 0 : index
    %8 = vector.load %arg5[%c0_12, %c0_13, %c0_14] : memref<2x1x32xf32, #tpu.memory_space<vmem>>, vector<1x1x32xf32>
    %9 = vector.shape_cast %8 : vector<1x1x32xf32> to vector<1x32xf32>
    %cst = arith.constant dense<0.000000e+00> : vector<16x96xf32>
    %10 = tpu.matmul %0, %3, %cst {dimension_numbers = #tpu.dot_dimension_numbers<[1], [0], [0], [1], [0, 0, 1, 1], [], []>} : vector<16x32xf32>, vector<32x96xf32>, vector<16x96xf32> -> vector<16x96xf32>
    %11 = vector.broadcast %5 : vector<1x96xf32> to vector<16x96xf32>
    %12 = arith.addf %10, %11 : vector<16x96xf32>
    %13 = vector.extract_strided_slice %12 {offsets = [0, 0], sizes = [16, 32], strides = [1, 1]} : vector<16x96xf32> to vector<16x32xf32>
    %14 = vector.extract_strided_slice %12 {offsets = [0, 32], sizes = [16, 32], strides = [1, 1]} : vector<16x96xf32> to vector<16x32xf32>
    %15 = vector.extract_strided_slice %12 {offsets = [0, 64], sizes = [16, 32], strides = [1, 1]} : vector<16x96xf32> to vector<16x32xf32>
    %cst_15 = arith.constant 0.000000e+00 : f32
    %16 = vector.broadcast %cst_15 : f32 to vector<16x32xf32>
    %17 = vector.extract_strided_slice %13 {offsets = [0, 0], sizes = [16, 8], strides = [1, 1]} : vector<16x32xf32> to vector<16x8xf32>
    %18 = vector.extract_strided_slice %14 {offsets = [0, 0], sizes = [16, 8], strides = [1, 1]} : vector<16x32xf32> to vector<16x8xf32>
    %cst_16 = arith.constant dense<0.000000e+00> : vector<16x16xf32>
    %19 = tpu.matmul %17, %18, %cst_16 {dimension_numbers = #tpu.dot_dimension_numbers<[1], [1], [0], [0], [0, 0, 1, 0], [], []>} : vector<16x8xf32>, vector<16x8xf32>, vector<16x16xf32> -> vector<16x16xf32>
    %cst_17 = arith.constant 0.353553385 : f32
    %20 = vector.broadcast %cst_17 : f32 to vector<16x16xf32>
    %21 = arith.mulf %19, %20 : vector<16x16xf32>
    %22 = arith.addf %21, %1 : vector<16x16xf32>
    %cst_18 = arith.constant dense<0xFF800000> : vector<16xf32>
    %23 = vector.multi_reduction <maximumf>, %22, %cst_18 [1] : vector<16x16xf32> to vector<16xf32>
    %24 = vector.shape_cast %23 : vector<16xf32> to vector<16x1xf32>
    %25 = vector.broadcast %24 : vector<16x1xf32> to vector<16x16xf32>
    %26 = arith.subf %22, %25 : vector<16x16xf32>
    %27 = math.exp %26 : vector<16x16xf32>
    %cst_19 = arith.constant dense<0.000000e+00> : vector<16xf32>
    %28 = vector.multi_reduction <add>, %27, %cst_19 [1] : vector<16x16xf32> to vector<16xf32>
    %29 = vector.shape_cast %28 : vector<16xf32> to vector<16x1xf32>
    %30 = tpu.reciprocal %29 {approx = true} : vector<16x1xf32> -> vector<16x1xf32>
    %31 = vector.broadcast %30 : vector<16x1xf32> to vector<16x16xf32>
    %32 = arith.mulf %27, %31 : vector<16x16xf32>
    %33 = vector.extract_strided_slice %15 {offsets = [0, 0], sizes = [16, 8], strides = [1, 1]} : vector<16x32xf32> to vector<16x8xf32>
    %cst_20 = arith.constant dense<0.000000e+00> : vector<16x8xf32>
    %34 = tpu.matmul %32, %33, %cst_20 {dimension_numbers = #tpu.dot_dimension_numbers<[1], [0], [0], [1], [0, 0, 1, 1], [], []>} : vector<16x16xf32>, vector<16x8xf32>, vector<16x8xf32> -> vector<16x8xf32>
    %35 = vector.extract_strided_slice %7 {offsets = [0, 0], sizes = [8, 32], strides = [1, 1]} : vector<32x32xf32> to vector<8x32xf32>
    %cst_21 = arith.constant dense<0.000000e+00> : vector<16x32xf32>
    %36 = tpu.matmul %34, %35, %cst_21 {dimension_numbers = #tpu.dot_dimension_numbers<[1], [0], [0], [1], [0, 0, 1, 1], [], []>} : vector<16x8xf32>, vector<8x32xf32>, vector<16x32xf32> -> vector<16x32xf32>
    %37 = arith.addf %16, %36 : vector<16x32xf32>
    %38 = vector.extract_strided_slice %13 {offsets = [0, 8], sizes = [16, 8], strides = [1, 1]} : vector<16x32xf32> to vector<16x8xf32>
    %39 = vector.extract_strided_slice %14 {offsets = [0, 8], sizes = [16, 8], strides = [1, 1]} : vector<16x32xf32> to vector<16x8xf32>
    %cst_22 = arith.constant dense<0.000000e+00> : vector<16x16xf32>
    %40 = tpu.matmul %38, %39, %cst_22 {dimension_numbers = #tpu.dot_dimension_numbers<[1], [1], [0], [0], [0, 0, 1, 0], [], []>} : vector<16x8xf32>, vector<16x8xf32>, vector<16x16xf32> -> vector<16x16xf32>
    %cst_23 = arith.constant 0.353553385 : f32
    %41 = vector.broadcast %cst_23 : f32 to vector<16x16xf32>
    %42 = arith.mulf %40, %41 : vector<16x16xf32>
    %43 = arith.addf %42, %1 : vector<16x16xf32>
    %cst_24 = arith.constant dense<0xFF800000> : vector<16xf32>
    %44 = vector.multi_reduction <maximumf>, %43, %cst_24 [1] : vector<16x16xf32> to vector<16xf32>
    %45 = vector.shape_cast %44 : vector<16xf32> to vector<16x1xf32>
    %46 = vector.broadcast %45 : vector<16x1xf32> to vector<16x16xf32>
    %47 = arith.subf %43, %46 : vector<16x16xf32>
    %48 = math.exp %47 : vector<16x16xf32>
    %cst_25 = arith.constant dense<0.000000e+00> : vector<16xf32>
    %49 = vector.multi_reduction <add>, %48, %cst_25 [1] : vector<16x16xf32> to vector<16xf32>
    %50 = vector.shape_cast %49 : vector<16xf32> to vector<16x1xf32>
    %51 = tpu.reciprocal %50 {approx = true} : vector<16x1xf32> -> vector<16x1xf32>
    %52 = vector.broadcast %51 : vector<16x1xf32> to vector<16x16xf32>
    %53 = arith.mulf %48, %52 : vector<16x16xf32>
    %54 = vector.extract_strided_slice %15 {offsets = [0, 8], sizes = [16, 8], strides = [1, 1]} : vector<16x32xf32> to vector<16x8xf32>
    %cst_26 = arith.constant dense<0.000000e+00> : vector<16x8xf32>
    %55 = tpu.matmul %53, %54, %cst_26 {dimension_numbers = #tpu.dot_dimension_numbers<[1], [0], [0], [1], [0, 0, 1, 1], [], []>} : vector<16x16xf32>, vector<16x8xf32>, vector<16x8xf32> -> vector<16x8xf32>
    %56 = vector.extract_strided_slice %7 {offsets = [8, 0], sizes = [8, 32], strides = [1, 1]} : vector<32x32xf32> to vector<8x32xf32>
    %cst_27 = arith.constant dense<0.000000e+00> : vector<16x32xf32>
    %57 = tpu.matmul %55, %56, %cst_27 {dimension_numbers = #tpu.dot_dimension_numbers<[1], [0], [0], [1], [0, 0, 1, 1], [], []>} : vector<16x8xf32>, vector<8x32xf32>, vector<16x32xf32> -> vector<16x32xf32>
    %58 = arith.addf %37, %57 : vector<16x32xf32>
    %59 = vector.extract_strided_slice %13 {offsets = [0, 16], sizes = [16, 8], strides = [1, 1]} : vector<16x32xf32> to vector<16x8xf32>
    %60 = vector.extract_strided_slice %14 {offsets = [0, 16], sizes = [16, 8], strides = [1, 1]} : vector<16x32xf32> to vector<16x8xf32>
    %cst_28 = arith.constant dense<0.000000e+00> : vector<16x16xf32>
    %61 = tpu.matmul %59, %60, %cst_28 {dimension_numbers = #tpu.dot_dimension_numbers<[1], [1], [0], [0], [0, 0, 1, 0], [], []>} : vector<16x8xf32>, vector<16x8xf32>, vector<16x16xf32> -> vector<16x16xf32>
    %cst_29 = arith.constant 0.353553385 : f32
    %62 = vector.broadcast %cst_29 : f32 to vector<16x16xf32>
    %63 = arith.mulf %61, %62 : vector<16x16xf32>
    %64 = arith.addf %63, %1 : vector<16x16xf32>
    %cst_30 = arith.constant dense<0xFF800000> : vector<16xf32>
    %65 = vector.multi_reduction <maximumf>, %64, %cst_30 [1] : vector<16x16xf32> to vector<16xf32>
    %66 = vector.shape_cast %65 : vector<16xf32> to vector<16x1xf32>
    %67 = vector.broadcast %66 : vector<16x1xf32> to vector<16x16xf32>
    %68 = arith.subf %64, %67 : vector<16x16xf32>
    %69 = math.exp %68 : vector<16x16xf32>
    %cst_31 = arith.constant dense<0.000000e+00> : vector<16xf32>
    %70 = vector.multi_reduction <add>, %69, %cst_31 [1] : vector<16x16xf32> to vector<16xf32>
    %71 = vector.shape_cast %70 : vector<16xf32> to vector<16x1xf32>
    %72 = tpu.reciprocal %71 {approx = true} : vector<16x1xf32> -> vector<16x1xf32>
    %73 = vector.broadcast %72 : vector<16x1xf32> to vector<16x16xf32>
    %74 = arith.mulf %69, %73 : vector<16x16xf32>
    %75 = vector.extract_strided_slice %15 {offsets = [0, 16], sizes = [16, 8], strides = [1, 1]} : vector<16x32xf32> to vector<16x8xf32>
    %cst_32 = arith.constant dense<0.000000e+00> : vector<16x8xf32>
    %76 = tpu.matmul %74, %75, %cst_32 {dimension_numbers = #tpu.dot_dimension_numbers<[1], [0], [0], [1], [0, 0, 1, 1], [], []>} : vector<16x16xf32>, vector<16x8xf32>, vector<16x8xf32> -> vector<16x8xf32>
    %77 = vector.extract_strided_slice %7 {offsets = [16, 0], sizes = [8, 32], strides = [1, 1]} : vector<32x32xf32> to vector<8x32xf32>
    %cst_33 = arith.constant dense<0.000000e+00> : vector<16x32xf32>
    %78 = tpu.matmul %76, %77, %cst_33 {dimension_numbers = #tpu.dot_dimension_numbers<[1], [0], [0], [1], [0, 0, 1, 1], [], []>} : vector<16x8xf32>, vector<8x32xf32>, vector<16x32xf32> -> vector<16x32xf32>
    %79 = arith.addf %58, %78 : vector<16x32xf32>
    %80 = vector.extract_strided_slice %13 {offsets = [0, 24], sizes = [16, 8], strides = [1, 1]} : vector<16x32xf32> to vector<16x8xf32>
    %81 = vector.extract_strided_slice %14 {offsets = [0, 24], sizes = [16, 8], strides = [1, 1]} : vector<16x32xf32> to vector<16x8xf32>
    %cst_34 = arith.constant dense<0.000000e+00> : vector<16x16xf32>
    %82 = tpu.matmul %80, %81, %cst_34 {dimension_numbers = #tpu.dot_dimension_numbers<[1], [1], [0], [0], [0, 0, 1, 0], [], []>} : vector<16x8xf32>, vector<16x8xf32>, vector<16x16xf32> -> vector<16x16xf32>
    %cst_35 = arith.constant 0.353553385 : f32
    %83 = vector.broadcast %cst_35 : f32 to vector<16x16xf32>
    %84 = arith.mulf %82, %83 : vector<16x16xf32>
    %85 = arith.addf %84, %1 : vector<16x16xf32>
    %cst_36 = arith.constant dense<0xFF800000> : vector<16xf32>
    %86 = vector.multi_reduction <maximumf>, %85, %cst_36 [1] : vector<16x16xf32> to vector<16xf32>
    %87 = vector.shape_cast %86 : vector<16xf32> to vector<16x1xf32>
    %88 = vector.broadcast %87 : vector<16x1xf32> to vector<16x16xf32>
    %89 = arith.subf %85, %88 : vector<16x16xf32>
    %90 = math.exp %89 : vector<16x16xf32>
    %cst_37 = arith.constant dense<0.000000e+00> : vector<16xf32>
    %91 = vector.multi_reduction <add>, %90, %cst_37 [1] : vector<16x16xf32> to vector<16xf32>
    %92 = vector.shape_cast %91 : vector<16xf32> to vector<16x1xf32>
    %93 = tpu.reciprocal %92 {approx = true} : vector<16x1xf32> -> vector<16x1xf32>
    %94 = vector.broadcast %93 : vector<16x1xf32> to vector<16x16xf32>
    %95 = arith.mulf %90, %94 : vector<16x16xf32>
    %96 = vector.extract_strided_slice %15 {offsets = [0, 24], sizes = [16, 8], strides = [1, 1]} : vector<16x32xf32> to vector<16x8xf32>
    %cst_38 = arith.constant dense<0.000000e+00> : vector<16x8xf32>
    %97 = tpu.matmul %95, %96, %cst_38 {dimension_numbers = #tpu.dot_dimension_numbers<[1], [0], [0], [1], [0, 0, 1, 1], [], []>} : vector<16x16xf32>, vector<16x8xf32>, vector<16x8xf32> -> vector<16x8xf32>
    %98 = vector.extract_strided_slice %7 {offsets = [24, 0], sizes = [8, 32], strides = [1, 1]} : vector<32x32xf32> to vector<8x32xf32>
    %cst_39 = arith.constant dense<0.000000e+00> : vector<16x32xf32>
    %99 = tpu.matmul %97, %98, %cst_39 {dimension_numbers = #tpu.dot_dimension_numbers<[1], [0], [0], [1], [0, 0, 1, 1], [], []>} : vector<16x8xf32>, vector<8x32xf32>, vector<16x32xf32> -> vector<16x32xf32>
    %100 = arith.addf %79, %99 : vector<16x32xf32>
    %101 = vector.broadcast %9 : vector<1x32xf32> to vector<16x32xf32>
    %102 = arith.addf %100, %101 : vector<16x32xf32>
    %103 = arith.addf %0, %102 : vector<16x32xf32>
    %c0_40 = arith.constant 0 : index
    %c0_41 = arith.constant 0 : index
    %c0_42 = arith.constant 0 : index
    %104 = vector.load %arg6[%c0_40, %c0_41, %c0_42] : memref<2x1x32xf32, #tpu.memory_space<vmem>>, vector<1x1x32xf32>
    %105 = vector.shape_cast %104 : vector<1x1x32xf32> to vector<1x32xf32>
    %c0_43 = arith.constant 0 : index
    %c0_44 = arith.constant 0 : index
    %c0_45 = arith.constant 0 : index
    %106 = vector.load %arg7[%c0_43, %c0_44, %c0_45] : memref<2x1x32xf32, #tpu.memory_space<vmem>>, vector<1x1x32xf32>
    %107 = vector.shape_cast %106 : vector<1x1x32xf32> to vector<1x32xf32>
    %cst_46 = arith.constant dense<0.000000e+00> : vector<16xf32>
    %108 = vector.multi_reduction <add>, %103, %cst_46 [1] : vector<16x32xf32> to vector<16xf32>
    %109 = vector.shape_cast %108 : vector<16xf32> to vector<16x1xf32>
    %cst_47 = arith.constant 3.200000e+01 : f32
    %110 = vector.broadcast %cst_47 : f32 to vector<16x1xf32>
    %111 = arith.divf %109, %110 : vector<16x1xf32>
    %112 = vector.broadcast %111 : vector<16x1xf32> to vector<16x32xf32>
    %113 = arith.subf %103, %112 : vector<16x32xf32>
    %114 = arith.mulf %113, %113 : vector<16x32xf32>
    %cst_48 = arith.constant dense<0.000000e+00> : vector<16xf32>
    %115 = vector.multi_reduction <add>, %114, %cst_48 [1] : vector<16x32xf32> to vector<16xf32>
    %116 = vector.shape_cast %115 : vector<16xf32> to vector<16x1xf32>
    %cst_49 = arith.constant 3.200000e+01 : f32
    %117 = vector.broadcast %cst_49 : f32 to vector<16x1xf32>
    %118 = arith.divf %116, %117 : vector<16x1xf32>
    %119 = vector.broadcast %111 : vector<16x1xf32> to vector<16x32xf32>
    %120 = arith.subf %103, %119 : vector<16x32xf32>
    %cst_50 = arith.constant 9.99999974E-6 : f32
    %121 = vector.broadcast %cst_50 : f32 to vector<16x1xf32>
    %122 = arith.addf %118, %121 : vector<16x1xf32>
    %123 = math.rsqrt %122 : vector<16x1xf32>
    %124 = vector.broadcast %123 : vector<16x1xf32> to vector<16x32xf32>
    %125 = arith.mulf %120, %124 : vector<16x32xf32>
    %126 = vector.broadcast %105 : vector<1x32xf32> to vector<16x32xf32>
    %127 = arith.mulf %125, %126 : vector<16x32xf32>
    %128 = vector.broadcast %107 : vector<1x32xf32> to vector<16x32xf32>
    %129 = arith.addf %127, %128 : vector<16x32xf32>
    %c0_51 = arith.constant 0 : index
    %c0_52 = arith.constant 0 : index
    %c0_53 = arith.constant 0 : index
    %130 = vector.load %arg8[%c0_51, %c0_52, %c0_53] : memref<2x32x64xf32, #tpu.memory_space<vmem>>, vector<1x32x64xf32>
    %131 = vector.shape_cast %130 : vector<1x32x64xf32> to vector<32x64xf32>
    %c0_54 = arith.constant 0 : index
    %c0_55 = arith.constant 0 : index
    %c0_56 = arith.constant 0 : index
    %132 = vector.load %arg9[%c0_54, %c0_55, %c0_56] : memref<2x1x64xf32, #tpu.memory_space<vmem>>, vector<1x1x64xf32>
    %133 = vector.shape_cast %132 : vector<1x1x64xf32> to vector<1x64xf32>
    %c0_57 = arith.constant 0 : index
    %c0_58 = arith.constant 0 : index
    %c0_59 = arith.constant 0 : index
    %134 = vector.load %arg10[%c0_57, %c0_58, %c0_59] : memref<2x64x32xf32, #tpu.memory_space<vmem>>, vector<1x64x32xf32>
    %135 = vector.shape_cast %134 : vector<1x64x32xf32> to vector<64x32xf32>
    %c0_60 = arith.constant 0 : index
    %c0_61 = arith.constant 0 : index
    %c0_62 = arith.constant 0 : index
    %136 = vector.load %arg11[%c0_60, %c0_61, %c0_62] : memref<2x1x32xf32, #tpu.memory_space<vmem>>, vector<1x1x32xf32>
    %137 = vector.shape_cast %136 : vector<1x1x32xf32> to vector<1x32xf32>
    %cst_63 = arith.constant dense<0.000000e+00> : vector<16x64xf32>
    %138 = tpu.matmul %129, %131, %cst_63 {dimension_numbers = #tpu.dot_dimension_numbers<[1], [0], [0], [1], [0, 0, 1, 1], [], []>} : vector<16x32xf32>, vector<32x64xf32>, vector<16x64xf32> -> vector<16x64xf32>
    %139 = vector.broadcast %133 : vector<1x64xf32> to vector<16x64xf32>
    %140 = arith.addf %138, %139 : vector<16x64xf32>
    %cst_64 = arith.constant 0.000000e+00 : f32
    %141 = vector.broadcast %cst_64 : f32 to vector<16x64xf32>
    %142 = arith.maximumf %140, %141 : vector<16x64xf32>
    %cst_65 = arith.constant dense<0.000000e+00> : vector<16x32xf32>
    %143 = tpu.matmul %142, %135, %cst_65 {dimension_numbers = #tpu.dot_dimension_numbers<[1], [0], [0], [1], [0, 0, 1, 1], [], []>} : vector<16x64xf32>, vector<64x32xf32>, vector<16x32xf32> -> vector<16x32xf32>
    %144 = vector.broadcast %137 : vector<1x32xf32> to vector<16x32xf32>
    %145 = arith.addf %143, %144 : vector<16x32xf32>
    %146 = arith.addf %129, %145 : vector<16x32xf32>
    %c0_66 = arith.constant 0 : index
    %c0_67 = arith.constant 0 : index
    %c0_68 = arith.constant 0 : index
    %147 = vector.load %arg12[%c0_66, %c0_67, %c0_68] : memref<2x1x32xf32, #tpu.memory_space<vmem>>, vector<1x1x32xf32>
    %148 = vector.shape_cast %147 : vector<1x1x32xf32> to vector<1x32xf32>
    %c0_69 = arith.constant 0 : index
    %c0_70 = arith.constant 0 : index
    %c0_71 = arith.constant 0 : index
    %149 = vector.load %arg13[%c0_69, %c0_70, %c0_71] : memref<2x1x32xf32, #tpu.memory_space<vmem>>, vector<1x1x32xf32>
    %150 = vector.shape_cast %149 : vector<1x1x32xf32> to vector<1x32xf32>
    %cst_72 = arith.constant dense<0.000000e+00> : vector<16xf32>
    %151 = vector.multi_reduction <add>, %146, %cst_72 [1] : vector<16x32xf32> to vector<16xf32>
    %152 = vector.shape_cast %151 : vector<16xf32> to vector<16x1xf32>
    %cst_73 = arith.constant 3.200000e+01 : f32
    %153 = vector.broadcast %cst_73 : f32 to vector<16x1xf32>
    %154 = arith.divf %152, %153 : vector<16x1xf32>
    %155 = vector.broadcast %154 : vector<16x1xf32> to vector<16x32xf32>
    %156 = arith.subf %146, %155 : vector<16x32xf32>
    %157 = arith.mulf %156, %156 : vector<16x32xf32>
    %cst_74 = arith.constant dense<0.000000e+00> : vector<16xf32>
    %158 = vector.multi_reduction <add>, %157, %cst_74 [1] : vector<16x32xf32> to vector<16xf32>
    %159 = vector.shape_cast %158 : vector<16xf32> to vector<16x1xf32>
    %cst_75 = arith.constant 3.200000e+01 : f32
    %160 = vector.broadcast %cst_75 : f32 to vector<16x1xf32>
    %161 = arith.divf %159, %160 : vector<16x1xf32>
    %162 = vector.broadcast %154 : vector<16x1xf32> to vector<16x32xf32>
    %163 = arith.subf %146, %162 : vector<16x32xf32>
    %cst_76 = arith.constant 9.99999974E-6 : f32
    %164 = vector.broadcast %cst_76 : f32 to vector<16x1xf32>
    %165 = arith.addf %161, %164 : vector<16x1xf32>
    %166 = math.rsqrt %165 : vector<16x1xf32>
    %167 = vector.broadcast %166 : vector<16x1xf32> to vector<16x32xf32>
    %168 = arith.mulf %163, %167 : vector<16x32xf32>
    %169 = vector.broadcast %148 : vector<1x32xf32> to vector<16x32xf32>
    %170 = arith.mulf %168, %169 : vector<16x32xf32>
    %171 = vector.broadcast %150 : vector<1x32xf32> to vector<16x32xf32>
    %172 = arith.addf %170, %171 : vector<16x32xf32>
    %c1 = arith.constant 1 : index
    %c0_77 = arith.constant 0 : index
    %c0_78 = arith.constant 0 : index
    %173 = vector.load %arg2[%c1, %c0_77, %c0_78] : memref<2x32x96xf32, #tpu.memory_space<vmem>>, vector<1x32x96xf32>
    %174 = vector.shape_cast %173 : vector<1x32x96xf32> to vector<32x96xf32>
    %c1_79 = arith.constant 1 : index
    %c0_80 = arith.constant 0 : index
    %c0_81 = arith.constant 0 : index
    %175 = vector.load %arg3[%c1_79, %c0_80, %c0_81] : memref<2x1x96xf32, #tpu.memory_space<vmem>>, vector<1x1x96xf32>
    %176 = vector.shape_cast %175 : vector<1x1x96xf32> to vector<1x96xf32>
    %c1_82 = arith.constant 1 : index
    %c0_83 = arith.constant 0 : index
    %c0_84 = arith.constant 0 : index
    %177 = vector.load %arg4[%c1_82, %c0_83, %c0_84] : memref<2x32x32xf32, #tpu.memory_space<vmem>>, vector<1x32x32xf32>
    %178 = vector.shape_cast %177 : vector<1x32x32xf32> to vector<32x32xf32>
    %c1_85 = arith.constant 1 : index
    %c0_86 = arith.constant 0 : index
    %c0_87 = arith.constant 0 : index
    %179 = vector.load %arg5[%c1_85, %c0_86, %c0_87] : memref<2x1x32xf32, #tpu.memory_space<vmem>>, vector<1x1x32xf32>
    %180 = vector.shape_cast %179 : vector<1x1x32xf32> to vector<1x32xf32>
    %cst_88 = arith.constant dense<0.000000e+00> : vector<16x96xf32>
    %181 = tpu.matmul %172, %174, %cst_88 {dimension_numbers = #tpu.dot_dimension_numbers<[1], [0], [0], [1], [0, 0, 1, 1], [], []>} : vector<16x32xf32>, vector<32x96xf32>, vector<16x96xf32> -> vector<16x96xf32>
    %182 = vector.broadcast %176 : vector<1x96xf32> to vector<16x96xf32>
    %183 = arith.addf %181, %182 : vector<16x96xf32>
    %184 = vector.extract_strided_slice %183 {offsets = [0, 0], sizes = [16, 32], strides = [1, 1]} : vector<16x96xf32> to vector<16x32xf32>
    %185 = vector.extract_strided_slice %183 {offsets = [0, 32], sizes = [16, 32], strides = [1, 1]} : vector<16x96xf32> to vector<16x32xf32>
    %186 = vector.extract_strided_slice %183 {offsets = [0, 64], sizes = [16, 32], strides = [1, 1]} : vector<16x96xf32> to vector<16x32xf32>
    %cst_89 = arith.constant 0.000000e+00 : f32
    %187 = vector.broadcast %cst_89 : f32 to vector<16x32xf32>
    %188 = vector.extract_strided_slice %184 {offsets = [0, 0], sizes = [16, 8], strides = [1, 1]} : vector<16x32xf32> to vector<16x8xf32>
    %189 = vector.extract_strided_slice %185 {offsets = [0, 0], sizes = [16, 8], strides = [1, 1]} : vector<16x32xf32> to vector<16x8xf32>
    %cst_90 = arith.constant dense<0.000000e+00> : vector<16x16xf32>
    %190 = tpu.matmul %188, %189, %cst_90 {dimension_numbers = #tpu.dot_dimension_numbers<[1], [1], [0], [0], [0, 0, 1, 0], [], []>} : vector<16x8xf32>, vector<16x8xf32>, vector<16x16xf32> -> vector<16x16xf32>
    %cst_91 = arith.constant 0.353553385 : f32
    %191 = vector.broadcast %cst_91 : f32 to vector<16x16xf32>
    %192 = arith.mulf %190, %191 : vector<16x16xf32>
    %193 = arith.addf %192, %1 : vector<16x16xf32>
    %cst_92 = arith.constant dense<0xFF800000> : vector<16xf32>
    %194 = vector.multi_reduction <maximumf>, %193, %cst_92 [1] : vector<16x16xf32> to vector<16xf32>
    %195 = vector.shape_cast %194 : vector<16xf32> to vector<16x1xf32>
    %196 = vector.broadcast %195 : vector<16x1xf32> to vector<16x16xf32>
    %197 = arith.subf %193, %196 : vector<16x16xf32>
    %198 = math.exp %197 : vector<16x16xf32>
    %cst_93 = arith.constant dense<0.000000e+00> : vector<16xf32>
    %199 = vector.multi_reduction <add>, %198, %cst_93 [1] : vector<16x16xf32> to vector<16xf32>
    %200 = vector.shape_cast %199 : vector<16xf32> to vector<16x1xf32>
    %201 = tpu.reciprocal %200 {approx = true} : vector<16x1xf32> -> vector<16x1xf32>
    %202 = vector.broadcast %201 : vector<16x1xf32> to vector<16x16xf32>
    %203 = arith.mulf %198, %202 : vector<16x16xf32>
    %204 = vector.extract_strided_slice %186 {offsets = [0, 0], sizes = [16, 8], strides = [1, 1]} : vector<16x32xf32> to vector<16x8xf32>
    %cst_94 = arith.constant dense<0.000000e+00> : vector<16x8xf32>
    %205 = tpu.matmul %203, %204, %cst_94 {dimension_numbers = #tpu.dot_dimension_numbers<[1], [0], [0], [1], [0, 0, 1, 1], [], []>} : vector<16x16xf32>, vector<16x8xf32>, vector<16x8xf32> -> vector<16x8xf32>
    %206 = vector.extract_strided_slice %178 {offsets = [0, 0], sizes = [8, 32], strides = [1, 1]} : vector<32x32xf32> to vector<8x32xf32>
    %cst_95 = arith.constant dense<0.000000e+00> : vector<16x32xf32>
    %207 = tpu.matmul %205, %206, %cst_95 {dimension_numbers = #tpu.dot_dimension_numbers<[1], [0], [0], [1], [0, 0, 1, 1], [], []>} : vector<16x8xf32>, vector<8x32xf32>, vector<16x32xf32> -> vector<16x32xf32>
    %208 = arith.addf %187, %207 : vector<16x32xf32>
    %209 = vector.extract_strided_slice %184 {offsets = [0, 8], sizes = [16, 8], strides = [1, 1]} : vector<16x32xf32> to vector<16x8xf32>
    %210 = vector.extract_strided_slice %185 {offsets = [0, 8], sizes = [16, 8], strides = [1, 1]} : vector<16x32xf32> to vector<16x8xf32>
    %cst_96 = arith.constant dense<0.000000e+00> : vector<16x16xf32>
    %211 = tpu.matmul %209, %210, %cst_96 {dimension_numbers = #tpu.dot_dimension_numbers<[1], [1], [0], [0], [0, 0, 1, 0], [], []>} : vector<16x8xf32>, vector<16x8xf32>, vector<16x16xf32> -> vector<16x16xf32>
    %cst_97 = arith.constant 0.353553385 : f32
    %212 = vector.broadcast %cst_97 : f32 to vector<16x16xf32>
    %213 = arith.mulf %211, %212 : vector<16x16xf32>
    %214 = arith.addf %213, %1 : vector<16x16xf32>
    %cst_98 = arith.constant dense<0xFF800000> : vector<16xf32>
    %215 = vector.multi_reduction <maximumf>, %214, %cst_98 [1] : vector<16x16xf32> to vector<16xf32>
    %216 = vector.shape_cast %215 : vector<16xf32> to vector<16x1xf32>
    %217 = vector.broadcast %216 : vector<16x1xf32> to vector<16x16xf32>
    %218 = arith.subf %214, %217 : vector<16x16xf32>
    %219 = math.exp %218 : vector<16x16xf32>
    %cst_99 = arith.constant dense<0.000000e+00> : vector<16xf32>
    %220 = vector.multi_reduction <add>, %219, %cst_99 [1] : vector<16x16xf32> to vector<16xf32>
    %221 = vector.shape_cast %220 : vector<16xf32> to vector<16x1xf32>
    %222 = tpu.reciprocal %221 {approx = true} : vector<16x1xf32> -> vector<16x1xf32>
    %223 = vector.broadcast %222 : vector<16x1xf32> to vector<16x16xf32>
    %224 = arith.mulf %219, %223 : vector<16x16xf32>
    %225 = vector.extract_strided_slice %186 {offsets = [0, 8], sizes = [16, 8], strides = [1, 1]} : vector<16x32xf32> to vector<16x8xf32>
    %cst_100 = arith.constant dense<0.000000e+00> : vector<16x8xf32>
    %226 = tpu.matmul %224, %225, %cst_100 {dimension_numbers = #tpu.dot_dimension_numbers<[1], [0], [0], [1], [0, 0, 1, 1], [], []>} : vector<16x16xf32>, vector<16x8xf32>, vector<16x8xf32> -> vector<16x8xf32>
    %227 = vector.extract_strided_slice %178 {offsets = [8, 0], sizes = [8, 32], strides = [1, 1]} : vector<32x32xf32> to vector<8x32xf32>
    %cst_101 = arith.constant dense<0.000000e+00> : vector<16x32xf32>
    %228 = tpu.matmul %226, %227, %cst_101 {dimension_numbers = #tpu.dot_dimension_numbers<[1], [0], [0], [1], [0, 0, 1, 1], [], []>} : vector<16x8xf32>, vector<8x32xf32>, vector<16x32xf32> -> vector<16x32xf32>
    %229 = arith.addf %208, %228 : vector<16x32xf32>
    %230 = vector.extract_strided_slice %184 {offsets = [0, 16], sizes = [16, 8], strides = [1, 1]} : vector<16x32xf32> to vector<16x8xf32>
    %231 = vector.extract_strided_slice %185 {offsets = [0, 16], sizes = [16, 8], strides = [1, 1]} : vector<16x32xf32> to vector<16x8xf32>
    %cst_102 = arith.constant dense<0.000000e+00> : vector<16x16xf32>
    %232 = tpu.matmul %230, %231, %cst_102 {dimension_numbers = #tpu.dot_dimension_numbers<[1], [1], [0], [0], [0, 0, 1, 0], [], []>} : vector<16x8xf32>, vector<16x8xf32>, vector<16x16xf32> -> vector<16x16xf32>
    %cst_103 = arith.constant 0.353553385 : f32
    %233 = vector.broadcast %cst_103 : f32 to vector<16x16xf32>
    %234 = arith.mulf %232, %233 : vector<16x16xf32>
    %235 = arith.addf %234, %1 : vector<16x16xf32>
    %cst_104 = arith.constant dense<0xFF800000> : vector<16xf32>
    %236 = vector.multi_reduction <maximumf>, %235, %cst_104 [1] : vector<16x16xf32> to vector<16xf32>
    %237 = vector.shape_cast %236 : vector<16xf32> to vector<16x1xf32>
    %238 = vector.broadcast %237 : vector<16x1xf32> to vector<16x16xf32>
    %239 = arith.subf %235, %238 : vector<16x16xf32>
    %240 = math.exp %239 : vector<16x16xf32>
    %cst_105 = arith.constant dense<0.000000e+00> : vector<16xf32>
    %241 = vector.multi_reduction <add>, %240, %cst_105 [1] : vector<16x16xf32> to vector<16xf32>
    %242 = vector.shape_cast %241 : vector<16xf32> to vector<16x1xf32>
    %243 = tpu.reciprocal %242 {approx = true} : vector<16x1xf32> -> vector<16x1xf32>
    %244 = vector.broadcast %243 : vector<16x1xf32> to vector<16x16xf32>
    %245 = arith.mulf %240, %244 : vector<16x16xf32>
    %246 = vector.extract_strided_slice %186 {offsets = [0, 16], sizes = [16, 8], strides = [1, 1]} : vector<16x32xf32> to vector<16x8xf32>
    %cst_106 = arith.constant dense<0.000000e+00> : vector<16x8xf32>
    %247 = tpu.matmul %245, %246, %cst_106 {dimension_numbers = #tpu.dot_dimension_numbers<[1], [0], [0], [1], [0, 0, 1, 1], [], []>} : vector<16x16xf32>, vector<16x8xf32>, vector<16x8xf32> -> vector<16x8xf32>
    %248 = vector.extract_strided_slice %178 {offsets = [16, 0], sizes = [8, 32], strides = [1, 1]} : vector<32x32xf32> to vector<8x32xf32>
    %cst_107 = arith.constant dense<0.000000e+00> : vector<16x32xf32>
    %249 = tpu.matmul %247, %248, %cst_107 {dimension_numbers = #tpu.dot_dimension_numbers<[1], [0], [0], [1], [0, 0, 1, 1], [], []>} : vector<16x8xf32>, vector<8x32xf32>, vector<16x32xf32> -> vector<16x32xf32>
    %250 = arith.addf %229, %249 : vector<16x32xf32>
    %251 = vector.extract_strided_slice %184 {offsets = [0, 24], sizes = [16, 8], strides = [1, 1]} : vector<16x32xf32> to vector<16x8xf32>
    %252 = vector.extract_strided_slice %185 {offsets = [0, 24], sizes = [16, 8], strides = [1, 1]} : vector<16x32xf32> to vector<16x8xf32>
    %cst_108 = arith.constant dense<0.000000e+00> : vector<16x16xf32>
    %253 = tpu.matmul %251, %252, %cst_108 {dimension_numbers = #tpu.dot_dimension_numbers<[1], [1], [0], [0], [0, 0, 1, 0], [], []>} : vector<16x8xf32>, vector<16x8xf32>, vector<16x16xf32> -> vector<16x16xf32>
    %cst_109 = arith.constant 0.353553385 : f32
    %254 = vector.broadcast %cst_109 : f32 to vector<16x16xf32>
    %255 = arith.mulf %253, %254 : vector<16x16xf32>
    %256 = arith.addf %255, %1 : vector<16x16xf32>
    %cst_110 = arith.constant dense<0xFF800000> : vector<16xf32>
    %257 = vector.multi_reduction <maximumf>, %256, %cst_110 [1] : vector<16x16xf32> to vector<16xf32>
    %258 = vector.shape_cast %257 : vector<16xf32> to vector<16x1xf32>
    %259 = vector.broadcast %258 : vector<16x1xf32> to vector<16x16xf32>
    %260 = arith.subf %256, %259 : vector<16x16xf32>
    %261 = math.exp %260 : vector<16x16xf32>
    %cst_111 = arith.constant dense<0.000000e+00> : vector<16xf32>
    %262 = vector.multi_reduction <add>, %261, %cst_111 [1] : vector<16x16xf32> to vector<16xf32>
    %263 = vector.shape_cast %262 : vector<16xf32> to vector<16x1xf32>
    %264 = tpu.reciprocal %263 {approx = true} : vector<16x1xf32> -> vector<16x1xf32>
    %265 = vector.broadcast %264 : vector<16x1xf32> to vector<16x16xf32>
    %266 = arith.mulf %261, %265 : vector<16x16xf32>
    %267 = vector.extract_strided_slice %186 {offsets = [0, 24], sizes = [16, 8], strides = [1, 1]} : vector<16x32xf32> to vector<16x8xf32>
    %cst_112 = arith.constant dense<0.000000e+00> : vector<16x8xf32>
    %268 = tpu.matmul %266, %267, %cst_112 {dimension_numbers = #tpu.dot_dimension_numbers<[1], [0], [0], [1], [0, 0, 1, 1], [], []>} : vector<16x16xf32>, vector<16x8xf32>, vector<16x8xf32> -> vector<16x8xf32>
    %269 = vector.extract_strided_slice %178 {offsets = [24, 0], sizes = [8, 32], strides = [1, 1]} : vector<32x32xf32> to vector<8x32xf32>
    %cst_113 = arith.constant dense<0.000000e+00> : vector<16x32xf32>
    %270 = tpu.matmul %268, %269, %cst_113 {dimension_numbers = #tpu.dot_dimension_numbers<[1], [0], [0], [1], [0, 0, 1, 1], [], []>} : vector<16x8xf32>, vector<8x32xf32>, vector<16x32xf32> -> vector<16x32xf32>
    %271 = arith.addf %250, %270 : vector<16x32xf32>
    %272 = vector.broadcast %180 : vector<1x32xf32> to vector<16x32xf32>
    %273 = arith.addf %271, %272 : vector<16x32xf32>
    %274 = arith.addf %172, %273 : vector<16x32xf32>
    %c1_114 = arith.constant 1 : index
    %c0_115 = arith.constant 0 : index
    %c0_116 = arith.constant 0 : index
    %275 = vector.load %arg6[%c1_114, %c0_115, %c0_116] : memref<2x1x32xf32, #tpu.memory_space<vmem>>, vector<1x1x32xf32>
    %276 = vector.shape_cast %275 : vector<1x1x32xf32> to vector<1x32xf32>
    %c1_117 = arith.constant 1 : index
    %c0_118 = arith.constant 0 : index
    %c0_119 = arith.constant 0 : index
    %277 = vector.load %arg7[%c1_117, %c0_118, %c0_119] : memref<2x1x32xf32, #tpu.memory_space<vmem>>, vector<1x1x32xf32>
    %278 = vector.shape_cast %277 : vector<1x1x32xf32> to vector<1x32xf32>
    %cst_120 = arith.constant dense<0.000000e+00> : vector<16xf32>
    %279 = vector.multi_reduction <add>, %274, %cst_120 [1] : vector<16x32xf32> to vector<16xf32>
    %280 = vector.shape_cast %279 : vector<16xf32> to vector<16x1xf32>
    %cst_121 = arith.constant 3.200000e+01 : f32
    %281 = vector.broadcast %cst_121 : f32 to vector<16x1xf32>
    %282 = arith.divf %280, %281 : vector<16x1xf32>
    %283 = vector.broadcast %282 : vector<16x1xf32> to vector<16x32xf32>
    %284 = arith.subf %274, %283 : vector<16x32xf32>
    %285 = arith.mulf %284, %284 : vector<16x32xf32>
    %cst_122 = arith.constant dense<0.000000e+00> : vector<16xf32>
    %286 = vector.multi_reduction <add>, %285, %cst_122 [1] : vector<16x32xf32> to vector<16xf32>
    %287 = vector.shape_cast %286 : vector<16xf32> to vector<16x1xf32>
    %cst_123 = arith.constant 3.200000e+01 : f32
    %288 = vector.broadcast %cst_123 : f32 to vector<16x1xf32>
    %289 = arith.divf %287, %288 : vector<16x1xf32>
    %290 = vector.broadcast %282 : vector<16x1xf32> to vector<16x32xf32>
    %291 = arith.subf %274, %290 : vector<16x32xf32>
    %cst_124 = arith.constant 9.99999974E-6 : f32
    %292 = vector.broadcast %cst_124 : f32 to vector<16x1xf32>
    %293 = arith.addf %289, %292 : vector<16x1xf32>
    %294 = math.rsqrt %293 : vector<16x1xf32>
    %295 = vector.broadcast %294 : vector<16x1xf32> to vector<16x32xf32>
    %296 = arith.mulf %291, %295 : vector<16x32xf32>
    %297 = vector.broadcast %276 : vector<1x32xf32> to vector<16x32xf32>
    %298 = arith.mulf %296, %297 : vector<16x32xf32>
    %299 = vector.broadcast %278 : vector<1x32xf32> to vector<16x32xf32>
    %300 = arith.addf %298, %299 : vector<16x32xf32>
    %c1_125 = arith.constant 1 : index
    %c0_126 = arith.constant 0 : index
    %c0_127 = arith.constant 0 : index
    %301 = vector.load %arg8[%c1_125, %c0_126, %c0_127] : memref<2x32x64xf32, #tpu.memory_space<vmem>>, vector<1x32x64xf32>
    %302 = vector.shape_cast %301 : vector<1x32x64xf32> to vector<32x64xf32>
    %c1_128 = arith.constant 1 : index
    %c0_129 = arith.constant 0 : index
    %c0_130 = arith.constant 0 : index
    %303 = vector.load %arg9[%c1_128, %c0_129, %c0_130] : memref<2x1x64xf32, #tpu.memory_space<vmem>>, vector<1x1x64xf32>
    %304 = vector.shape_cast %303 : vector<1x1x64xf32> to vector<1x64xf32>
    %c1_131 = arith.constant 1 : index
    %c0_132 = arith.constant 0 : index
    %c0_133 = arith.constant 0 : index
    %305 = vector.load %arg10[%c1_131, %c0_132, %c0_133] : memref<2x64x32xf32, #tpu.memory_space<vmem>>, vector<1x64x32xf32>
    %306 = vector.shape_cast %305 : vector<1x64x32xf32> to vector<64x32xf32>
    %c1_134 = arith.constant 1 : index
    %c0_135 = arith.constant 0 : index
    %c0_136 = arith.constant 0 : index
    %307 = vector.load %arg11[%c1_134, %c0_135, %c0_136] : memref<2x1x32xf32, #tpu.memory_space<vmem>>, vector<1x1x32xf32>
    %308 = vector.shape_cast %307 : vector<1x1x32xf32> to vector<1x32xf32>
    %cst_137 = arith.constant dense<0.000000e+00> : vector<16x64xf32>
    %309 = tpu.matmul %300, %302, %cst_137 {dimension_numbers = #tpu.dot_dimension_numbers<[1], [0], [0], [1], [0, 0, 1, 1], [], []>} : vector<16x32xf32>, vector<32x64xf32>, vector<16x64xf32> -> vector<16x64xf32>
    %310 = vector.broadcast %304 : vector<1x64xf32> to vector<16x64xf32>
    %311 = arith.addf %309, %310 : vector<16x64xf32>
    %cst_138 = arith.constant 0.000000e+00 : f32
    %312 = vector.broadcast %cst_138 : f32 to vector<16x64xf32>
    %313 = arith.maximumf %311, %312 : vector<16x64xf32>
    %cst_139 = arith.constant dense<0.000000e+00> : vector<16x32xf32>
    %314 = tpu.matmul %313, %306, %cst_139 {dimension_numbers = #tpu.dot_dimension_numbers<[1], [0], [0], [1], [0, 0, 1, 1], [], []>} : vector<16x64xf32>, vector<64x32xf32>, vector<16x32xf32> -> vector<16x32xf32>
    %315 = vector.broadcast %308 : vector<1x32xf32> to vector<16x32xf32>
    %316 = arith.addf %314, %315 : vector<16x32xf32>
    %317 = arith.addf %300, %316 : vector<16x32xf32>
    %c1_140 = arith.constant 1 : index
    %c0_141 = arith.constant 0 : index
    %c0_142 = arith.constant 0 : index
    %318 = vector.load %arg12[%c1_140, %c0_141, %c0_142] : memref<2x1x32xf32, #tpu.memory_space<vmem>>, vector<1x1x32xf32>
    %319 = vector.shape_cast %318 : vector<1x1x32xf32> to vector<1x32xf32>
    %c1_143 = arith.constant 1 : index
    %c0_144 = arith.constant 0 : index
    %c0_145 = arith.constant 0 : index
    %320 = vector.load %arg13[%c1_143, %c0_144, %c0_145] : memref<2x1x32xf32, #tpu.memory_space<vmem>>, vector<1x1x32xf32>
    %321 = vector.shape_cast %320 : vector<1x1x32xf32> to vector<1x32xf32>
    %cst_146 = arith.constant dense<0.000000e+00> : vector<16xf32>
    %322 = vector.multi_reduction <add>, %317, %cst_146 [1] : vector<16x32xf32> to vector<16xf32>
    %323 = vector.shape_cast %322 : vector<16xf32> to vector<16x1xf32>
    %cst_147 = arith.constant 3.200000e+01 : f32
    %324 = vector.broadcast %cst_147 : f32 to vector<16x1xf32>
    %325 = arith.divf %323, %324 : vector<16x1xf32>
    %326 = vector.broadcast %325 : vector<16x1xf32> to vector<16x32xf32>
    %327 = arith.subf %317, %326 : vector<16x32xf32>
    %328 = arith.mulf %327, %327 : vector<16x32xf32>
    %cst_148 = arith.constant dense<0.000000e+00> : vector<16xf32>
    %329 = vector.multi_reduction <add>, %328, %cst_148 [1] : vector<16x32xf32> to vector<16xf32>
    %330 = vector.shape_cast %329 : vector<16xf32> to vector<16x1xf32>
    %cst_149 = arith.constant 3.200000e+01 : f32
    %331 = vector.broadcast %cst_149 : f32 to vector<16x1xf32>
    %332 = arith.divf %330, %331 : vector<16x1xf32>
    %333 = vector.broadcast %325 : vector<16x1xf32> to vector<16x32xf32>
    %334 = arith.subf %317, %333 : vector<16x32xf32>
    %cst_150 = arith.constant 9.99999974E-6 : f32
    %335 = vector.broadcast %cst_150 : f32 to vector<16x1xf32>
    %336 = arith.addf %332, %335 : vector<16x1xf32>
    %337 = math.rsqrt %336 : vector<16x1xf32>
    %338 = vector.broadcast %337 : vector<16x1xf32> to vector<16x32xf32>
    %339 = arith.mulf %334, %338 : vector<16x32xf32>
    %340 = vector.broadcast %319 : vector<1x32xf32> to vector<16x32xf32>
    %341 = arith.mulf %339, %340 : vector<16x32xf32>
    %342 = vector.broadcast %321 : vector<1x32xf32> to vector<16x32xf32>
    %343 = arith.addf %341, %342 : vector<16x32xf32>
    %c0_151 = arith.constant 0 : index
    %c0_152 = arith.constant 0 : index
    %344 = vector.load %arg14[%c0_151, %c0_152] : memref<16x32xf32, #tpu.memory_space<vmem>>, vector<16x32xf32>
    tpu.vector_store %arg14[%c0_151, %c0_152], %343 {strides = array<i32>} : memref<16x32xf32, #tpu.memory_space<vmem>>, vector<16x32xf32>,
    return
  }
}

module attributes {stable_mosaic.version = 11 : i64} {
  func.func @decoder_kernel(%arg0: memref<16x32xf32, #tpu.memory_space<vmem>>, %arg1: memref<16x32xf32, #tpu.memory_space<vmem>>, %arg2: memref<16x16xf32, #tpu.memory_space<vmem>>, %arg3: memref<2x32x96xf32, #tpu.memory_space<vmem>>, %arg4: memref<2x1x96xf32, #tpu.memory_space<vmem>>, %arg5: memref<2x32x32xf32, #tpu.memory_space<vmem>>, %arg6: memref<2x1x32xf32, #tpu.memory_space<vmem>>, %arg7: memref<2x1x32xf32, #tpu.memory_space<vmem>>, %arg8: memref<2x1x32xf32, #tpu.memory_space<vmem>>, %arg9: memref<2x32x96xf32, #tpu.memory_space<vmem>>, %arg10: memref<2x1x96xf32, #tpu.memory_space<vmem>>, %arg11: memref<2x32x32xf32, #tpu.memory_space<vmem>>, %arg12: memref<2x1x32xf32, #tpu.memory_space<vmem>>, %arg13: memref<2x1x32xf32, #tpu.memory_space<vmem>>, %arg14: memref<2x1x32xf32, #tpu.memory_space<vmem>>, %arg15: memref<2x32x64xf32, #tpu.memory_space<vmem>>, %arg16: memref<2x1x64xf32, #tpu.memory_space<vmem>>, %arg17: memref<2x64x32xf32, #tpu.memory_space<vmem>>, %arg18: memref<2x1x32xf32, #tpu.memory_space<vmem>>, %arg19: memref<2x1x32xf32, #tpu.memory_space<vmem>>, %arg20: memref<2x1x32xf32, #tpu.memory_space<vmem>>, %arg21: memref<32x128xf32, #tpu.memory_space<vmem>>, %arg22: memref<1x128xf32, #tpu.memory_space<vmem>>, %arg23: memref<16x128xf32, #tpu.memory_space<vmem>>) attributes {dimension_semantics = [], scalar_prefetch = 0 : i64, scratch_operands = 0 : i64, tpu.core_type = #tpu.core_type<tc>} {
    %c0 = arith.constant 0 : index
    %c0_0 = arith.constant 0 : index
    %0 = vector.load %arg0[%c0, %c0_0] : memref<16x32xf32, #tpu.memory_space<vmem>>, vector<16x32xf32>
    %c0_1 = arith.constant 0 : index
    %c0_2 = arith.constant 0 : index
    %1 = vector.load %arg1[%c0_1, %c0_2] : memref<16x32xf32, #tpu.memory_space<vmem>>, vector<16x32xf32>
    %c0_3 = arith.constant 0 : index
    %c0_4 = arith.constant 0 : index
    %2 = vector.load %arg2[%c0_3, %c0_4] : memref<16x16xf32, #tpu.memory_space<vmem>>, vector<16x16xf32>
    %c0_5 = arith.constant 0 : index
    %c0_6 = arith.constant 0 : index
    %c0_7 = arith.constant 0 : index
    %3 = vector.load %arg3[%c0_5, %c0_6, %c0_7] : memref<2x32x96xf32, #tpu.memory_space<vmem>>, vector<1x32x96xf32>
    %4 = vector.shape_cast %3 : vector<1x32x96xf32> to vector<32x96xf32>
    %c0_8 = arith.constant 0 : index
    %c0_9 = arith.constant 0 : index
    %c0_10 = arith.constant 0 : index
    %5 = vector.load %arg4[%c0_8, %c0_9, %c0_10] : memref<2x1x96xf32, #tpu.memory_space<vmem>>, vector<1x1x96xf32>
    %6 = vector.shape_cast %5 : vector<1x1x96xf32> to vector<1x96xf32>
    %c0_11 = arith.constant 0 : index
    %c0_12 = arith.constant 0 : index
    %c0_13 = arith.constant 0 : index
    %7 = vector.load %arg5[%c0_11, %c0_12, %c0_13] : memref<2x32x32xf32, #tpu.memory_space<vmem>>, vector<1x32x32xf32>
    %8 = vector.shape_cast %7 : vector<1x32x32xf32> to vector<32x32xf32>
    %c0_14 = arith.constant 0 : index
    %c0_15 = arith.constant 0 : index
    %c0_16 = arith.constant 0 : index
    %9 = vector.load %arg6[%c0_14, %c0_15, %c0_16] : memref<2x1x32xf32, #tpu.memory_space<vmem>>, vector<1x1x32xf32>
    %10 = vector.shape_cast %9 : vector<1x1x32xf32> to vector<1x32xf32>
    %cst = arith.constant dense<0.000000e+00> : vector<16x96xf32>
    %11 = tpu.matmul %0, %4, %cst {dimension_numbers = #tpu.dot_dimension_numbers<[1], [0], [0], [1], [0, 0, 1, 1], [], []>} : vector<16x32xf32>, vector<32x96xf32>, vector<16x96xf32> -> vector<16x96xf32>
    %12 = vector.broadcast %6 : vector<1x96xf32> to vector<16x96xf32>
    %13 = arith.addf %11, %12 : vector<16x96xf32>
    %14 = vector.extract_strided_slice %13 {offsets = [0, 0], sizes = [16, 32], strides = [1, 1]} : vector<16x96xf32> to vector<16x32xf32>
    %15 = vector.extract_strided_slice %13 {offsets = [0, 32], sizes = [16, 32], strides = [1, 1]} : vector<16x96xf32> to vector<16x32xf32>
    %16 = vector.extract_strided_slice %13 {offsets = [0, 64], sizes = [16, 32], strides = [1, 1]} : vector<16x96xf32> to vector<16x32xf32>
    %cst_17 = arith.constant 0.000000e+00 : f32
    %17 = vector.broadcast %cst_17 : f32 to vector<16x32xf32>
    %18 = vector.extract_strided_slice %14 {offsets = [0, 0], sizes = [16, 8], strides = [1, 1]} : vector<16x32xf32> to vector<16x8xf32>
    %19 = vector.extract_strided_slice %15 {offsets = [0, 0], sizes = [16, 8], strides = [1, 1]} : vector<16x32xf32> to vector<16x8xf32>
    %cst_18 = arith.constant dense<0.000000e+00> : vector<16x16xf32>
    %20 = tpu.matmul %18, %19, %cst_18 {dimension_numbers = #tpu.dot_dimension_numbers<[1], [1], [0], [0], [0, 0, 1, 0], [], []>} : vector<16x8xf32>, vector<16x8xf32>, vector<16x16xf32> -> vector<16x16xf32>
    %cst_19 = arith.constant 0.353553385 : f32
    %21 = vector.broadcast %cst_19 : f32 to vector<16x16xf32>
    %22 = arith.mulf %20, %21 : vector<16x16xf32>
    %23 = arith.addf %22, %2 : vector<16x16xf32>
    %cst_20 = arith.constant dense<0xFF800000> : vector<16xf32>
    %24 = vector.multi_reduction <maximumf>, %23, %cst_20 [1] : vector<16x16xf32> to vector<16xf32>
    %25 = vector.shape_cast %24 : vector<16xf32> to vector<16x1xf32>
    %26 = vector.broadcast %25 : vector<16x1xf32> to vector<16x16xf32>
    %27 = arith.subf %23, %26 : vector<16x16xf32>
    %28 = math.exp %27 : vector<16x16xf32>
    %cst_21 = arith.constant dense<0.000000e+00> : vector<16xf32>
    %29 = vector.multi_reduction <add>, %28, %cst_21 [1] : vector<16x16xf32> to vector<16xf32>
    %30 = vector.shape_cast %29 : vector<16xf32> to vector<16x1xf32>
    %31 = tpu.reciprocal %30 {approx = true} : vector<16x1xf32> -> vector<16x1xf32>
    %32 = vector.broadcast %31 : vector<16x1xf32> to vector<16x16xf32>
    %33 = arith.mulf %28, %32 : vector<16x16xf32>
    %34 = vector.extract_strided_slice %16 {offsets = [0, 0], sizes = [16, 8], strides = [1, 1]} : vector<16x32xf32> to vector<16x8xf32>
    %cst_22 = arith.constant dense<0.000000e+00> : vector<16x8xf32>
    %35 = tpu.matmul %33, %34, %cst_22 {dimension_numbers = #tpu.dot_dimension_numbers<[1], [0], [0], [1], [0, 0, 1, 1], [], []>} : vector<16x16xf32>, vector<16x8xf32>, vector<16x8xf32> -> vector<16x8xf32>
    %36 = vector.extract_strided_slice %8 {offsets = [0, 0], sizes = [8, 32], strides = [1, 1]} : vector<32x32xf32> to vector<8x32xf32>
    %cst_23 = arith.constant dense<0.000000e+00> : vector<16x32xf32>
    %37 = tpu.matmul %35, %36, %cst_23 {dimension_numbers = #tpu.dot_dimension_numbers<[1], [0], [0], [1], [0, 0, 1, 1], [], []>} : vector<16x8xf32>, vector<8x32xf32>, vector<16x32xf32> -> vector<16x32xf32>
    %38 = arith.addf %17, %37 : vector<16x32xf32>
    %39 = vector.extract_strided_slice %14 {offsets = [0, 8], sizes = [16, 8], strides = [1, 1]} : vector<16x32xf32> to vector<16x8xf32>
    %40 = vector.extract_strided_slice %15 {offsets = [0, 8], sizes = [16, 8], strides = [1, 1]} : vector<16x32xf32> to vector<16x8xf32>
    %cst_24 = arith.constant dense<0.000000e+00> : vector<16x16xf32>
    %41 = tpu.matmul %39, %40, %cst_24 {dimension_numbers = #tpu.dot_dimension_numbers<[1], [1], [0], [0], [0, 0, 1, 0], [], []>} : vector<16x8xf32>, vector<16x8xf32>, vector<16x16xf32> -> vector<16x16xf32>
    %cst_25 = arith.constant 0.353553385 : f32
    %42 = vector.broadcast %cst_25 : f32 to vector<16x16xf32>
    %43 = arith.mulf %41, %42 : vector<16x16xf32>
    %44 = arith.addf %43, %2 : vector<16x16xf32>
    %cst_26 = arith.constant dense<0xFF800000> : vector<16xf32>
    %45 = vector.multi_reduction <maximumf>, %44, %cst_26 [1] : vector<16x16xf32> to vector<16xf32>
    %46 = vector.shape_cast %45 : vector<16xf32> to vector<16x1xf32>
    %47 = vector.broadcast %46 : vector<16x1xf32> to vector<16x16xf32>
    %48 = arith.subf %44, %47 : vector<16x16xf32>
    %49 = math.exp %48 : vector<16x16xf32>
    %cst_27 = arith.constant dense<0.000000e+00> : vector<16xf32>
    %50 = vector.multi_reduction <add>, %49, %cst_27 [1] : vector<16x16xf32> to vector<16xf32>
    %51 = vector.shape_cast %50 : vector<16xf32> to vector<16x1xf32>
    %52 = tpu.reciprocal %51 {approx = true} : vector<16x1xf32> -> vector<16x1xf32>
    %53 = vector.broadcast %52 : vector<16x1xf32> to vector<16x16xf32>
    %54 = arith.mulf %49, %53 : vector<16x16xf32>
    %55 = vector.extract_strided_slice %16 {offsets = [0, 8], sizes = [16, 8], strides = [1, 1]} : vector<16x32xf32> to vector<16x8xf32>
    %cst_28 = arith.constant dense<0.000000e+00> : vector<16x8xf32>
    %56 = tpu.matmul %54, %55, %cst_28 {dimension_numbers = #tpu.dot_dimension_numbers<[1], [0], [0], [1], [0, 0, 1, 1], [], []>} : vector<16x16xf32>, vector<16x8xf32>, vector<16x8xf32> -> vector<16x8xf32>
    %57 = vector.extract_strided_slice %8 {offsets = [8, 0], sizes = [8, 32], strides = [1, 1]} : vector<32x32xf32> to vector<8x32xf32>
    %cst_29 = arith.constant dense<0.000000e+00> : vector<16x32xf32>
    %58 = tpu.matmul %56, %57, %cst_29 {dimension_numbers = #tpu.dot_dimension_numbers<[1], [0], [0], [1], [0, 0, 1, 1], [], []>} : vector<16x8xf32>, vector<8x32xf32>, vector<16x32xf32> -> vector<16x32xf32>
    %59 = arith.addf %38, %58 : vector<16x32xf32>
    %60 = vector.extract_strided_slice %14 {offsets = [0, 16], sizes = [16, 8], strides = [1, 1]} : vector<16x32xf32> to vector<16x8xf32>
    %61 = vector.extract_strided_slice %15 {offsets = [0, 16], sizes = [16, 8], strides = [1, 1]} : vector<16x32xf32> to vector<16x8xf32>
    %cst_30 = arith.constant dense<0.000000e+00> : vector<16x16xf32>
    %62 = tpu.matmul %60, %61, %cst_30 {dimension_numbers = #tpu.dot_dimension_numbers<[1], [1], [0], [0], [0, 0, 1, 0], [], []>} : vector<16x8xf32>, vector<16x8xf32>, vector<16x16xf32> -> vector<16x16xf32>
    %cst_31 = arith.constant 0.353553385 : f32
    %63 = vector.broadcast %cst_31 : f32 to vector<16x16xf32>
    %64 = arith.mulf %62, %63 : vector<16x16xf32>
    %65 = arith.addf %64, %2 : vector<16x16xf32>
    %cst_32 = arith.constant dense<0xFF800000> : vector<16xf32>
    %66 = vector.multi_reduction <maximumf>, %65, %cst_32 [1] : vector<16x16xf32> to vector<16xf32>
    %67 = vector.shape_cast %66 : vector<16xf32> to vector<16x1xf32>
    %68 = vector.broadcast %67 : vector<16x1xf32> to vector<16x16xf32>
    %69 = arith.subf %65, %68 : vector<16x16xf32>
    %70 = math.exp %69 : vector<16x16xf32>
    %cst_33 = arith.constant dense<0.000000e+00> : vector<16xf32>
    %71 = vector.multi_reduction <add>, %70, %cst_33 [1] : vector<16x16xf32> to vector<16xf32>
    %72 = vector.shape_cast %71 : vector<16xf32> to vector<16x1xf32>
    %73 = tpu.reciprocal %72 {approx = true} : vector<16x1xf32> -> vector<16x1xf32>
    %74 = vector.broadcast %73 : vector<16x1xf32> to vector<16x16xf32>
    %75 = arith.mulf %70, %74 : vector<16x16xf32>
    %76 = vector.extract_strided_slice %16 {offsets = [0, 16], sizes = [16, 8], strides = [1, 1]} : vector<16x32xf32> to vector<16x8xf32>
    %cst_34 = arith.constant dense<0.000000e+00> : vector<16x8xf32>
    %77 = tpu.matmul %75, %76, %cst_34 {dimension_numbers = #tpu.dot_dimension_numbers<[1], [0], [0], [1], [0, 0, 1, 1], [], []>} : vector<16x16xf32>, vector<16x8xf32>, vector<16x8xf32> -> vector<16x8xf32>
    %78 = vector.extract_strided_slice %8 {offsets = [16, 0], sizes = [8, 32], strides = [1, 1]} : vector<32x32xf32> to vector<8x32xf32>
    %cst_35 = arith.constant dense<0.000000e+00> : vector<16x32xf32>
    %79 = tpu.matmul %77, %78, %cst_35 {dimension_numbers = #tpu.dot_dimension_numbers<[1], [0], [0], [1], [0, 0, 1, 1], [], []>} : vector<16x8xf32>, vector<8x32xf32>, vector<16x32xf32> -> vector<16x32xf32>
    %80 = arith.addf %59, %79 : vector<16x32xf32>
    %81 = vector.extract_strided_slice %14 {offsets = [0, 24], sizes = [16, 8], strides = [1, 1]} : vector<16x32xf32> to vector<16x8xf32>
    %82 = vector.extract_strided_slice %15 {offsets = [0, 24], sizes = [16, 8], strides = [1, 1]} : vector<16x32xf32> to vector<16x8xf32>
    %cst_36 = arith.constant dense<0.000000e+00> : vector<16x16xf32>
    %83 = tpu.matmul %81, %82, %cst_36 {dimension_numbers = #tpu.dot_dimension_numbers<[1], [1], [0], [0], [0, 0, 1, 0], [], []>} : vector<16x8xf32>, vector<16x8xf32>, vector<16x16xf32> -> vector<16x16xf32>
    %cst_37 = arith.constant 0.353553385 : f32
    %84 = vector.broadcast %cst_37 : f32 to vector<16x16xf32>
    %85 = arith.mulf %83, %84 : vector<16x16xf32>
    %86 = arith.addf %85, %2 : vector<16x16xf32>
    %cst_38 = arith.constant dense<0xFF800000> : vector<16xf32>
    %87 = vector.multi_reduction <maximumf>, %86, %cst_38 [1] : vector<16x16xf32> to vector<16xf32>
    %88 = vector.shape_cast %87 : vector<16xf32> to vector<16x1xf32>
    %89 = vector.broadcast %88 : vector<16x1xf32> to vector<16x16xf32>
    %90 = arith.subf %86, %89 : vector<16x16xf32>
    %91 = math.exp %90 : vector<16x16xf32>
    %cst_39 = arith.constant dense<0.000000e+00> : vector<16xf32>
    %92 = vector.multi_reduction <add>, %91, %cst_39 [1] : vector<16x16xf32> to vector<16xf32>
    %93 = vector.shape_cast %92 : vector<16xf32> to vector<16x1xf32>
    %94 = tpu.reciprocal %93 {approx = true} : vector<16x1xf32> -> vector<16x1xf32>
    %95 = vector.broadcast %94 : vector<16x1xf32> to vector<16x16xf32>
    %96 = arith.mulf %91, %95 : vector<16x16xf32>
    %97 = vector.extract_strided_slice %16 {offsets = [0, 24], sizes = [16, 8], strides = [1, 1]} : vector<16x32xf32> to vector<16x8xf32>
    %cst_40 = arith.constant dense<0.000000e+00> : vector<16x8xf32>
    %98 = tpu.matmul %96, %97, %cst_40 {dimension_numbers = #tpu.dot_dimension_numbers<[1], [0], [0], [1], [0, 0, 1, 1], [], []>} : vector<16x16xf32>, vector<16x8xf32>, vector<16x8xf32> -> vector<16x8xf32>
    %99 = vector.extract_strided_slice %8 {offsets = [24, 0], sizes = [8, 32], strides = [1, 1]} : vector<32x32xf32> to vector<8x32xf32>
    %cst_41 = arith.constant dense<0.000000e+00> : vector<16x32xf32>
    %100 = tpu.matmul %98, %99, %cst_41 {dimension_numbers = #tpu.dot_dimension_numbers<[1], [0], [0], [1], [0, 0, 1, 1], [], []>} : vector<16x8xf32>, vector<8x32xf32>, vector<16x32xf32> -> vector<16x32xf32>
    %101 = arith.addf %80, %100 : vector<16x32xf32>
    %102 = vector.broadcast %10 : vector<1x32xf32> to vector<16x32xf32>
    %103 = arith.addf %101, %102 : vector<16x32xf32>
    %104 = arith.addf %0, %103 : vector<16x32xf32>
    %c0_42 = arith.constant 0 : index
    %c0_43 = arith.constant 0 : index
    %c0_44 = arith.constant 0 : index
    %105 = vector.load %arg7[%c0_42, %c0_43, %c0_44] : memref<2x1x32xf32, #tpu.memory_space<vmem>>, vector<1x1x32xf32>
    %106 = vector.shape_cast %105 : vector<1x1x32xf32> to vector<1x32xf32>
    %c0_45 = arith.constant 0 : index
    %c0_46 = arith.constant 0 : index
    %c0_47 = arith.constant 0 : index
    %107 = vector.load %arg8[%c0_45, %c0_46, %c0_47] : memref<2x1x32xf32, #tpu.memory_space<vmem>>, vector<1x1x32xf32>
    %108 = vector.shape_cast %107 : vector<1x1x32xf32> to vector<1x32xf32>
    %cst_48 = arith.constant dense<0.000000e+00> : vector<16xf32>
    %109 = vector.multi_reduction <add>, %104, %cst_48 [1] : vector<16x32xf32> to vector<16xf32>
    %110 = vector.shape_cast %109 : vector<16xf32> to vector<16x1xf32>
    %cst_49 = arith.constant 3.200000e+01 : f32
    %111 = vector.broadcast %cst_49 : f32 to vector<16x1xf32>
    %112 = arith.divf %110, %111 : vector<16x1xf32>
    %113 = vector.broadcast %112 : vector<16x1xf32> to vector<16x32xf32>
    %114 = arith.subf %104, %113 : vector<16x32xf32>
    %115 = arith.mulf %114, %114 : vector<16x32xf32>
    %cst_50 = arith.constant dense<0.000000e+00> : vector<16xf32>
    %116 = vector.multi_reduction <add>, %115, %cst_50 [1] : vector<16x32xf32> to vector<16xf32>
    %117 = vector.shape_cast %116 : vector<16xf32> to vector<16x1xf32>
    %cst_51 = arith.constant 3.200000e+01 : f32
    %118 = vector.broadcast %cst_51 : f32 to vector<16x1xf32>
    %119 = arith.divf %117, %118 : vector<16x1xf32>
    %120 = vector.broadcast %112 : vector<16x1xf32> to vector<16x32xf32>
    %121 = arith.subf %104, %120 : vector<16x32xf32>
    %cst_52 = arith.constant 9.99999974E-6 : f32
    %122 = vector.broadcast %cst_52 : f32 to vector<16x1xf32>
    %123 = arith.addf %119, %122 : vector<16x1xf32>
    %124 = math.rsqrt %123 : vector<16x1xf32>
    %125 = vector.broadcast %124 : vector<16x1xf32> to vector<16x32xf32>
    %126 = arith.mulf %121, %125 : vector<16x32xf32>
    %127 = vector.broadcast %106 : vector<1x32xf32> to vector<16x32xf32>
    %128 = arith.mulf %126, %127 : vector<16x32xf32>
    %129 = vector.broadcast %108 : vector<1x32xf32> to vector<16x32xf32>
    %130 = arith.addf %128, %129 : vector<16x32xf32>
    %c0_53 = arith.constant 0 : index
    %c0_54 = arith.constant 0 : index
    %c0_55 = arith.constant 0 : index
    %131 = vector.load %arg9[%c0_53, %c0_54, %c0_55] : memref<2x32x96xf32, #tpu.memory_space<vmem>>, vector<1x32x96xf32>
    %132 = vector.shape_cast %131 : vector<1x32x96xf32> to vector<32x96xf32>
    %c0_56 = arith.constant 0 : index
    %c0_57 = arith.constant 0 : index
    %c0_58 = arith.constant 0 : index
    %133 = vector.load %arg10[%c0_56, %c0_57, %c0_58] : memref<2x1x96xf32, #tpu.memory_space<vmem>>, vector<1x1x96xf32>
    %134 = vector.shape_cast %133 : vector<1x1x96xf32> to vector<1x96xf32>
    %c0_59 = arith.constant 0 : index
    %c0_60 = arith.constant 0 : index
    %c0_61 = arith.constant 0 : index
    %135 = vector.load %arg11[%c0_59, %c0_60, %c0_61] : memref<2x32x32xf32, #tpu.memory_space<vmem>>, vector<1x32x32xf32>
    %136 = vector.shape_cast %135 : vector<1x32x32xf32> to vector<32x32xf32>
    %c0_62 = arith.constant 0 : index
    %c0_63 = arith.constant 0 : index
    %c0_64 = arith.constant 0 : index
    %137 = vector.load %arg12[%c0_62, %c0_63, %c0_64] : memref<2x1x32xf32, #tpu.memory_space<vmem>>, vector<1x1x32xf32>
    %138 = vector.shape_cast %137 : vector<1x1x32xf32> to vector<1x32xf32>
    %139 = vector.extract_strided_slice %132 {offsets = [0, 0], sizes = [32, 32], strides = [1, 1]} : vector<32x96xf32> to vector<32x32xf32>
    %cst_65 = arith.constant dense<0.000000e+00> : vector<16x32xf32>
    %140 = tpu.matmul %130, %139, %cst_65 {dimension_numbers = #tpu.dot_dimension_numbers<[1], [0], [0], [1], [0, 0, 1, 1], [], []>} : vector<16x32xf32>, vector<32x32xf32>, vector<16x32xf32> -> vector<16x32xf32>
    %141 = vector.extract_strided_slice %134 {offsets = [0, 0], sizes = [1, 32], strides = [1, 1]} : vector<1x96xf32> to vector<1x32xf32>
    %142 = vector.broadcast %141 : vector<1x32xf32> to vector<16x32xf32>
    %143 = arith.addf %140, %142 : vector<16x32xf32>
    %144 = vector.extract_strided_slice %132 {offsets = [0, 32], sizes = [32, 64], strides = [1, 1]} : vector<32x96xf32> to vector<32x64xf32>
    %cst_66 = arith.constant dense<0.000000e+00> : vector<16x64xf32>
    %145 = tpu.matmul %1, %144, %cst_66 {dimension_numbers = #tpu.dot_dimension_numbers<[1], [0], [0], [1], [0, 0, 1, 1], [], []>} : vector<16x32xf32>, vector<32x64xf32>, vector<16x64xf32> -> vector<16x64xf32>
    %146 = vector.extract_strided_slice %134 {offsets = [0, 32], sizes = [1, 64], strides = [1, 1]} : vector<1x96xf32> to vector<1x64xf32>
    %147 = vector.broadcast %146 : vector<1x64xf32> to vector<16x64xf32>
    %148 = arith.addf %145, %147 : vector<16x64xf32>
    %149 = vector.extract_strided_slice %148 {offsets = [0, 0], sizes = [16, 32], strides = [1, 1]} : vector<16x64xf32> to vector<16x32xf32>
    %150 = vector.extract_strided_slice %148 {offsets = [0, 32], sizes = [16, 32], strides = [1, 1]} : vector<16x64xf32> to vector<16x32xf32>
    %cst_67 = arith.constant 0.000000e+00 : f32
    %151 = vector.broadcast %cst_67 : f32 to vector<16x32xf32>
    %152 = vector.extract_strided_slice %143 {offsets = [0, 0], sizes = [16, 8], strides = [1, 1]} : vector<16x32xf32> to vector<16x8xf32>
    %153 = vector.extract_strided_slice %149 {offsets = [0, 0], sizes = [16, 8], strides = [1, 1]} : vector<16x32xf32> to vector<16x8xf32>
    %cst_68 = arith.constant dense<0.000000e+00> : vector<16x16xf32>
    %154 = tpu.matmul %152, %153, %cst_68 {dimension_numbers = #tpu.dot_dimension_numbers<[1], [1], [0], [0], [0, 0, 1, 0], [], []>} : vector<16x8xf32>, vector<16x8xf32>, vector<16x16xf32> -> vector<16x16xf32>
    %cst_69 = arith.constant 0.353553385 : f32
    %155 = vector.broadcast %cst_69 : f32 to vector<16x16xf32>
    %156 = arith.mulf %154, %155 : vector<16x16xf32>
    %157 = arith.addf %156, %2 : vector<16x16xf32>
    %cst_70 = arith.constant dense<0xFF800000> : vector<16xf32>
    %158 = vector.multi_reduction <maximumf>, %157, %cst_70 [1] : vector<16x16xf32> to vector<16xf32>
    %159 = vector.shape_cast %158 : vector<16xf32> to vector<16x1xf32>
    %160 = vector.broadcast %159 : vector<16x1xf32> to vector<16x16xf32>
    %161 = arith.subf %157, %160 : vector<16x16xf32>
    %162 = math.exp %161 : vector<16x16xf32>
    %cst_71 = arith.constant dense<0.000000e+00> : vector<16xf32>
    %163 = vector.multi_reduction <add>, %162, %cst_71 [1] : vector<16x16xf32> to vector<16xf32>
    %164 = vector.shape_cast %163 : vector<16xf32> to vector<16x1xf32>
    %165 = tpu.reciprocal %164 {approx = true} : vector<16x1xf32> -> vector<16x1xf32>
    %166 = vector.broadcast %165 : vector<16x1xf32> to vector<16x16xf32>
    %167 = arith.mulf %162, %166 : vector<16x16xf32>
    %168 = vector.extract_strided_slice %150 {offsets = [0, 0], sizes = [16, 8], strides = [1, 1]} : vector<16x32xf32> to vector<16x8xf32>
    %cst_72 = arith.constant dense<0.000000e+00> : vector<16x8xf32>
    %169 = tpu.matmul %167, %168, %cst_72 {dimension_numbers = #tpu.dot_dimension_numbers<[1], [0], [0], [1], [0, 0, 1, 1], [], []>} : vector<16x16xf32>, vector<16x8xf32>, vector<16x8xf32> -> vector<16x8xf32>
    %170 = vector.extract_strided_slice %136 {offsets = [0, 0], sizes = [8, 32], strides = [1, 1]} : vector<32x32xf32> to vector<8x32xf32>
    %cst_73 = arith.constant dense<0.000000e+00> : vector<16x32xf32>
    %171 = tpu.matmul %169, %170, %cst_73 {dimension_numbers = #tpu.dot_dimension_numbers<[1], [0], [0], [1], [0, 0, 1, 1], [], []>} : vector<16x8xf32>, vector<8x32xf32>, vector<16x32xf32> -> vector<16x32xf32>
    %172 = arith.addf %151, %171 : vector<16x32xf32>
    %173 = vector.extract_strided_slice %143 {offsets = [0, 8], sizes = [16, 8], strides = [1, 1]} : vector<16x32xf32> to vector<16x8xf32>
    %174 = vector.extract_strided_slice %149 {offsets = [0, 8], sizes = [16, 8], strides = [1, 1]} : vector<16x32xf32> to vector<16x8xf32>
    %cst_74 = arith.constant dense<0.000000e+00> : vector<16x16xf32>
    %175 = tpu.matmul %173, %174, %cst_74 {dimension_numbers = #tpu.dot_dimension_numbers<[1], [1], [0], [0], [0, 0, 1, 0], [], []>} : vector<16x8xf32>, vector<16x8xf32>, vector<16x16xf32> -> vector<16x16xf32>
    %cst_75 = arith.constant 0.353553385 : f32
    %176 = vector.broadcast %cst_75 : f32 to vector<16x16xf32>
    %177 = arith.mulf %175, %176 : vector<16x16xf32>
    %178 = arith.addf %177, %2 : vector<16x16xf32>
    %cst_76 = arith.constant dense<0xFF800000> : vector<16xf32>
    %179 = vector.multi_reduction <maximumf>, %178, %cst_76 [1] : vector<16x16xf32> to vector<16xf32>
    %180 = vector.shape_cast %179 : vector<16xf32> to vector<16x1xf32>
    %181 = vector.broadcast %180 : vector<16x1xf32> to vector<16x16xf32>
    %182 = arith.subf %178, %181 : vector<16x16xf32>
    %183 = math.exp %182 : vector<16x16xf32>
    %cst_77 = arith.constant dense<0.000000e+00> : vector<16xf32>
    %184 = vector.multi_reduction <add>, %183, %cst_77 [1] : vector<16x16xf32> to vector<16xf32>
    %185 = vector.shape_cast %184 : vector<16xf32> to vector<16x1xf32>
    %186 = tpu.reciprocal %185 {approx = true} : vector<16x1xf32> -> vector<16x1xf32>
    %187 = vector.broadcast %186 : vector<16x1xf32> to vector<16x16xf32>
    %188 = arith.mulf %183, %187 : vector<16x16xf32>
    %189 = vector.extract_strided_slice %150 {offsets = [0, 8], sizes = [16, 8], strides = [1, 1]} : vector<16x32xf32> to vector<16x8xf32>
    %cst_78 = arith.constant dense<0.000000e+00> : vector<16x8xf32>
    %190 = tpu.matmul %188, %189, %cst_78 {dimension_numbers = #tpu.dot_dimension_numbers<[1], [0], [0], [1], [0, 0, 1, 1], [], []>} : vector<16x16xf32>, vector<16x8xf32>, vector<16x8xf32> -> vector<16x8xf32>
    %191 = vector.extract_strided_slice %136 {offsets = [8, 0], sizes = [8, 32], strides = [1, 1]} : vector<32x32xf32> to vector<8x32xf32>
    %cst_79 = arith.constant dense<0.000000e+00> : vector<16x32xf32>
    %192 = tpu.matmul %190, %191, %cst_79 {dimension_numbers = #tpu.dot_dimension_numbers<[1], [0], [0], [1], [0, 0, 1, 1], [], []>} : vector<16x8xf32>, vector<8x32xf32>, vector<16x32xf32> -> vector<16x32xf32>
    %193 = arith.addf %172, %192 : vector<16x32xf32>
    %194 = vector.extract_strided_slice %143 {offsets = [0, 16], sizes = [16, 8], strides = [1, 1]} : vector<16x32xf32> to vector<16x8xf32>
    %195 = vector.extract_strided_slice %149 {offsets = [0, 16], sizes = [16, 8], strides = [1, 1]} : vector<16x32xf32> to vector<16x8xf32>
    %cst_80 = arith.constant dense<0.000000e+00> : vector<16x16xf32>
    %196 = tpu.matmul %194, %195, %cst_80 {dimension_numbers = #tpu.dot_dimension_numbers<[1], [1], [0], [0], [0, 0, 1, 0], [], []>} : vector<16x8xf32>, vector<16x8xf32>, vector<16x16xf32> -> vector<16x16xf32>
    %cst_81 = arith.constant 0.353553385 : f32
    %197 = vector.broadcast %cst_81 : f32 to vector<16x16xf32>
    %198 = arith.mulf %196, %197 : vector<16x16xf32>
    %199 = arith.addf %198, %2 : vector<16x16xf32>
    %cst_82 = arith.constant dense<0xFF800000> : vector<16xf32>
    %200 = vector.multi_reduction <maximumf>, %199, %cst_82 [1] : vector<16x16xf32> to vector<16xf32>
    %201 = vector.shape_cast %200 : vector<16xf32> to vector<16x1xf32>
    %202 = vector.broadcast %201 : vector<16x1xf32> to vector<16x16xf32>
    %203 = arith.subf %199, %202 : vector<16x16xf32>
    %204 = math.exp %203 : vector<16x16xf32>
    %cst_83 = arith.constant dense<0.000000e+00> : vector<16xf32>
    %205 = vector.multi_reduction <add>, %204, %cst_83 [1] : vector<16x16xf32> to vector<16xf32>
    %206 = vector.shape_cast %205 : vector<16xf32> to vector<16x1xf32>
    %207 = tpu.reciprocal %206 {approx = true} : vector<16x1xf32> -> vector<16x1xf32>
    %208 = vector.broadcast %207 : vector<16x1xf32> to vector<16x16xf32>
    %209 = arith.mulf %204, %208 : vector<16x16xf32>
    %210 = vector.extract_strided_slice %150 {offsets = [0, 16], sizes = [16, 8], strides = [1, 1]} : vector<16x32xf32> to vector<16x8xf32>
    %cst_84 = arith.constant dense<0.000000e+00> : vector<16x8xf32>
    %211 = tpu.matmul %209, %210, %cst_84 {dimension_numbers = #tpu.dot_dimension_numbers<[1], [0], [0], [1], [0, 0, 1, 1], [], []>} : vector<16x16xf32>, vector<16x8xf32>, vector<16x8xf32> -> vector<16x8xf32>
    %212 = vector.extract_strided_slice %136 {offsets = [16, 0], sizes = [8, 32], strides = [1, 1]} : vector<32x32xf32> to vector<8x32xf32>
    %cst_85 = arith.constant dense<0.000000e+00> : vector<16x32xf32>
    %213 = tpu.matmul %211, %212, %cst_85 {dimension_numbers = #tpu.dot_dimension_numbers<[1], [0], [0], [1], [0, 0, 1, 1], [], []>} : vector<16x8xf32>, vector<8x32xf32>, vector<16x32xf32> -> vector<16x32xf32>
    %214 = arith.addf %193, %213 : vector<16x32xf32>
    %215 = vector.extract_strided_slice %143 {offsets = [0, 24], sizes = [16, 8], strides = [1, 1]} : vector<16x32xf32> to vector<16x8xf32>
    %216 = vector.extract_strided_slice %149 {offsets = [0, 24], sizes = [16, 8], strides = [1, 1]} : vector<16x32xf32> to vector<16x8xf32>
    %cst_86 = arith.constant dense<0.000000e+00> : vector<16x16xf32>
    %217 = tpu.matmul %215, %216, %cst_86 {dimension_numbers = #tpu.dot_dimension_numbers<[1], [1], [0], [0], [0, 0, 1, 0], [], []>} : vector<16x8xf32>, vector<16x8xf32>, vector<16x16xf32> -> vector<16x16xf32>
    %cst_87 = arith.constant 0.353553385 : f32
    %218 = vector.broadcast %cst_87 : f32 to vector<16x16xf32>
    %219 = arith.mulf %217, %218 : vector<16x16xf32>
    %220 = arith.addf %219, %2 : vector<16x16xf32>
    %cst_88 = arith.constant dense<0xFF800000> : vector<16xf32>
    %221 = vector.multi_reduction <maximumf>, %220, %cst_88 [1] : vector<16x16xf32> to vector<16xf32>
    %222 = vector.shape_cast %221 : vector<16xf32> to vector<16x1xf32>
    %223 = vector.broadcast %222 : vector<16x1xf32> to vector<16x16xf32>
    %224 = arith.subf %220, %223 : vector<16x16xf32>
    %225 = math.exp %224 : vector<16x16xf32>
    %cst_89 = arith.constant dense<0.000000e+00> : vector<16xf32>
    %226 = vector.multi_reduction <add>, %225, %cst_89 [1] : vector<16x16xf32> to vector<16xf32>
    %227 = vector.shape_cast %226 : vector<16xf32> to vector<16x1xf32>
    %228 = tpu.reciprocal %227 {approx = true} : vector<16x1xf32> -> vector<16x1xf32>
    %229 = vector.broadcast %228 : vector<16x1xf32> to vector<16x16xf32>
    %230 = arith.mulf %225, %229 : vector<16x16xf32>
    %231 = vector.extract_strided_slice %150 {offsets = [0, 24], sizes = [16, 8], strides = [1, 1]} : vector<16x32xf32> to vector<16x8xf32>
    %cst_90 = arith.constant dense<0.000000e+00> : vector<16x8xf32>
    %232 = tpu.matmul %230, %231, %cst_90 {dimension_numbers = #tpu.dot_dimension_numbers<[1], [0], [0], [1], [0, 0, 1, 1], [], []>} : vector<16x16xf32>, vector<16x8xf32>, vector<16x8xf32> -> vector<16x8xf32>
    %233 = vector.extract_strided_slice %136 {offsets = [24, 0], sizes = [8, 32], strides = [1, 1]} : vector<32x32xf32> to vector<8x32xf32>
    %cst_91 = arith.constant dense<0.000000e+00> : vector<16x32xf32>
    %234 = tpu.matmul %232, %233, %cst_91 {dimension_numbers = #tpu.dot_dimension_numbers<[1], [0], [0], [1], [0, 0, 1, 1], [], []>} : vector<16x8xf32>, vector<8x32xf32>, vector<16x32xf32> -> vector<16x32xf32>
    %235 = arith.addf %214, %234 : vector<16x32xf32>
    %236 = vector.broadcast %138 : vector<1x32xf32> to vector<16x32xf32>
    %237 = arith.addf %235, %236 : vector<16x32xf32>
    %238 = arith.addf %130, %237 : vector<16x32xf32>
    %c0_92 = arith.constant 0 : index
    %c0_93 = arith.constant 0 : index
    %c0_94 = arith.constant 0 : index
    %239 = vector.load %arg13[%c0_92, %c0_93, %c0_94] : memref<2x1x32xf32, #tpu.memory_space<vmem>>, vector<1x1x32xf32>
    %240 = vector.shape_cast %239 : vector<1x1x32xf32> to vector<1x32xf32>
    %c0_95 = arith.constant 0 : index
    %c0_96 = arith.constant 0 : index
    %c0_97 = arith.constant 0 : index
    %241 = vector.load %arg14[%c0_95, %c0_96, %c0_97] : memref<2x1x32xf32, #tpu.memory_space<vmem>>, vector<1x1x32xf32>
    %242 = vector.shape_cast %241 : vector<1x1x32xf32> to vector<1x32xf32>
    %cst_98 = arith.constant dense<0.000000e+00> : vector<16xf32>
    %243 = vector.multi_reduction <add>, %238, %cst_98 [1] : vector<16x32xf32> to vector<16xf32>
    %244 = vector.shape_cast %243 : vector<16xf32> to vector<16x1xf32>
    %cst_99 = arith.constant 3.200000e+01 : f32
    %245 = vector.broadcast %cst_99 : f32 to vector<16x1xf32>
    %246 = arith.divf %244, %245 : vector<16x1xf32>
    %247 = vector.broadcast %246 : vector<16x1xf32> to vector<16x32xf32>
    %248 = arith.subf %238, %247 : vector<16x32xf32>
    %249 = arith.mulf %248, %248 : vector<16x32xf32>
    %cst_100 = arith.constant dense<0.000000e+00> : vector<16xf32>
    %250 = vector.multi_reduction <add>, %249, %cst_100 [1] : vector<16x32xf32> to vector<16xf32>
    %251 = vector.shape_cast %250 : vector<16xf32> to vector<16x1xf32>
    %cst_101 = arith.constant 3.200000e+01 : f32
    %252 = vector.broadcast %cst_101 : f32 to vector<16x1xf32>
    %253 = arith.divf %251, %252 : vector<16x1xf32>
    %254 = vector.broadcast %246 : vector<16x1xf32> to vector<16x32xf32>
    %255 = arith.subf %238, %254 : vector<16x32xf32>
    %cst_102 = arith.constant 9.99999974E-6 : f32
    %256 = vector.broadcast %cst_102 : f32 to vector<16x1xf32>
    %257 = arith.addf %253, %256 : vector<16x1xf32>
    %258 = math.rsqrt %257 : vector<16x1xf32>
    %259 = vector.broadcast %258 : vector<16x1xf32> to vector<16x32xf32>
    %260 = arith.mulf %255, %259 : vector<16x32xf32>
    %261 = vector.broadcast %240 : vector<1x32xf32> to vector<16x32xf32>
    %262 = arith.mulf %260, %261 : vector<16x32xf32>
    %263 = vector.broadcast %242 : vector<1x32xf32> to vector<16x32xf32>
    %264 = arith.addf %262, %263 : vector<16x32xf32>
    %c0_103 = arith.constant 0 : index
    %c0_104 = arith.constant 0 : index
    %c0_105 = arith.constant 0 : index
    %265 = vector.load %arg15[%c0_103, %c0_104, %c0_105] : memref<2x32x64xf32, #tpu.memory_space<vmem>>, vector<1x32x64xf32>
    %266 = vector.shape_cast %265 : vector<1x32x64xf32> to vector<32x64xf32>
    %c0_106 = arith.constant 0 : index
    %c0_107 = arith.constant 0 : index
    %c0_108 = arith.constant 0 : index
    %267 = vector.load %arg16[%c0_106, %c0_107, %c0_108] : memref<2x1x64xf32, #tpu.memory_space<vmem>>, vector<1x1x64xf32>
    %268 = vector.shape_cast %267 : vector<1x1x64xf32> to vector<1x64xf32>
    %c0_109 = arith.constant 0 : index
    %c0_110 = arith.constant 0 : index
    %c0_111 = arith.constant 0 : index
    %269 = vector.load %arg17[%c0_109, %c0_110, %c0_111] : memref<2x64x32xf32, #tpu.memory_space<vmem>>, vector<1x64x32xf32>
    %270 = vector.shape_cast %269 : vector<1x64x32xf32> to vector<64x32xf32>
    %c0_112 = arith.constant 0 : index
    %c0_113 = arith.constant 0 : index
    %c0_114 = arith.constant 0 : index
    %271 = vector.load %arg18[%c0_112, %c0_113, %c0_114] : memref<2x1x32xf32, #tpu.memory_space<vmem>>, vector<1x1x32xf32>
    %272 = vector.shape_cast %271 : vector<1x1x32xf32> to vector<1x32xf32>
    %cst_115 = arith.constant dense<0.000000e+00> : vector<16x64xf32>
    %273 = tpu.matmul %264, %266, %cst_115 {dimension_numbers = #tpu.dot_dimension_numbers<[1], [0], [0], [1], [0, 0, 1, 1], [], []>} : vector<16x32xf32>, vector<32x64xf32>, vector<16x64xf32> -> vector<16x64xf32>
    %274 = vector.broadcast %268 : vector<1x64xf32> to vector<16x64xf32>
    %275 = arith.addf %273, %274 : vector<16x64xf32>
    %cst_116 = arith.constant 0.000000e+00 : f32
    %276 = vector.broadcast %cst_116 : f32 to vector<16x64xf32>
    %277 = arith.maximumf %275, %276 : vector<16x64xf32>
    %cst_117 = arith.constant dense<0.000000e+00> : vector<16x32xf32>
    %278 = tpu.matmul %277, %270, %cst_117 {dimension_numbers = #tpu.dot_dimension_numbers<[1], [0], [0], [1], [0, 0, 1, 1], [], []>} : vector<16x64xf32>, vector<64x32xf32>, vector<16x32xf32> -> vector<16x32xf32>
    %279 = vector.broadcast %272 : vector<1x32xf32> to vector<16x32xf32>
    %280 = arith.addf %278, %279 : vector<16x32xf32>
    %281 = arith.addf %264, %280 : vector<16x32xf32>
    %c0_118 = arith.constant 0 : index
    %c0_119 = arith.constant 0 : index
    %c0_120 = arith.constant 0 : index
    %282 = vector.load %arg19[%c0_118, %c0_119, %c0_120] : memref<2x1x32xf32, #tpu.memory_space<vmem>>, vector<1x1x32xf32>
    %283 = vector.shape_cast %282 : vector<1x1x32xf32> to vector<1x32xf32>
    %c0_121 = arith.constant 0 : index
    %c0_122 = arith.constant 0 : index
    %c0_123 = arith.constant 0 : index
    %284 = vector.load %arg20[%c0_121, %c0_122, %c0_123] : memref<2x1x32xf32, #tpu.memory_space<vmem>>, vector<1x1x32xf32>
    %285 = vector.shape_cast %284 : vector<1x1x32xf32> to vector<1x32xf32>
    %cst_124 = arith.constant dense<0.000000e+00> : vector<16xf32>
    %286 = vector.multi_reduction <add>, %281, %cst_124 [1] : vector<16x32xf32> to vector<16xf32>
    %287 = vector.shape_cast %286 : vector<16xf32> to vector<16x1xf32>
    %cst_125 = arith.constant 3.200000e+01 : f32
    %288 = vector.broadcast %cst_125 : f32 to vector<16x1xf32>
    %289 = arith.divf %287, %288 : vector<16x1xf32>
    %290 = vector.broadcast %289 : vector<16x1xf32> to vector<16x32xf32>
    %291 = arith.subf %281, %290 : vector<16x32xf32>
    %292 = arith.mulf %291, %291 : vector<16x32xf32>
    %cst_126 = arith.constant dense<0.000000e+00> : vector<16xf32>
    %293 = vector.multi_reduction <add>, %292, %cst_126 [1] : vector<16x32xf32> to vector<16xf32>
    %294 = vector.shape_cast %293 : vector<16xf32> to vector<16x1xf32>
    %cst_127 = arith.constant 3.200000e+01 : f32
    %295 = vector.broadcast %cst_127 : f32 to vector<16x1xf32>
    %296 = arith.divf %294, %295 : vector<16x1xf32>
    %297 = vector.broadcast %289 : vector<16x1xf32> to vector<16x32xf32>
    %298 = arith.subf %281, %297 : vector<16x32xf32>
    %cst_128 = arith.constant 9.99999974E-6 : f32
    %299 = vector.broadcast %cst_128 : f32 to vector<16x1xf32>
    %300 = arith.addf %296, %299 : vector<16x1xf32>
    %301 = math.rsqrt %300 : vector<16x1xf32>
    %302 = vector.broadcast %301 : vector<16x1xf32> to vector<16x32xf32>
    %303 = arith.mulf %298, %302 : vector<16x32xf32>
    %304 = vector.broadcast %283 : vector<1x32xf32> to vector<16x32xf32>
    %305 = arith.mulf %303, %304 : vector<16x32xf32>
    %306 = vector.broadcast %285 : vector<1x32xf32> to vector<16x32xf32>
    %307 = arith.addf %305, %306 : vector<16x32xf32>
    %c1 = arith.constant 1 : index
    %c0_129 = arith.constant 0 : index
    %c0_130 = arith.constant 0 : index
    %308 = vector.load %arg3[%c1, %c0_129, %c0_130] : memref<2x32x96xf32, #tpu.memory_space<vmem>>, vector<1x32x96xf32>
    %309 = vector.shape_cast %308 : vector<1x32x96xf32> to vector<32x96xf32>
    %c1_131 = arith.constant 1 : index
    %c0_132 = arith.constant 0 : index
    %c0_133 = arith.constant 0 : index
    %310 = vector.load %arg4[%c1_131, %c0_132, %c0_133] : memref<2x1x96xf32, #tpu.memory_space<vmem>>, vector<1x1x96xf32>
    %311 = vector.shape_cast %310 : vector<1x1x96xf32> to vector<1x96xf32>
    %c1_134 = arith.constant 1 : index
    %c0_135 = arith.constant 0 : index
    %c0_136 = arith.constant 0 : index
    %312 = vector.load %arg5[%c1_134, %c0_135, %c0_136] : memref<2x32x32xf32, #tpu.memory_space<vmem>>, vector<1x32x32xf32>
    %313 = vector.shape_cast %312 : vector<1x32x32xf32> to vector<32x32xf32>
    %c1_137 = arith.constant 1 : index
    %c0_138 = arith.constant 0 : index
    %c0_139 = arith.constant 0 : index
    %314 = vector.load %arg6[%c1_137, %c0_138, %c0_139] : memref<2x1x32xf32, #tpu.memory_space<vmem>>, vector<1x1x32xf32>
    %315 = vector.shape_cast %314 : vector<1x1x32xf32> to vector<1x32xf32>
    %cst_140 = arith.constant dense<0.000000e+00> : vector<16x96xf32>
    %316 = tpu.matmul %307, %309, %cst_140 {dimension_numbers = #tpu.dot_dimension_numbers<[1], [0], [0], [1], [0, 0, 1, 1], [], []>} : vector<16x32xf32>, vector<32x96xf32>, vector<16x96xf32> -> vector<16x96xf32>
    %317 = vector.broadcast %311 : vector<1x96xf32> to vector<16x96xf32>
    %318 = arith.addf %316, %317 : vector<16x96xf32>
    %319 = vector.extract_strided_slice %318 {offsets = [0, 0], sizes = [16, 32], strides = [1, 1]} : vector<16x96xf32> to vector<16x32xf32>
    %320 = vector.extract_strided_slice %318 {offsets = [0, 32], sizes = [16, 32], strides = [1, 1]} : vector<16x96xf32> to vector<16x32xf32>
    %321 = vector.extract_strided_slice %318 {offsets = [0, 64], sizes = [16, 32], strides = [1, 1]} : vector<16x96xf32> to vector<16x32xf32>
    %cst_141 = arith.constant 0.000000e+00 : f32
    %322 = vector.broadcast %cst_141 : f32 to vector<16x32xf32>
    %323 = vector.extract_strided_slice %319 {offsets = [0, 0], sizes = [16, 8], strides = [1, 1]} : vector<16x32xf32> to vector<16x8xf32>
    %324 = vector.extract_strided_slice %320 {offsets = [0, 0], sizes = [16, 8], strides = [1, 1]} : vector<16x32xf32> to vector<16x8xf32>
    %cst_142 = arith.constant dense<0.000000e+00> : vector<16x16xf32>
    %325 = tpu.matmul %323, %324, %cst_142 {dimension_numbers = #tpu.dot_dimension_numbers<[1], [1], [0], [0], [0, 0, 1, 0], [], []>} : vector<16x8xf32>, vector<16x8xf32>, vector<16x16xf32> -> vector<16x16xf32>
    %cst_143 = arith.constant 0.353553385 : f32
    %326 = vector.broadcast %cst_143 : f32 to vector<16x16xf32>
    %327 = arith.mulf %325, %326 : vector<16x16xf32>
    %328 = arith.addf %327, %2 : vector<16x16xf32>
    %cst_144 = arith.constant dense<0xFF800000> : vector<16xf32>
    %329 = vector.multi_reduction <maximumf>, %328, %cst_144 [1] : vector<16x16xf32> to vector<16xf32>
    %330 = vector.shape_cast %329 : vector<16xf32> to vector<16x1xf32>
    %331 = vector.broadcast %330 : vector<16x1xf32> to vector<16x16xf32>
    %332 = arith.subf %328, %331 : vector<16x16xf32>
    %333 = math.exp %332 : vector<16x16xf32>
    %cst_145 = arith.constant dense<0.000000e+00> : vector<16xf32>
    %334 = vector.multi_reduction <add>, %333, %cst_145 [1] : vector<16x16xf32> to vector<16xf32>
    %335 = vector.shape_cast %334 : vector<16xf32> to vector<16x1xf32>
    %336 = tpu.reciprocal %335 {approx = true} : vector<16x1xf32> -> vector<16x1xf32>
    %337 = vector.broadcast %336 : vector<16x1xf32> to vector<16x16xf32>
    %338 = arith.mulf %333, %337 : vector<16x16xf32>
    %339 = vector.extract_strided_slice %321 {offsets = [0, 0], sizes = [16, 8], strides = [1, 1]} : vector<16x32xf32> to vector<16x8xf32>
    %cst_146 = arith.constant dense<0.000000e+00> : vector<16x8xf32>
    %340 = tpu.matmul %338, %339, %cst_146 {dimension_numbers = #tpu.dot_dimension_numbers<[1], [0], [0], [1], [0, 0, 1, 1], [], []>} : vector<16x16xf32>, vector<16x8xf32>, vector<16x8xf32> -> vector<16x8xf32>
    %341 = vector.extract_strided_slice %313 {offsets = [0, 0], sizes = [8, 32], strides = [1, 1]} : vector<32x32xf32> to vector<8x32xf32>
    %cst_147 = arith.constant dense<0.000000e+00> : vector<16x32xf32>
    %342 = tpu.matmul %340, %341, %cst_147 {dimension_numbers = #tpu.dot_dimension_numbers<[1], [0], [0], [1], [0, 0, 1, 1], [], []>} : vector<16x8xf32>, vector<8x32xf32>, vector<16x32xf32> -> vector<16x32xf32>
    %343 = arith.addf %322, %342 : vector<16x32xf32>
    %344 = vector.extract_strided_slice %319 {offsets = [0, 8], sizes = [16, 8], strides = [1, 1]} : vector<16x32xf32> to vector<16x8xf32>
    %345 = vector.extract_strided_slice %320 {offsets = [0, 8], sizes = [16, 8], strides = [1, 1]} : vector<16x32xf32> to vector<16x8xf32>
    %cst_148 = arith.constant dense<0.000000e+00> : vector<16x16xf32>
    %346 = tpu.matmul %344, %345, %cst_148 {dimension_numbers = #tpu.dot_dimension_numbers<[1], [1], [0], [0], [0, 0, 1, 0], [], []>} : vector<16x8xf32>, vector<16x8xf32>, vector<16x16xf32> -> vector<16x16xf32>
    %cst_149 = arith.constant 0.353553385 : f32
    %347 = vector.broadcast %cst_149 : f32 to vector<16x16xf32>
    %348 = arith.mulf %346, %347 : vector<16x16xf32>
    %349 = arith.addf %348, %2 : vector<16x16xf32>
    %cst_150 = arith.constant dense<0xFF800000> : vector<16xf32>
    %350 = vector.multi_reduction <maximumf>, %349, %cst_150 [1] : vector<16x16xf32> to vector<16xf32>
    %351 = vector.shape_cast %350 : vector<16xf32> to vector<16x1xf32>
    %352 = vector.broadcast %351 : vector<16x1xf32> to vector<16x16xf32>
    %353 = arith.subf %349, %352 : vector<16x16xf32>
    %354 = math.exp %353 : vector<16x16xf32>
    %cst_151 = arith.constant dense<0.000000e+00> : vector<16xf32>
    %355 = vector.multi_reduction <add>, %354, %cst_151 [1] : vector<16x16xf32> to vector<16xf32>
    %356 = vector.shape_cast %355 : vector<16xf32> to vector<16x1xf32>
    %357 = tpu.reciprocal %356 {approx = true} : vector<16x1xf32> -> vector<16x1xf32>
    %358 = vector.broadcast %357 : vector<16x1xf32> to vector<16x16xf32>
    %359 = arith.mulf %354, %358 : vector<16x16xf32>
    %360 = vector.extract_strided_slice %321 {offsets = [0, 8], sizes = [16, 8], strides = [1, 1]} : vector<16x32xf32> to vector<16x8xf32>
    %cst_152 = arith.constant dense<0.000000e+00> : vector<16x8xf32>
    %361 = tpu.matmul %359, %360, %cst_152 {dimension_numbers = #tpu.dot_dimension_numbers<[1], [0], [0], [1], [0, 0, 1, 1], [], []>} : vector<16x16xf32>, vector<16x8xf32>, vector<16x8xf32> -> vector<16x8xf32>
    %362 = vector.extract_strided_slice %313 {offsets = [8, 0], sizes = [8, 32], strides = [1, 1]} : vector<32x32xf32> to vector<8x32xf32>
    %cst_153 = arith.constant dense<0.000000e+00> : vector<16x32xf32>
    %363 = tpu.matmul %361, %362, %cst_153 {dimension_numbers = #tpu.dot_dimension_numbers<[1], [0], [0], [1], [0, 0, 1, 1], [], []>} : vector<16x8xf32>, vector<8x32xf32>, vector<16x32xf32> -> vector<16x32xf32>
    %364 = arith.addf %343, %363 : vector<16x32xf32>
    %365 = vector.extract_strided_slice %319 {offsets = [0, 16], sizes = [16, 8], strides = [1, 1]} : vector<16x32xf32> to vector<16x8xf32>
    %366 = vector.extract_strided_slice %320 {offsets = [0, 16], sizes = [16, 8], strides = [1, 1]} : vector<16x32xf32> to vector<16x8xf32>
    %cst_154 = arith.constant dense<0.000000e+00> : vector<16x16xf32>
    %367 = tpu.matmul %365, %366, %cst_154 {dimension_numbers = #tpu.dot_dimension_numbers<[1], [1], [0], [0], [0, 0, 1, 0], [], []>} : vector<16x8xf32>, vector<16x8xf32>, vector<16x16xf32> -> vector<16x16xf32>
    %cst_155 = arith.constant 0.353553385 : f32
    %368 = vector.broadcast %cst_155 : f32 to vector<16x16xf32>
    %369 = arith.mulf %367, %368 : vector<16x16xf32>
    %370 = arith.addf %369, %2 : vector<16x16xf32>
    %cst_156 = arith.constant dense<0xFF800000> : vector<16xf32>
    %371 = vector.multi_reduction <maximumf>, %370, %cst_156 [1] : vector<16x16xf32> to vector<16xf32>
    %372 = vector.shape_cast %371 : vector<16xf32> to vector<16x1xf32>
    %373 = vector.broadcast %372 : vector<16x1xf32> to vector<16x16xf32>
    %374 = arith.subf %370, %373 : vector<16x16xf32>
    %375 = math.exp %374 : vector<16x16xf32>
    %cst_157 = arith.constant dense<0.000000e+00> : vector<16xf32>
    %376 = vector.multi_reduction <add>, %375, %cst_157 [1] : vector<16x16xf32> to vector<16xf32>
    %377 = vector.shape_cast %376 : vector<16xf32> to vector<16x1xf32>
    %378 = tpu.reciprocal %377 {approx = true} : vector<16x1xf32> -> vector<16x1xf32>
    %379 = vector.broadcast %378 : vector<16x1xf32> to vector<16x16xf32>
    %380 = arith.mulf %375, %379 : vector<16x16xf32>
    %381 = vector.extract_strided_slice %321 {offsets = [0, 16], sizes = [16, 8], strides = [1, 1]} : vector<16x32xf32> to vector<16x8xf32>
    %cst_158 = arith.constant dense<0.000000e+00> : vector<16x8xf32>
    %382 = tpu.matmul %380, %381, %cst_158 {dimension_numbers = #tpu.dot_dimension_numbers<[1], [0], [0], [1], [0, 0, 1, 1], [], []>} : vector<16x16xf32>, vector<16x8xf32>, vector<16x8xf32> -> vector<16x8xf32>
    %383 = vector.extract_strided_slice %313 {offsets = [16, 0], sizes = [8, 32], strides = [1, 1]} : vector<32x32xf32> to vector<8x32xf32>
    %cst_159 = arith.constant dense<0.000000e+00> : vector<16x32xf32>
    %384 = tpu.matmul %382, %383, %cst_159 {dimension_numbers = #tpu.dot_dimension_numbers<[1], [0], [0], [1], [0, 0, 1, 1], [], []>} : vector<16x8xf32>, vector<8x32xf32>, vector<16x32xf32> -> vector<16x32xf32>
    %385 = arith.addf %364, %384 : vector<16x32xf32>
    %386 = vector.extract_strided_slice %319 {offsets = [0, 24], sizes = [16, 8], strides = [1, 1]} : vector<16x32xf32> to vector<16x8xf32>
    %387 = vector.extract_strided_slice %320 {offsets = [0, 24], sizes = [16, 8], strides = [1, 1]} : vector<16x32xf32> to vector<16x8xf32>
    %cst_160 = arith.constant dense<0.000000e+00> : vector<16x16xf32>
    %388 = tpu.matmul %386, %387, %cst_160 {dimension_numbers = #tpu.dot_dimension_numbers<[1], [1], [0], [0], [0, 0, 1, 0], [], []>} : vector<16x8xf32>, vector<16x8xf32>, vector<16x16xf32> -> vector<16x16xf32>
    %cst_161 = arith.constant 0.353553385 : f32
    %389 = vector.broadcast %cst_161 : f32 to vector<16x16xf32>
    %390 = arith.mulf %388, %389 : vector<16x16xf32>
    %391 = arith.addf %390, %2 : vector<16x16xf32>
    %cst_162 = arith.constant dense<0xFF800000> : vector<16xf32>
    %392 = vector.multi_reduction <maximumf>, %391, %cst_162 [1] : vector<16x16xf32> to vector<16xf32>
    %393 = vector.shape_cast %392 : vector<16xf32> to vector<16x1xf32>
    %394 = vector.broadcast %393 : vector<16x1xf32> to vector<16x16xf32>
    %395 = arith.subf %391, %394 : vector<16x16xf32>
    %396 = math.exp %395 : vector<16x16xf32>
    %cst_163 = arith.constant dense<0.000000e+00> : vector<16xf32>
    %397 = vector.multi_reduction <add>, %396, %cst_163 [1] : vector<16x16xf32> to vector<16xf32>
    %398 = vector.shape_cast %397 : vector<16xf32> to vector<16x1xf32>
    %399 = tpu.reciprocal %398 {approx = true} : vector<16x1xf32> -> vector<16x1xf32>
    %400 = vector.broadcast %399 : vector<16x1xf32> to vector<16x16xf32>
    %401 = arith.mulf %396, %400 : vector<16x16xf32>
    %402 = vector.extract_strided_slice %321 {offsets = [0, 24], sizes = [16, 8], strides = [1, 1]} : vector<16x32xf32> to vector<16x8xf32>
    %cst_164 = arith.constant dense<0.000000e+00> : vector<16x8xf32>
    %403 = tpu.matmul %401, %402, %cst_164 {dimension_numbers = #tpu.dot_dimension_numbers<[1], [0], [0], [1], [0, 0, 1, 1], [], []>} : vector<16x16xf32>, vector<16x8xf32>, vector<16x8xf32> -> vector<16x8xf32>
    %404 = vector.extract_strided_slice %313 {offsets = [24, 0], sizes = [8, 32], strides = [1, 1]} : vector<32x32xf32> to vector<8x32xf32>
    %cst_165 = arith.constant dense<0.000000e+00> : vector<16x32xf32>
    %405 = tpu.matmul %403, %404, %cst_165 {dimension_numbers = #tpu.dot_dimension_numbers<[1], [0], [0], [1], [0, 0, 1, 1], [], []>} : vector<16x8xf32>, vector<8x32xf32>, vector<16x32xf32> -> vector<16x32xf32>
    %406 = arith.addf %385, %405 : vector<16x32xf32>
    %407 = vector.broadcast %315 : vector<1x32xf32> to vector<16x32xf32>
    %408 = arith.addf %406, %407 : vector<16x32xf32>
    %409 = arith.addf %307, %408 : vector<16x32xf32>
    %c1_166 = arith.constant 1 : index
    %c0_167 = arith.constant 0 : index
    %c0_168 = arith.constant 0 : index
    %410 = vector.load %arg7[%c1_166, %c0_167, %c0_168] : memref<2x1x32xf32, #tpu.memory_space<vmem>>, vector<1x1x32xf32>
    %411 = vector.shape_cast %410 : vector<1x1x32xf32> to vector<1x32xf32>
    %c1_169 = arith.constant 1 : index
    %c0_170 = arith.constant 0 : index
    %c0_171 = arith.constant 0 : index
    %412 = vector.load %arg8[%c1_169, %c0_170, %c0_171] : memref<2x1x32xf32, #tpu.memory_space<vmem>>, vector<1x1x32xf32>
    %413 = vector.shape_cast %412 : vector<1x1x32xf32> to vector<1x32xf32>
    %cst_172 = arith.constant dense<0.000000e+00> : vector<16xf32>
    %414 = vector.multi_reduction <add>, %409, %cst_172 [1] : vector<16x32xf32> to vector<16xf32>
    %415 = vector.shape_cast %414 : vector<16xf32> to vector<16x1xf32>
    %cst_173 = arith.constant 3.200000e+01 : f32
    %416 = vector.broadcast %cst_173 : f32 to vector<16x1xf32>
    %417 = arith.divf %415, %416 : vector<16x1xf32>
    %418 = vector.broadcast %417 : vector<16x1xf32> to vector<16x32xf32>
    %419 = arith.subf %409, %418 : vector<16x32xf32>
    %420 = arith.mulf %419, %419 : vector<16x32xf32>
    %cst_174 = arith.constant dense<0.000000e+00> : vector<16xf32>
    %421 = vector.multi_reduction <add>, %420, %cst_174 [1] : vector<16x32xf32> to vector<16xf32>
    %422 = vector.shape_cast %421 : vector<16xf32> to vector<16x1xf32>
    %cst_175 = arith.constant 3.200000e+01 : f32
    %423 = vector.broadcast %cst_175 : f32 to vector<16x1xf32>
    %424 = arith.divf %422, %423 : vector<16x1xf32>
    %425 = vector.broadcast %417 : vector<16x1xf32> to vector<16x32xf32>
    %426 = arith.subf %409, %425 : vector<16x32xf32>
    %cst_176 = arith.constant 9.99999974E-6 : f32
    %427 = vector.broadcast %cst_176 : f32 to vector<16x1xf32>
    %428 = arith.addf %424, %427 : vector<16x1xf32>
    %429 = math.rsqrt %428 : vector<16x1xf32>
    %430 = vector.broadcast %429 : vector<16x1xf32> to vector<16x32xf32>
    %431 = arith.mulf %426, %430 : vector<16x32xf32>
    %432 = vector.broadcast %411 : vector<1x32xf32> to vector<16x32xf32>
    %433 = arith.mulf %431, %432 : vector<16x32xf32>
    %434 = vector.broadcast %413 : vector<1x32xf32> to vector<16x32xf32>
    %435 = arith.addf %433, %434 : vector<16x32xf32>
    %c1_177 = arith.constant 1 : index
    %c0_178 = arith.constant 0 : index
    %c0_179 = arith.constant 0 : index
    %436 = vector.load %arg9[%c1_177, %c0_178, %c0_179] : memref<2x32x96xf32, #tpu.memory_space<vmem>>, vector<1x32x96xf32>
    %437 = vector.shape_cast %436 : vector<1x32x96xf32> to vector<32x96xf32>
    %c1_180 = arith.constant 1 : index
    %c0_181 = arith.constant 0 : index
    %c0_182 = arith.constant 0 : index
    %438 = vector.load %arg10[%c1_180, %c0_181, %c0_182] : memref<2x1x96xf32, #tpu.memory_space<vmem>>, vector<1x1x96xf32>
    %439 = vector.shape_cast %438 : vector<1x1x96xf32> to vector<1x96xf32>
    %c1_183 = arith.constant 1 : index
    %c0_184 = arith.constant 0 : index
    %c0_185 = arith.constant 0 : index
    %440 = vector.load %arg11[%c1_183, %c0_184, %c0_185] : memref<2x32x32xf32, #tpu.memory_space<vmem>>, vector<1x32x32xf32>
    %441 = vector.shape_cast %440 : vector<1x32x32xf32> to vector<32x32xf32>
    %c1_186 = arith.constant 1 : index
    %c0_187 = arith.constant 0 : index
    %c0_188 = arith.constant 0 : index
    %442 = vector.load %arg12[%c1_186, %c0_187, %c0_188] : memref<2x1x32xf32, #tpu.memory_space<vmem>>, vector<1x1x32xf32>
    %443 = vector.shape_cast %442 : vector<1x1x32xf32> to vector<1x32xf32>
    %444 = vector.extract_strided_slice %437 {offsets = [0, 0], sizes = [32, 32], strides = [1, 1]} : vector<32x96xf32> to vector<32x32xf32>
    %cst_189 = arith.constant dense<0.000000e+00> : vector<16x32xf32>
    %445 = tpu.matmul %435, %444, %cst_189 {dimension_numbers = #tpu.dot_dimension_numbers<[1], [0], [0], [1], [0, 0, 1, 1], [], []>} : vector<16x32xf32>, vector<32x32xf32>, vector<16x32xf32> -> vector<16x32xf32>
    %446 = vector.extract_strided_slice %439 {offsets = [0, 0], sizes = [1, 32], strides = [1, 1]} : vector<1x96xf32> to vector<1x32xf32>
    %447 = vector.broadcast %446 : vector<1x32xf32> to vector<16x32xf32>
    %448 = arith.addf %445, %447 : vector<16x32xf32>
    %449 = vector.extract_strided_slice %437 {offsets = [0, 32], sizes = [32, 64], strides = [1, 1]} : vector<32x96xf32> to vector<32x64xf32>
    %cst_190 = arith.constant dense<0.000000e+00> : vector<16x64xf32>
    %450 = tpu.matmul %1, %449, %cst_190 {dimension_numbers = #tpu.dot_dimension_numbers<[1], [0], [0], [1], [0, 0, 1, 1], [], []>} : vector<16x32xf32>, vector<32x64xf32>, vector<16x64xf32> -> vector<16x64xf32>
    %451 = vector.extract_strided_slice %439 {offsets = [0, 32], sizes = [1, 64], strides = [1, 1]} : vector<1x96xf32> to vector<1x64xf32>
    %452 = vector.broadcast %451 : vector<1x64xf32> to vector<16x64xf32>
    %453 = arith.addf %450, %452 : vector<16x64xf32>
    %454 = vector.extract_strided_slice %453 {offsets = [0, 0], sizes = [16, 32], strides = [1, 1]} : vector<16x64xf32> to vector<16x32xf32>
    %455 = vector.extract_strided_slice %453 {offsets = [0, 32], sizes = [16, 32], strides = [1, 1]} : vector<16x64xf32> to vector<16x32xf32>
    %cst_191 = arith.constant 0.000000e+00 : f32
    %456 = vector.broadcast %cst_191 : f32 to vector<16x32xf32>
    %457 = vector.extract_strided_slice %448 {offsets = [0, 0], sizes = [16, 8], strides = [1, 1]} : vector<16x32xf32> to vector<16x8xf32>
    %458 = vector.extract_strided_slice %454 {offsets = [0, 0], sizes = [16, 8], strides = [1, 1]} : vector<16x32xf32> to vector<16x8xf32>
    %cst_192 = arith.constant dense<0.000000e+00> : vector<16x16xf32>
    %459 = tpu.matmul %457, %458, %cst_192 {dimension_numbers = #tpu.dot_dimension_numbers<[1], [1], [0], [0], [0, 0, 1, 0], [], []>} : vector<16x8xf32>, vector<16x8xf32>, vector<16x16xf32> -> vector<16x16xf32>
    %cst_193 = arith.constant 0.353553385 : f32
    %460 = vector.broadcast %cst_193 : f32 to vector<16x16xf32>
    %461 = arith.mulf %459, %460 : vector<16x16xf32>
    %462 = arith.addf %461, %2 : vector<16x16xf32>
    %cst_194 = arith.constant dense<0xFF800000> : vector<16xf32>
    %463 = vector.multi_reduction <maximumf>, %462, %cst_194 [1] : vector<16x16xf32> to vector<16xf32>
    %464 = vector.shape_cast %463 : vector<16xf32> to vector<16x1xf32>
    %465 = vector.broadcast %464 : vector<16x1xf32> to vector<16x16xf32>
    %466 = arith.subf %462, %465 : vector<16x16xf32>
    %467 = math.exp %466 : vector<16x16xf32>
    %cst_195 = arith.constant dense<0.000000e+00> : vector<16xf32>
    %468 = vector.multi_reduction <add>, %467, %cst_195 [1] : vector<16x16xf32> to vector<16xf32>
    %469 = vector.shape_cast %468 : vector<16xf32> to vector<16x1xf32>
    %470 = tpu.reciprocal %469 {approx = true} : vector<16x1xf32> -> vector<16x1xf32>
    %471 = vector.broadcast %470 : vector<16x1xf32> to vector<16x16xf32>
    %472 = arith.mulf %467, %471 : vector<16x16xf32>
    %473 = vector.extract_strided_slice %455 {offsets = [0, 0], sizes = [16, 8], strides = [1, 1]} : vector<16x32xf32> to vector<16x8xf32>
    %cst_196 = arith.constant dense<0.000000e+00> : vector<16x8xf32>
    %474 = tpu.matmul %472, %473, %cst_196 {dimension_numbers = #tpu.dot_dimension_numbers<[1], [0], [0], [1], [0, 0, 1, 1], [], []>} : vector<16x16xf32>, vector<16x8xf32>, vector<16x8xf32> -> vector<16x8xf32>
    %475 = vector.extract_strided_slice %441 {offsets = [0, 0], sizes = [8, 32], strides = [1, 1]} : vector<32x32xf32> to vector<8x32xf32>
    %cst_197 = arith.constant dense<0.000000e+00> : vector<16x32xf32>
    %476 = tpu.matmul %474, %475, %cst_197 {dimension_numbers = #tpu.dot_dimension_numbers<[1], [0], [0], [1], [0, 0, 1, 1], [], []>} : vector<16x8xf32>, vector<8x32xf32>, vector<16x32xf32> -> vector<16x32xf32>
    %477 = arith.addf %456, %476 : vector<16x32xf32>
    %478 = vector.extract_strided_slice %448 {offsets = [0, 8], sizes = [16, 8], strides = [1, 1]} : vector<16x32xf32> to vector<16x8xf32>
    %479 = vector.extract_strided_slice %454 {offsets = [0, 8], sizes = [16, 8], strides = [1, 1]} : vector<16x32xf32> to vector<16x8xf32>
    %cst_198 = arith.constant dense<0.000000e+00> : vector<16x16xf32>
    %480 = tpu.matmul %478, %479, %cst_198 {dimension_numbers = #tpu.dot_dimension_numbers<[1], [1], [0], [0], [0, 0, 1, 0], [], []>} : vector<16x8xf32>, vector<16x8xf32>, vector<16x16xf32> -> vector<16x16xf32>
    %cst_199 = arith.constant 0.353553385 : f32
    %481 = vector.broadcast %cst_199 : f32 to vector<16x16xf32>
    %482 = arith.mulf %480, %481 : vector<16x16xf32>
    %483 = arith.addf %482, %2 : vector<16x16xf32>
    %cst_200 = arith.constant dense<0xFF800000> : vector<16xf32>
    %484 = vector.multi_reduction <maximumf>, %483, %cst_200 [1] : vector<16x16xf32> to vector<16xf32>
    %485 = vector.shape_cast %484 : vector<16xf32> to vector<16x1xf32>
    %486 = vector.broadcast %485 : vector<16x1xf32> to vector<16x16xf32>
    %487 = arith.subf %483, %486 : vector<16x16xf32>
    %488 = math.exp %487 : vector<16x16xf32>
    %cst_201 = arith.constant dense<0.000000e+00> : vector<16xf32>
    %489 = vector.multi_reduction <add>, %488, %cst_201 [1] : vector<16x16xf32> to vector<16xf32>
    %490 = vector.shape_cast %489 : vector<16xf32> to vector<16x1xf32>
    %491 = tpu.reciprocal %490 {approx = true} : vector<16x1xf32> -> vector<16x1xf32>
    %492 = vector.broadcast %491 : vector<16x1xf32> to vector<16x16xf32>
    %493 = arith.mulf %488, %492 : vector<16x16xf32>
    %494 = vector.extract_strided_slice %455 {offsets = [0, 8], sizes = [16, 8], strides = [1, 1]} : vector<16x32xf32> to vector<16x8xf32>
    %cst_202 = arith.constant dense<0.000000e+00> : vector<16x8xf32>
    %495 = tpu.matmul %493, %494, %cst_202 {dimension_numbers = #tpu.dot_dimension_numbers<[1], [0], [0], [1], [0, 0, 1, 1], [], []>} : vector<16x16xf32>, vector<16x8xf32>, vector<16x8xf32> -> vector<16x8xf32>
    %496 = vector.extract_strided_slice %441 {offsets = [8, 0], sizes = [8, 32], strides = [1, 1]} : vector<32x32xf32> to vector<8x32xf32>
    %cst_203 = arith.constant dense<0.000000e+00> : vector<16x32xf32>
    %497 = tpu.matmul %495, %496, %cst_203 {dimension_numbers = #tpu.dot_dimension_numbers<[1], [0], [0], [1], [0, 0, 1, 1], [], []>} : vector<16x8xf32>, vector<8x32xf32>, vector<16x32xf32> -> vector<16x32xf32>
    %498 = arith.addf %477, %497 : vector<16x32xf32>
    %499 = vector.extract_strided_slice %448 {offsets = [0, 16], sizes = [16, 8], strides = [1, 1]} : vector<16x32xf32> to vector<16x8xf32>
    %500 = vector.extract_strided_slice %454 {offsets = [0, 16], sizes = [16, 8], strides = [1, 1]} : vector<16x32xf32> to vector<16x8xf32>
    %cst_204 = arith.constant dense<0.000000e+00> : vector<16x16xf32>
    %501 = tpu.matmul %499, %500, %cst_204 {dimension_numbers = #tpu.dot_dimension_numbers<[1], [1], [0], [0], [0, 0, 1, 0], [], []>} : vector<16x8xf32>, vector<16x8xf32>, vector<16x16xf32> -> vector<16x16xf32>
    %cst_205 = arith.constant 0.353553385 : f32
    %502 = vector.broadcast %cst_205 : f32 to vector<16x16xf32>
    %503 = arith.mulf %501, %502 : vector<16x16xf32>
    %504 = arith.addf %503, %2 : vector<16x16xf32>
    %cst_206 = arith.constant dense<0xFF800000> : vector<16xf32>
    %505 = vector.multi_reduction <maximumf>, %504, %cst_206 [1] : vector<16x16xf32> to vector<16xf32>
    %506 = vector.shape_cast %505 : vector<16xf32> to vector<16x1xf32>
    %507 = vector.broadcast %506 : vector<16x1xf32> to vector<16x16xf32>
    %508 = arith.subf %504, %507 : vector<16x16xf32>
    %509 = math.exp %508 : vector<16x16xf32>
    %cst_207 = arith.constant dense<0.000000e+00> : vector<16xf32>
    %510 = vector.multi_reduction <add>, %509, %cst_207 [1] : vector<16x16xf32> to vector<16xf32>
    %511 = vector.shape_cast %510 : vector<16xf32> to vector<16x1xf32>
    %512 = tpu.reciprocal %511 {approx = true} : vector<16x1xf32> -> vector<16x1xf32>
    %513 = vector.broadcast %512 : vector<16x1xf32> to vector<16x16xf32>
    %514 = arith.mulf %509, %513 : vector<16x16xf32>
    %515 = vector.extract_strided_slice %455 {offsets = [0, 16], sizes = [16, 8], strides = [1, 1]} : vector<16x32xf32> to vector<16x8xf32>
    %cst_208 = arith.constant dense<0.000000e+00> : vector<16x8xf32>
    %516 = tpu.matmul %514, %515, %cst_208 {dimension_numbers = #tpu.dot_dimension_numbers<[1], [0], [0], [1], [0, 0, 1, 1], [], []>} : vector<16x16xf32>, vector<16x8xf32>, vector<16x8xf32> -> vector<16x8xf32>
    %517 = vector.extract_strided_slice %441 {offsets = [16, 0], sizes = [8, 32], strides = [1, 1]} : vector<32x32xf32> to vector<8x32xf32>
    %cst_209 = arith.constant dense<0.000000e+00> : vector<16x32xf32>
    %518 = tpu.matmul %516, %517, %cst_209 {dimension_numbers = #tpu.dot_dimension_numbers<[1], [0], [0], [1], [0, 0, 1, 1], [], []>} : vector<16x8xf32>, vector<8x32xf32>, vector<16x32xf32> -> vector<16x32xf32>
    %519 = arith.addf %498, %518 : vector<16x32xf32>
    %520 = vector.extract_strided_slice %448 {offsets = [0, 24], sizes = [16, 8], strides = [1, 1]} : vector<16x32xf32> to vector<16x8xf32>
    %521 = vector.extract_strided_slice %454 {offsets = [0, 24], sizes = [16, 8], strides = [1, 1]} : vector<16x32xf32> to vector<16x8xf32>
    %cst_210 = arith.constant dense<0.000000e+00> : vector<16x16xf32>
    %522 = tpu.matmul %520, %521, %cst_210 {dimension_numbers = #tpu.dot_dimension_numbers<[1], [1], [0], [0], [0, 0, 1, 0], [], []>} : vector<16x8xf32>, vector<16x8xf32>, vector<16x16xf32> -> vector<16x16xf32>
    %cst_211 = arith.constant 0.353553385 : f32
    %523 = vector.broadcast %cst_211 : f32 to vector<16x16xf32>
    %524 = arith.mulf %522, %523 : vector<16x16xf32>
    %525 = arith.addf %524, %2 : vector<16x16xf32>
    %cst_212 = arith.constant dense<0xFF800000> : vector<16xf32>
    %526 = vector.multi_reduction <maximumf>, %525, %cst_212 [1] : vector<16x16xf32> to vector<16xf32>
    %527 = vector.shape_cast %526 : vector<16xf32> to vector<16x1xf32>
    %528 = vector.broadcast %527 : vector<16x1xf32> to vector<16x16xf32>
    %529 = arith.subf %525, %528 : vector<16x16xf32>
    %530 = math.exp %529 : vector<16x16xf32>
    %cst_213 = arith.constant dense<0.000000e+00> : vector<16xf32>
    %531 = vector.multi_reduction <add>, %530, %cst_213 [1] : vector<16x16xf32> to vector<16xf32>
    %532 = vector.shape_cast %531 : vector<16xf32> to vector<16x1xf32>
    %533 = tpu.reciprocal %532 {approx = true} : vector<16x1xf32> -> vector<16x1xf32>
    %534 = vector.broadcast %533 : vector<16x1xf32> to vector<16x16xf32>
    %535 = arith.mulf %530, %534 : vector<16x16xf32>
    %536 = vector.extract_strided_slice %455 {offsets = [0, 24], sizes = [16, 8], strides = [1, 1]} : vector<16x32xf32> to vector<16x8xf32>
    %cst_214 = arith.constant dense<0.000000e+00> : vector<16x8xf32>
    %537 = tpu.matmul %535, %536, %cst_214 {dimension_numbers = #tpu.dot_dimension_numbers<[1], [0], [0], [1], [0, 0, 1, 1], [], []>} : vector<16x16xf32>, vector<16x8xf32>, vector<16x8xf32> -> vector<16x8xf32>
    %538 = vector.extract_strided_slice %441 {offsets = [24, 0], sizes = [8, 32], strides = [1, 1]} : vector<32x32xf32> to vector<8x32xf32>
    %cst_215 = arith.constant dense<0.000000e+00> : vector<16x32xf32>
    %539 = tpu.matmul %537, %538, %cst_215 {dimension_numbers = #tpu.dot_dimension_numbers<[1], [0], [0], [1], [0, 0, 1, 1], [], []>} : vector<16x8xf32>, vector<8x32xf32>, vector<16x32xf32> -> vector<16x32xf32>
    %540 = arith.addf %519, %539 : vector<16x32xf32>
    %541 = vector.broadcast %443 : vector<1x32xf32> to vector<16x32xf32>
    %542 = arith.addf %540, %541 : vector<16x32xf32>
    %543 = arith.addf %435, %542 : vector<16x32xf32>
    %c1_216 = arith.constant 1 : index
    %c0_217 = arith.constant 0 : index
    %c0_218 = arith.constant 0 : index
    %544 = vector.load %arg13[%c1_216, %c0_217, %c0_218] : memref<2x1x32xf32, #tpu.memory_space<vmem>>, vector<1x1x32xf32>
    %545 = vector.shape_cast %544 : vector<1x1x32xf32> to vector<1x32xf32>
    %c1_219 = arith.constant 1 : index
    %c0_220 = arith.constant 0 : index
    %c0_221 = arith.constant 0 : index
    %546 = vector.load %arg14[%c1_219, %c0_220, %c0_221] : memref<2x1x32xf32, #tpu.memory_space<vmem>>, vector<1x1x32xf32>
    %547 = vector.shape_cast %546 : vector<1x1x32xf32> to vector<1x32xf32>
    %cst_222 = arith.constant dense<0.000000e+00> : vector<16xf32>
    %548 = vector.multi_reduction <add>, %543, %cst_222 [1] : vector<16x32xf32> to vector<16xf32>
    %549 = vector.shape_cast %548 : vector<16xf32> to vector<16x1xf32>
    %cst_223 = arith.constant 3.200000e+01 : f32
    %550 = vector.broadcast %cst_223 : f32 to vector<16x1xf32>
    %551 = arith.divf %549, %550 : vector<16x1xf32>
    %552 = vector.broadcast %551 : vector<16x1xf32> to vector<16x32xf32>
    %553 = arith.subf %543, %552 : vector<16x32xf32>
    %554 = arith.mulf %553, %553 : vector<16x32xf32>
    %cst_224 = arith.constant dense<0.000000e+00> : vector<16xf32>
    %555 = vector.multi_reduction <add>, %554, %cst_224 [1] : vector<16x32xf32> to vector<16xf32>
    %556 = vector.shape_cast %555 : vector<16xf32> to vector<16x1xf32>
    %cst_225 = arith.constant 3.200000e+01 : f32
    %557 = vector.broadcast %cst_225 : f32 to vector<16x1xf32>
    %558 = arith.divf %556, %557 : vector<16x1xf32>
    %559 = vector.broadcast %551 : vector<16x1xf32> to vector<16x32xf32>
    %560 = arith.subf %543, %559 : vector<16x32xf32>
    %cst_226 = arith.constant 9.99999974E-6 : f32
    %561 = vector.broadcast %cst_226 : f32 to vector<16x1xf32>
    %562 = arith.addf %558, %561 : vector<16x1xf32>
    %563 = math.rsqrt %562 : vector<16x1xf32>
    %564 = vector.broadcast %563 : vector<16x1xf32> to vector<16x32xf32>
    %565 = arith.mulf %560, %564 : vector<16x32xf32>
    %566 = vector.broadcast %545 : vector<1x32xf32> to vector<16x32xf32>
    %567 = arith.mulf %565, %566 : vector<16x32xf32>
    %568 = vector.broadcast %547 : vector<1x32xf32> to vector<16x32xf32>
    %569 = arith.addf %567, %568 : vector<16x32xf32>
    %c1_227 = arith.constant 1 : index
    %c0_228 = arith.constant 0 : index
    %c0_229 = arith.constant 0 : index
    %570 = vector.load %arg15[%c1_227, %c0_228, %c0_229] : memref<2x32x64xf32, #tpu.memory_space<vmem>>, vector<1x32x64xf32>
    %571 = vector.shape_cast %570 : vector<1x32x64xf32> to vector<32x64xf32>
    %c1_230 = arith.constant 1 : index
    %c0_231 = arith.constant 0 : index
    %c0_232 = arith.constant 0 : index
    %572 = vector.load %arg16[%c1_230, %c0_231, %c0_232] : memref<2x1x64xf32, #tpu.memory_space<vmem>>, vector<1x1x64xf32>
    %573 = vector.shape_cast %572 : vector<1x1x64xf32> to vector<1x64xf32>
    %c1_233 = arith.constant 1 : index
    %c0_234 = arith.constant 0 : index
    %c0_235 = arith.constant 0 : index
    %574 = vector.load %arg17[%c1_233, %c0_234, %c0_235] : memref<2x64x32xf32, #tpu.memory_space<vmem>>, vector<1x64x32xf32>
    %575 = vector.shape_cast %574 : vector<1x64x32xf32> to vector<64x32xf32>
    %c1_236 = arith.constant 1 : index
    %c0_237 = arith.constant 0 : index
    %c0_238 = arith.constant 0 : index
    %576 = vector.load %arg18[%c1_236, %c0_237, %c0_238] : memref<2x1x32xf32, #tpu.memory_space<vmem>>, vector<1x1x32xf32>
    %577 = vector.shape_cast %576 : vector<1x1x32xf32> to vector<1x32xf32>
    %cst_239 = arith.constant dense<0.000000e+00> : vector<16x64xf32>
    %578 = tpu.matmul %569, %571, %cst_239 {dimension_numbers = #tpu.dot_dimension_numbers<[1], [0], [0], [1], [0, 0, 1, 1], [], []>} : vector<16x32xf32>, vector<32x64xf32>, vector<16x64xf32> -> vector<16x64xf32>
    %579 = vector.broadcast %573 : vector<1x64xf32> to vector<16x64xf32>
    %580 = arith.addf %578, %579 : vector<16x64xf32>
    %cst_240 = arith.constant 0.000000e+00 : f32
    %581 = vector.broadcast %cst_240 : f32 to vector<16x64xf32>
    %582 = arith.maximumf %580, %581 : vector<16x64xf32>
    %cst_241 = arith.constant dense<0.000000e+00> : vector<16x32xf32>
    %583 = tpu.matmul %582, %575, %cst_241 {dimension_numbers = #tpu.dot_dimension_numbers<[1], [0], [0], [1], [0, 0, 1, 1], [], []>} : vector<16x64xf32>, vector<64x32xf32>, vector<16x32xf32> -> vector<16x32xf32>
    %584 = vector.broadcast %577 : vector<1x32xf32> to vector<16x32xf32>
    %585 = arith.addf %583, %584 : vector<16x32xf32>
    %586 = arith.addf %569, %585 : vector<16x32xf32>
    %c1_242 = arith.constant 1 : index
    %c0_243 = arith.constant 0 : index
    %c0_244 = arith.constant 0 : index
    %587 = vector.load %arg19[%c1_242, %c0_243, %c0_244] : memref<2x1x32xf32, #tpu.memory_space<vmem>>, vector<1x1x32xf32>
    %588 = vector.shape_cast %587 : vector<1x1x32xf32> to vector<1x32xf32>
    %c1_245 = arith.constant 1 : index
    %c0_246 = arith.constant 0 : index
    %c0_247 = arith.constant 0 : index
    %589 = vector.load %arg20[%c1_245, %c0_246, %c0_247] : memref<2x1x32xf32, #tpu.memory_space<vmem>>, vector<1x1x32xf32>
    %590 = vector.shape_cast %589 : vector<1x1x32xf32> to vector<1x32xf32>
    %cst_248 = arith.constant dense<0.000000e+00> : vector<16xf32>
    %591 = vector.multi_reduction <add>, %586, %cst_248 [1] : vector<16x32xf32> to vector<16xf32>
    %592 = vector.shape_cast %591 : vector<16xf32> to vector<16x1xf32>
    %cst_249 = arith.constant 3.200000e+01 : f32
    %593 = vector.broadcast %cst_249 : f32 to vector<16x1xf32>
    %594 = arith.divf %592, %593 : vector<16x1xf32>
    %595 = vector.broadcast %594 : vector<16x1xf32> to vector<16x32xf32>
    %596 = arith.subf %586, %595 : vector<16x32xf32>
    %597 = arith.mulf %596, %596 : vector<16x32xf32>
    %cst_250 = arith.constant dense<0.000000e+00> : vector<16xf32>
    %598 = vector.multi_reduction <add>, %597, %cst_250 [1] : vector<16x32xf32> to vector<16xf32>
    %599 = vector.shape_cast %598 : vector<16xf32> to vector<16x1xf32>
    %cst_251 = arith.constant 3.200000e+01 : f32
    %600 = vector.broadcast %cst_251 : f32 to vector<16x1xf32>
    %601 = arith.divf %599, %600 : vector<16x1xf32>
    %602 = vector.broadcast %594 : vector<16x1xf32> to vector<16x32xf32>
    %603 = arith.subf %586, %602 : vector<16x32xf32>
    %cst_252 = arith.constant 9.99999974E-6 : f32
    %604 = vector.broadcast %cst_252 : f32 to vector<16x1xf32>
    %605 = arith.addf %601, %604 : vector<16x1xf32>
    %606 = math.rsqrt %605 : vector<16x1xf32>
    %607 = vector.broadcast %606 : vector<16x1xf32> to vector<16x32xf32>
    %608 = arith.mulf %603, %607 : vector<16x32xf32>
    %609 = vector.broadcast %588 : vector<1x32xf32> to vector<16x32xf32>
    %610 = arith.mulf %608, %609 : vector<16x32xf32>
    %611 = vector.broadcast %590 : vector<1x32xf32> to vector<16x32xf32>
    %612 = arith.addf %610, %611 : vector<16x32xf32>
    %c0_253 = arith.constant 0 : index
    %c0_254 = arith.constant 0 : index
    %613 = vector.load %arg21[%c0_253, %c0_254] : memref<32x128xf32, #tpu.memory_space<vmem>>, vector<32x128xf32>
    %cst_255 = arith.constant dense<0.000000e+00> : vector<16x128xf32>
    %614 = tpu.matmul %612, %613, %cst_255 {dimension_numbers = #tpu.dot_dimension_numbers<[1], [0], [0], [1], [0, 0, 1, 1], [], []>} : vector<16x32xf32>, vector<32x128xf32>, vector<16x128xf32> -> vector<16x128xf32>
    %c0_256 = arith.constant 0 : index
    %c0_257 = arith.constant 0 : index
    %615 = vector.load %arg22[%c0_256, %c0_257] : memref<1x128xf32, #tpu.memory_space<vmem>>, vector<1x128xf32>
    %616 = vector.broadcast %615 : vector<1x128xf32> to vector<16x128xf32>
    %617 = arith.addf %614, %616 : vector<16x128xf32>
    %c0_258 = arith.constant 0 : index
    %c0_259 = arith.constant 0 : index
    %618 = vector.load %arg23[%c0_258, %c0_259] : memref<16x128xf32, #tpu.memory_space<vmem>>, vector<16x128xf32>
    tpu.vector_store %arg23[%c0_258, %c0_259], %617 {strides = array<i32>} : memref<16x128xf32, #tpu.memory_space<vmem>>, vector<16x128xf32>,
    return
  }
}

</mosaic_0001>

<bundles_post_ra>
// kernel: _lambda_.2
= control target key start
LH: loop header
LB: loop body
LE: loop exit
PB: predicated region body
PF: predicated region fallthrough
CT: control target
= control target key end

     0   :  { %vm67_vm0 = vcmask 261120   ;;  %vm155_vm1 = vcmask 64512   ;;  %s3711_s27 = smov 88   ;;  %s3713_s28 = smov 120   ;;  %vm243_vm2 = vcmask 130048   ;;  %vm1457_vm3 = vcmask 523264   ;;  %s4275_s2 = inlined_call_operand.vmem [shape: f32[2,32,96], index: 2, kind: input, shape index: {}]   ;;  %s4276_s0 = inlined_call_operand.vmem [shape: f32[16,32], index: 0, kind: input, shape index: {}]   ;;  %s4277_s3 = inlined_call_operand.vmem [shape: f32[2,1,96], index: 3, kind: input, shape index: {}]   ;;  %s4278_s1 = inlined_call_operand.vmem [shape: f32[16,16], index: 1, kind: input, shape index: {}]   ;;  %s4279_s4 = inlined_call_operand.vmem [shape: f32[2,32,32], index: 4, kind: input, shape index: {}]   ;;  %s4280_s5 = inlined_call_operand.vmem [shape: f32[2,1,32], index: 5, kind: input, shape index: {}, may-alias: {5,7,11,13}]   ;;  %s4281_s8 = inlined_call_operand.vmem [shape: f32[2,32,64], index: 8, kind: input, shape index: {}]   ;;  %s4282_s10 = inlined_call_operand.vmem [shape: f32[2,64,32], index: 10, kind: input, shape index: {}]   ;;  %s4283_s6 = inlined_call_operand.vmem [shape: f32[2,1,32], index: 6, kind: input, shape index: {}, may-alias: {6,12}]   ;;  %s4284_s7 = inlined_call_operand.vmem [shape: f32[2,1,32], index: 7, kind: input, shape index: {}, may-alias: {5,7,11,13}]   ;;  %s4285_s9 = inlined_call_operand.vmem [shape: f32[2,1,64], index: 9, kind: input, shape index: {}]   ;;  %s4286_s11 = inlined_call_operand.vmem [shape: f32[2,1,32], index: 11, kind: input, shape index: {}, may-alias: {5,7,11,13}]   ;;  %s4287_s12 = inlined_call_operand.vmem [shape: f32[2,1,32], index: 12, kind: input, shape index: {}, may-alias: {6,12}]   ;;  %s4288_s13 = inlined_call_operand.vmem [shape: f32[2,1,32], index: 13, kind: input, shape index: {}, may-alias: {5,7,11,13}]   ;;  %s4289_s14 = inlined_call_operand.vmem [shape: f32[16,32], index: 14, kind: output, shape index: {}]  }
   0x1   :  { %v54_v0 = vld [vmem:[%s4275_s2 + $0x18] sm:$0xff]  ;;  %v53_v1 = vld [vmem:[%s4275_s2 + $0x10] sm:$0xff]  ;;  %v3806_v2 = vld [vmem:[%s4276_s0] sm:$0xff]  ;;  %s3714_s17 = smov 64   ;;  %s3715_s18 = smov 56  }
   0x2   :  { %3384 = vmatprep.subr.mxu0 %v54_v0  ;;  %v52_v3 = vld [vmem:[%s4275_s2 + $0x8] sm:$0xff]  ;;  %3392 = vmatprep.mubr.msk.f32.mxu0 %vm67_vm0, %v3806_v2  ;;  %v51_v4 = vld [vmem:[%s4275_s2] sm:$0xff]  ;;  %s3716_s19 = smov 80   ;;  %s3717_s20 = smov 112  }
   0x3   :  { %3385 = vmatpush3.msra.mxu0 %v54_v0  ;;  %v3819_v5 = vld [vmem:[%s4276_s0 + $0x8] sm:$0xff]  ;;  %v3132_v6 = vld [vmem:[%s4277_s3] ss:$0 sm:$0xff]  ;;  %s3712_s0 = smov 96   ;;  %s3718_s21 = smov 72  }
   0x4   :  { %3386 = vmatprep.subr.mxu0 %v53_v1  ;;  %v3859_v18 = vld [vmem:[%s4278_s1 + $0x8] sm:$0xff]  ;;  %v3864_v21 = vld [vmem:[%s4278_s1] sm:$0xff]  ;;  %s3719_s22 = smov 104   ;;  %s4292_s29 = smov 48  }
   0x5   :  { %3387 = vmatpush3.msra.mxu0 %v53_v1  ;;  %s4290_s30 = smov 40  }
   0x6   :  { %3388 = vmatprep.subr.mxu0 %v52_v3 }
   0x7   :  { %3389 = vmatpush3.msra.mxu0 %v52_v3 }
   0x8   :  { %3390 = vmatprep.subr.mxu0 %v51_v4 }
   0x9   :  { %3391 = vmatpush3.msra.mxu0 %v51_v4 }
   0xa   :  { %3393 = vmatmul.mubr.msk.f32.vlgmr.msra.gmra.mxu0 %vm67_vm0, %v3819_v5 }
  0xca   :  { %v3394_v7 = vpop.f32.mrf.mxu0 }
  0xcb   :  { %v3826_v8 = vadd.f32 %v3394_v7, %v3132_v6 }
  0xcc   :  { %v140_v9 = vpop.f32.mrf.mxu0 }
  0xcd   :  { %v3828_v10 = vadd.f32 %v3132_v6, %v140_v9  ;;  %359 = vrot.lane.b32.xlu1 %v3826_v8, %s3711_s27  ;;  %153 = vrot.lane.b32.xlu0 %v3826_v8, %s3712_s0 }
  0xcf   :  { %3399 = vmatprep.mubr.msk.f32.mxu1 %vm155_vm1, %v3828_v10 }
  0xd1   :  { %357 = vrot.lane.b32.xlu1 %v3828_v10, %s3711_s27  ;;  %151 = vrot.lane.b32.xlu0 %v3828_v10, %s3712_s0 }
  0xd5   :  { %355 = vrot.lane.b32.xlu1 %v3826_v8, %s3713_s28  ;;  %353 = vrot.lane.b32.xlu0 %v3828_v10, %s3713_s28 }
 0x13f   :  { %v154_v11 = vpop.permute.xlu0 %153  ;;  %v360_v12 = vpop.permute.xlu1 %359 }
 0x140   :  { %3395 = vmatprep.subr.msk.mxu1 %vm155_vm1, %v154_v11 }
 0x141   :  { %3396 = vmatpush3.xpose.msk.msra.mxu1 %vm155_vm1, %v154_v11  ;;  %v57_v11 = vld [vmem:[%s4279_s4 + $0x8] sm:$0xff] }
 0x143   :  { %v152_v13 = vpop.permute.xlu0 %151  ;;  %v358_v15 = vpop.permute.xlu1 %357 }
 0x144   :  { %3397 = vmatprep.subr.msk.mxu1 %vm155_vm1, %v152_v13 }
 0x145   :  { %3398 = vmatpush3.xpose.msk.msra.mxu1 %vm155_vm1, %v152_v13 }
 0x146   :  { %3409 = vmatprep.subr.msk.mxu1 %vm155_vm1, %v360_v12 }
 0x147   :  { %v354_v14 = vpop.permute.xlu0 %353  ;;  %v356_v16 = vpop.permute.xlu1 %355 }
 0x148   :  { %3400 = vmatmul.mubr.msk.f32.vlgmr.msra.gmra.mxu1 %vm155_vm1, %v3826_v8 }
 0x149   :  { %3410 = vmatpush3.xpose.msk.msra.mxu1 %vm155_vm1, %v360_v12  ;;  %3413 = vmatprep.mubr.msk.f32.mxu1 %vm155_vm1, %v354_v14  ;;  %v56_v12 = vld [vmem:[%s4279_s4] sm:$0xff] }
 0x14a   :  { %3411 = vmatprep.subr.msk.mxu1 %vm155_vm1, %v358_v15 }
 0x14d   :  { %3412 = vmatpush3.xpose.msk.msra.mxu1 %vm155_vm1, %v358_v15 }
 0x150   :  { %3414 = vmatmul.mubr.msk.f32.vlgmr.msra.gmra.mxu1 %vm155_vm1, %v356_v16 }
 0x208   :  { %v3401_v17 = vpop.f32.mrf.mxu1 }
 0x209   :  { %v240_v19 = vmul.f32 0.35355338, %v3401_v17 }
 0x20a   :  { %v230_v20 = vpop.f32.mrf.mxu1 }
 0x20b   :  { %v239_v22 = vmul.f32 0.35355338, %v230_v20  ;;  %v242_v23 = vadd.f32 %v240_v19, %v3859_v18 }
 0x20d   :  { %v247_v24 = vsel %vm243_vm2, %v242_v23, -inf  ;;  %v241_v25 = vadd.f32 %v239_v22, %v3864_v21 }
 0x20e   :  { %248 = vmax.xlane.f32.xlu1 %v247_v24 }
 0x20f   :  { %v244_v26 = vsel %vm243_vm2, %v241_v25, -inf }
 0x210   :  { %v3415_v27 = vpop.f32.mrf.mxu1  ;;  %245 = vmax.xlane.f32.xlu0 %v244_v26 }
 0x211   :  { %v445_v29 = vmul.f32 0.35355338, %v3415_v27 }
 0x212   :  { %v435_v28 = vpop.f32.mrf.mxu1 }
 0x213   :  { %v444_v30 = vmul.f32 0.35355338, %v435_v28  ;;  %v447_v33 = vadd.f32 %v445_v29, %v3859_v18 }
 0x215   :  { %v446_v31 = vadd.f32 %v444_v30, %v3864_v21  ;;  %v451_v34 = vsel %vm243_vm2, %v447_v33, -inf }
 0x217   :  { %v448_v32 = vsel %vm243_vm2, %v446_v31, -inf }
 0x218   :  { %449 = vmax.xlane.f32.xlu0 %v448_v32 }
 0x21c   :  { %452 = vmax.xlane.f32.xlu0 %v451_v34 }
 0x21f   :  { %268 = vrot.lane.b32.xlu1 %v3826_v8, %s3714_s17 }
 0x297   :  { %v249_v35 = vpop.xlane.xlu1 %248 }
 0x298   :  { %v251_v36 = vsub.f32 %v242_v23, %v249_v35 }
 0x299   :  { %v246_v37 = vpop.xlane.xlu0 %245 }
 0x29a   :  { %v254_v38 = vmul.f32 1.442695, %v251_v36  ;;  %v250_v39 = vsub.f32 %v241_v25, %v246_v37 }
 0x29b   :  { %v269_v40 = vpop.permute.xlu1 %268 }
 0x29c   :  { %3629 = vpow2.f32 %v254_v38  ;;  %v252_v41 = vmul.f32 1.442695, %v250_v39  ;;  %3402 = vmatprep.subr.mxu0 %v269_v40 }
 0x29d   :  { %3403 = vmatpush3.msra.mxu0 %v269_v40 }
 0x29e   :  { %3631 = vpow2.f32 %v252_v41 }
 0x2a1   :  { %v450_v42 = vpop.xlane.xlu0 %449 }
 0x2a2   :  { %v454_v52 = vsub.f32 %v446_v31, %v450_v42 }
 0x2a4   :  { %v456_v53 = vmul.f32 1.442695, %v454_v52 }
 0x2a5   :  { %v453_v43 = vpop.xlane.xlu0 %452 }
 0x2a6   :  { %v455_v44 = vsub.f32 %v447_v33, %v453_v43 }
 0x2a8   :  { %v458_v45 = vmul.f32 1.442695, %v455_v44 }
 0x2a9   :  { %v3630_v46 = vpop.eup %3629 }
 0x2aa   :  { %3633 = vpow2.f32 %v458_v45  ;;  %v259_v47 = vsel %vm243_vm2, %v3630_v46, 0.0 }
 0x2ab   :  { %v3632_v48 = vpop.eup %3631  ;;  %260 = vadd.xlane.f32.xlu0 %v259_v47  ;;  %3635 = vpow2.f32 %v456_v53 }
 0x2ac   :  { %v256_v49 = vsel %vm243_vm2, %v3632_v48, 0.0 }
 0x2ad   :  { %257 = vadd.xlane.f32.xlu1 %v256_v49 }
 0x2b7   :  { %v3634_v50 = vpop.eup %3633 }
 0x2b8   :  { %v463_v51 = vsel %vm243_vm2, %v3634_v50, 0.0  ;;  %v3636_v54 = vpop.eup %3635 }
 0x2b9   :  { %464 = vadd.xlane.f32.xlu0 %v463_v51  ;;  %v460_v55 = vsel %vm243_vm2, %v3636_v54, 0.0 }
 0x2be   :  { %472 = vrot.lane.b32.xlu1 %v3826_v8, %s3715_s18 }
 0x2cf   :  { %266 = vrot.lane.b32.xlu0 %v3828_v10, %s3714_s17 }
 0x2d3   :  { %725 = vrot.lane.b32.xlu0 %v3826_v8, %s3716_s19 }
 0x2d7   :  { %719 = vrot.lane.b32.xlu0 %v3828_v10, %s3717_s20 }
 0x2db   :  { %1012 = vrot.lane.b32.xlu0 %v3826_v8, %s3718_s21 }
 0x2df   :  { %1006 = vrot.lane.b32.xlu0 %v3828_v10, %s3719_s22 }
 0x2e2   :  { %461 = vadd.xlane.f32.xlu1 %v460_v55 }
 0x2f3   :  { %470 = vrot.lane.b32.xlu1 %v3828_v10, %s3715_s18 }
 0x2f7   :  { %723 = vrot.lane.b32.xlu1 %v3828_v10, %s3716_s19 }
 0x2fb   :  { %721 = vrot.lane.b32.xlu1 %v3826_v8, %s3717_s20 }
 0x2ff   :  { %1010 = vrot.lane.b32.xlu1 %v3828_v10, %s3718_s21 }
 0x303   :  { %1008 = vrot.lane.b32.xlu1 %v3826_v8, %s3719_s22 }
 0x334   :  { %v261_v56 = vpop.xlane.xlu0 %260 }
 0x335   :  { %3637 = vrcp.f32 %v261_v56 }
 0x336   :  { %v258_v57 = vpop.xlane.xlu1 %257 }
 0x337   :  { %3639 = vrcp.f32 %v258_v57 }
 0x33a   :  { %v473_v0 = vpop.permute.xlu1 %472 }
 0x342   :  { %v465_v58 = vpop.xlane.xlu0 %464  ;;  %v3638_v59 = vpop.eup %3637 }
 0x343   :  { %v265_v63 = vmul.f32 %v3638_v59, %v3630_v46  ;;  %3641 = vrcp.f32 %v465_v58 }
 0x344   :  { %v3640_v60 = vpop.eup %3639 }
 0x345   :  { %v264_v61 = vmul.f32 %v3640_v60, %v3632_v48 }
 0x346   :  { %v267_v62 = vpop.permute.xlu0 %266 }
 0x347   :  { %3404 = vmatprep.subr.mxu0 %v267_v62  ;;  %3406 = vmatprep.mubr.msk.f32.mxu0 %vm243_vm2, %v264_v61 }
 0x348   :  { %3405 = vmatpush3.msra.mxu0 %v267_v62 }
 0x349   :  { %3407 = vmatmul.mubr.msk.f32.vlgmr.msra.gmra.mxu0 %vm243_vm2, %v265_v63  ;;  %3416 = vmatprep.subr.mxu0 %v473_v0 }
 0x34a   :  { %3417 = vmatpush3.msra.mxu0 %v473_v0  ;;  %v726_v14 = vpop.permute.xlu0 %725 }
 0x34e   :  { %v720_v19 = vpop.permute.xlu0 %719 }
 0x350   :  { %v3642_v4 = vpop.eup %3641 }
 0x351   :  { %v469_v9 = vmul.f32 %v3642_v4, %v3634_v50 }
 0x352   :  { %v1013_v22 = vpop.permute.xlu0 %1012 }
 0x356   :  { %v1007_v24 = vpop.permute.xlu0 %1006 }
 0x36b   :  { %v462_v1 = vpop.xlane.xlu1 %461 }
 0x36c   :  { %3643 = vrcp.f32 %v462_v1 }
 0x36f   :  { %v471_v3 = vpop.permute.xlu1 %470 }
 0x370   :  { %3418 = vmatprep.subr.mxu0 %v471_v3 }
 0x371   :  { %3419 = vmatpush3.msra.mxu0 %v471_v3 }
 0x372   :  { %3423 = vmatprep.subr.mxu0 %v57_v11 }
 0x373   :  { %v724_v20 = vpop.permute.xlu1 %723 }
 0x377   :  { %v722_v23 = vpop.permute.xlu1 %721 }
 0x379   :  { %v3644_v6 = vpop.eup %3643 }
 0x37a   :  { %v468_v7 = vmul.f32 %v3644_v6, %v3636_v54  ;;  %v58_v6 = vld [vmem:[%s4279_s4 + $0x10] sm:$0xff] }
 0x37b   :  { %v1011_v25 = vpop.permute.xlu1 %1010 }
 0x37c   :  { %3420 = vmatprep.mubr.msk.f32.mxu0 %vm243_vm2, %v468_v7 }
 0x37d   :  { %3421 = vmatmul.mubr.msk.f32.vlgmr.msra.gmra.mxu0 %vm243_vm2, %v469_v9 }
 0x37e   :  { %3424 = vmatpush3.msra.mxu0 %v57_v11 }
 0x37f   :  { %3428 = vmatprep.subr.mxu0 %v56_v12  ;;  %v1009_v26 = vpop.permute.xlu1 %1008 }
 0x409   :  { %v3408_v13 = vpop.f32.mrf.mxu0 }
 0x40b   :  { %v344_v15 = vpop.f32.mrf.mxu0 }
 0x43d   :  { %v3422_v16 = vpop.f32.mrf.mxu0 }
 0x43f   :  { %v548_v17 = vpop.f32.mrf.mxu0 }
 0x440   :  { %3425 = vmatprep.mubr.msk.f32.mxu0 %vm155_vm1, %v548_v17 }
 0x441   :  { %3426 = vmatmul.mubr.msk.f32.vlgmr.msra.gmra.mxu0 %vm155_vm1, %v3422_v16 }
 0x442   :  { %3429 = vmatpush3.msra.mxu0 %v56_v12  ;;  %3430 = vmatprep.mubr.msk.f32.mxu0 %vm155_vm1, %v344_v15 }
 0x443   :  { %3433 = vmatprep.subr.msk.mxu0 %vm155_vm1, %v726_v14 }
 0x445   :  { %3431 = vmatmul.mubr.msk.f32.vlgmr.msra.gmra.mxu0 %vm155_vm1, %v3408_v13 }
 0x446   :  { %3434 = vmatpush3.xpose.msk.msra.mxu0 %vm155_vm1, %v726_v14  ;;  %3437 = vmatprep.mubr.msk.f32.mxu0 %vm155_vm1, %v720_v19 }
 0x447   :  { %3435 = vmatprep.subr.msk.mxu0 %vm155_vm1, %v724_v20 }
 0x44a   :  { %3436 = vmatpush3.xpose.msk.msra.mxu0 %vm155_vm1, %v724_v20 }
 0x44b   :  { %3452 = vmatprep.subr.msk.mxu0 %vm155_vm1, %v1013_v22 }
 0x44d   :  { %3438 = vmatmul.mubr.msk.f32.vlgmr.msra.gmra.mxu0 %vm155_vm1, %v722_v23 }
 0x44e   :  { %3453 = vmatpush3.xpose.msk.msra.mxu0 %vm155_vm1, %v1013_v22  ;;  %3456 = vmatprep.mubr.msk.f32.mxu0 %vm155_vm1, %v1007_v24 }
 0x44f   :  { %3454 = vmatprep.subr.msk.mxu0 %vm155_vm1, %v1011_v25 }
 0x452   :  { %3455 = vmatpush3.xpose.msk.msra.mxu0 %vm155_vm1, %v1011_v25 }
 0x455   :  { %3457 = vmatmul.mubr.msk.f32.vlgmr.msra.gmra.mxu0 %vm155_vm1, %v1009_v26 }
 0x501   :  { %v3427_v27 = vpop.f32.mrf.mxu0 }
 0x503   :  { %v629_v28 = vpop.f32.mrf.mxu0 }
 0x505   :  { %v3432_v29 = vpop.f32.mrf.mxu0 }
 0x506   :  { %v3928_v30 = vadd.f32 %v3432_v29, %v3427_v27 }
 0x507   :  { %v710_v31 = vpop.f32.mrf.mxu0 }
 0x508   :  { %v3930_v32 = vadd.f32 %v710_v31, %v629_v28 }
 0x50d   :  { %v3439_v33 = vpop.f32.mrf.mxu0 }
 0x50e   :  { %v811_v34 = vmul.f32 0.35355338, %v3439_v33 }
 0x50f   :  { %v801_v35 = vpop.f32.mrf.mxu0 }
 0x510   :  { %v810_v36 = vmul.f32 0.35355338, %v801_v35  ;;  %v813_v37 = vadd.f32 %v811_v34, %v3859_v18 }
 0x512   :  { %v817_v38 = vsel %vm243_vm2, %v813_v37, -inf  ;;  %v812_v39 = vadd.f32 %v810_v36, %v3864_v21 }
 0x513   :  { %818 = vmax.xlane.f32.xlu1 %v817_v38 }
 0x514   :  { %v814_v40 = vsel %vm243_vm2, %v812_v39, -inf }
 0x515   :  { %815 = vmax.xlane.f32.xlu0 %v814_v40  ;;  %v3458_v41 = vpop.f32.mrf.mxu0 }
 0x516   :  { %v1098_v60 = vmul.f32 0.35355338, %v3458_v41 }
 0x517   :  { %v1088_v42 = vpop.f32.mrf.mxu0 }
 0x518   :  { %v1097_v43 = vmul.f32 0.35355338, %v1088_v42  ;;  %v1100_v63 = vadd.f32 %v1098_v60, %v3859_v18  ;;  %v1358_v60 = vld [vmem:[%s4282_s10 + $0x28] sm:$0xff] }
 0x51a   :  { %v1099_v44 = vadd.f32 %v1097_v43, %v3864_v21  ;;  %v1104_v0 = vsel %vm243_vm2, %v1100_v63, -inf }
 0x51c   :  { %v1101_v45 = vsel %vm243_vm2, %v1099_v44, -inf }
 0x524   :  { %838 = vrot.lane.b32.xlu1 %v3826_v8, %s4292_s29 }
 0x548   :  { %1102 = vmax.xlane.f32.xlu1 %v1101_v45 }
 0x59c   :  { %v819_v46 = vpop.xlane.xlu1 %818 }
 0x59d   :  { %v821_v47 = vsub.f32 %v813_v37, %v819_v46  ;;  %v3167_v37 = vld [vmem:[%s4280_s5] ss:$0 sm:$0xff] }
 0x59e   :  { %v816_v48 = vpop.xlane.xlu0 %815 }
 0x59f   :  { %v824_v49 = vmul.f32 1.442695, %v821_v47  ;;  %v820_v50 = vsub.f32 %v812_v39, %v816_v48 }
 0x5a0   :  { %v839_v51 = vpop.permute.xlu1 %838 }
 0x5a1   :  { %3645 = vpow2.f32 %v824_v49  ;;  %v822_v52 = vmul.f32 1.442695, %v820_v50  ;;  %3440 = vmatprep.subr.mxu1 %v839_v51 }
 0x5a2   :  { %3441 = vmatpush3.msra.mxu1 %v839_v51 }
 0x5a3   :  { %3647 = vpow2.f32 %v822_v52 }
 0x5ae   :  { %v3646_v53 = vpop.eup %3645 }
 0x5af   :  { %v829_v54 = vsel %vm243_vm2, %v3646_v53, 0.0 }
 0x5b0   :  { %v3648_v55 = vpop.eup %3647  ;;  %830 = vadd.xlane.f32.xlu0 %v829_v54 }
 0x5b1   :  { %v826_v56 = vsel %vm243_vm2, %v3648_v55, 0.0 }
 0x5b4   :  { %827 = vadd.xlane.f32.xlu0 %v826_v56  ;;  %v1349_v56 = vld [vmem:[%s4281_s8 + $0x8] sm:$0xff] }
 0x5ca   :  { %836 = vrot.lane.b32.xlu0 %v3828_v10, %s4292_s29 }
 0x5d1   :  { %v1103_v57 = vpop.xlane.xlu1 %1102 }
 0x5d2   :  { %v1107_v58 = vsub.f32 %v1099_v44, %v1103_v57  ;;  %v1348_v57 = vld [vmem:[%s4281_s8] sm:$0xff] }
 0x5d4   :  { %v1109_v59 = vmul.f32 1.442695, %v1107_v58  ;;  %v1360_v58 = vld [vmem:[%s4282_s10 + $0x38] sm:$0xff] }
 0x5d6   :  { %3649 = vpow2.f32 %v1109_v59  ;;  %v1359_v59 = vld [vmem:[%s4282_s10 + $0x30] sm:$0xff] }
 0x5e3   :  { %v3650_v61 = vpop.eup %3649 }
 0x5e4   :  { %v1113_v62 = vsel %vm243_vm2, %v3650_v61, 0.0 }
 0x5e5   :  { %1114 = vadd.xlane.f32.xlu1 %v1113_v62 }
 0x5e9   :  { %1105 = vmax.xlane.f32.xlu0 %v1104_v0 }
 0x5f6   :  { %1125 = vrot.lane.b32.xlu1 %v3826_v8, %s4290_s30 }
 0x639   :  { %v831_v1 = vpop.xlane.xlu0 %830 }
 0x63a   :  { %3651 = vrcp.f32 %v831_v1 }
 0x63d   :  { %v828_v3 = vpop.xlane.xlu0 %827 }
 0x63e   :  { %3653 = vrcp.f32 %v828_v3 }
 0x641   :  { %v837_v4 = vpop.permute.xlu0 %836 }
 0x642   :  { %3442 = vmatprep.subr.mxu1 %v837_v4 }
 0x643   :  { %3443 = vmatpush3.msra.mxu1 %v837_v4 }
 0x644   :  { %3447 = vmatprep.subr.mxu1 %v58_v6 }
 0x647   :  { %v3652_v7 = vpop.eup %3651 }
 0x648   :  { %v835_v12 = vmul.f32 %v3652_v7, %v3646_v53  ;;  %v3168_v7 = vld [vmem:[%s4283_s6] ss:$0 sm:$0xff] }
 0x64b   :  { %v3654_v9 = vpop.eup %3653 }
 0x64c   :  { %v834_v11 = vmul.f32 %v3654_v9, %v3648_v55  ;;  %v1350_v55 = vld [vmem:[%s4281_s8 + $0x10] sm:$0xff] }
 0x64e   :  { %3444 = vmatprep.mubr.msk.f32.mxu1 %vm243_vm2, %v834_v11 }
 0x64f   :  { %3445 = vmatmul.mubr.msk.f32.vlgmr.msra.gmra.mxu1 %vm243_vm2, %v835_v12 }
 0x650   :  { %3448 = vmatpush3.msra.mxu1 %v58_v6 }
 0x66e   :  { %v1115_v8 = vpop.xlane.xlu1 %1114 }
 0x672   :  { %v1126_v13 = vpop.permute.xlu1 %1125  ;;  %v1106_v14 = vpop.xlane.xlu0 %1105 }
 0x673   :  { %v1108_v15 = vsub.f32 %v1100_v63, %v1106_v14  ;;  %3459 = vmatprep.subr.mxu1 %v1126_v13 }
 0x675   :  { %v1111_v16 = vmul.f32 1.442695, %v1108_v15 }
 0x677   :  { %3655 = vpow2.f32 %v1111_v16 }
 0x678   :  { %3657 = vrcp.f32 %v1115_v8 }
 0x684   :  { %v3656_v17 = vpop.eup %3655 }
 0x685   :  { %v1116_v19 = vsel %vm243_vm2, %v3656_v17, 0.0  ;;  %v3658_v20 = vpop.eup %3657 }
 0x686   :  { %1117 = vadd.xlane.f32.xlu0 %v1116_v19  ;;  %v1121_v25 = vmul.f32 %v3658_v20, %v3650_v61  ;;  %v1357_v61 = vld [vmem:[%s4282_s10 + $0x20] sm:$0xff]  ;;  %v1355_v19 = vld [vmem:[%s4282_s10 + $0x10] sm:$0xff]  ;;  %v1354_v20 = vld [vmem:[%s4282_s10 + $0x8] sm:$0xff] }
 0x69c   :  { %1123 = vrot.lane.b32.xlu0 %v3828_v10, %s4290_s30  ;;  %v59_v10 = vld [vmem:[%s4279_s4 + $0x18] sm:$0xff] }
 0x70f   :  { %v3446_v22 = vpop.f32.mrf.mxu1  ;;  %v1118_v23 = vpop.xlane.xlu0 %1117 }
 0x710   :  { %3659 = vrcp.f32 %v1118_v23  ;;  %v3170_v23 = vld [vmem:[%s4285_s9] ss:$0 sm:$0xff] }
 0x711   :  { %v914_v24 = vpop.f32.mrf.mxu1 }
 0x712   :  { %3449 = vmatprep.mubr.msk.f32.mxu1 %vm155_vm1, %v914_v24 }
 0x713   :  { %3450 = vmatmul.mubr.msk.f32.vlgmr.msra.gmra.mxu1 %vm155_vm1, %v3446_v22  ;;  %v1124_v26 = vpop.permute.xlu0 %1123  ;;  %v1353_v22 = vld [vmem:[%s4282_s10] sm:$0xff] }
 0x714   :  { %3460 = vmatpush3.msra.mxu1 %v1126_v13  ;;  %3463 = vmatprep.mubr.msk.f32.mxu1 %vm243_vm2, %v1121_v25  ;;  %v3169_v13 = vld [vmem:[%s4284_s7] ss:$0 sm:$0xff] }
 0x715   :  { %3461 = vmatprep.subr.mxu1 %v1124_v26 }
 0x716   :  { %3462 = vmatpush3.msra.mxu1 %v1124_v26 }
 0x717   :  { %3466 = vmatprep.subr.mxu1 %v59_v10 }
 0x71d   :  { %v3660_v27 = vpop.eup %3659 }
 0x71e   :  { %v1122_v28 = vmul.f32 %v3660_v27, %v3656_v17  ;;  %v1356_v17 = vld [vmem:[%s4282_s10 + $0x18] sm:$0xff] }
 0x720   :  { %3464 = vmatmul.mubr.msk.f32.vlgmr.msra.gmra.mxu1 %vm243_vm2, %v1122_v28 }
 0x721   :  { %3467 = vmatpush3.msra.mxu1 %v59_v10 }
 0x722   :  { %3482 = vmatprep.subr.mxu1 %v1360_v58 }
 0x7d3   :  { %v3451_v29 = vpop.f32.mrf.mxu1 }
 0x7d4   :  { %v1005_v31 = vadd.f32 %v3451_v29, %v3928_v30  ;;  %v3173_v29 = vld [vmem:[%s4286_s11] ss:$0 sm:$0xff] }
 0x7d5   :  { %v995_v33 = vpop.f32.mrf.mxu1 }
 0x7d6   :  { %v1004_v34 = vadd.f32 %v995_v33, %v3930_v32 }
 0x7e0   :  { %v3465_v35 = vpop.f32.mrf.mxu1 }
 0x7e2   :  { %v1201_v36 = vpop.f32.mrf.mxu1 }
 0x7e3   :  { %3468 = vmatprep.mubr.msk.f32.mxu1 %vm155_vm1, %v1201_v36 }
 0x7e4   :  { %3469 = vmatmul.mubr.msk.f32.vlgmr.msra.gmra.mxu1 %vm155_vm1, %v3465_v35 }
 0x7e5   :  { %3483 = vmatpush3.msra.mxu1 %v1360_v58 }
 0x7e6   :  { %3484 = vmatprep.subr.mxu1 %v1359_v59 }
 0x7e7   :  { %3485 = vmatpush3.msra.mxu1 %v1359_v59 }
 0x7e8   :  { %3486 = vmatprep.subr.mxu1 %v1358_v60 }
 0x7e9   :  { %3487 = vmatpush3.msra.mxu1 %v1358_v60 }
 0x7ea   :  { %3488 = vmatprep.subr.mxu1 %v1357_v61 }
 0x7eb   :  { %3489 = vmatpush3.msra.mxu1 %v1357_v61 }
 0x7ec   :  { %3490 = vmatprep.subr.mxu1 %v1356_v17 }
 0x7ed   :  { %3491 = vmatpush3.msra.mxu1 %v1356_v17 }
 0x7ee   :  { %3492 = vmatprep.subr.mxu1 %v1355_v19 }
 0x7ef   :  { %3493 = vmatpush3.msra.mxu1 %v1355_v19 }
 0x7f0   :  { %3494 = vmatprep.subr.mxu1 %v1354_v20 }
 0x7f1   :  { %3495 = vmatpush3.msra.mxu1 %v1354_v20 }
 0x7f2   :  { %3496 = vmatprep.subr.mxu1 %v1353_v22 }
 0x7f3   :  { %3497 = vmatpush3.msra.mxu1 %v1353_v22 }
 0x8a4   :  { %v3470_v38 = vpop.f32.mrf.mxu1 }
 0x8a5   :  { %v1292_v39 = vadd.f32 %v3470_v38, %v1005_v31 }
 0x8a6   :  { %v1282_v40 = vpop.f32.mrf.mxu1 }
 0x8a7   :  { %v1300_v41 = vadd.f32 %v3167_v37, %v1292_v39  ;;  %v1291_v42 = vadd.f32 %v1282_v40, %v1004_v34 }
 0x8a9   :  { %v1299_v43 = vadd.f32 %v3167_v37, %v1291_v42  ;;  %v1302_v30 = vadd.f32 %v1300_v41, %v3819_v5 }
 0x8ab   :  { %v1308_v32 = vsel %vm67_vm0, %v1302_v30, 0.0  ;;  %v1301_v44 = vadd.f32 %v1299_v43, %v3806_v2  ;;  %v1351_v2 = vld [vmem:[%s4281_s8 + $0x18] sm:$0xff] }
 0x8ac   :  { %1309 = vadd.xlane.f32.xlu0 %v1308_v32  ;;  %3471 = vmatprep.subr.mxu0 %v1351_v2 }
 0x8ad   :  { %v1305_v45 = vsel %vm67_vm0, %v1301_v44, 0.0  ;;  %3472 = vmatpush3.msra.mxu0 %v1351_v2 }
 0x8ae   :  { %1306 = vadd.xlane.f32.xlu1 %v1305_v45  ;;  %3473 = vmatprep.subr.mxu0 %v1350_v55 }
 0x8af   :  { %3474 = vmatpush3.msra.mxu0 %v1350_v55 }
 0x8b0   :  { %3475 = vmatprep.subr.mxu0 %v1349_v56 }
 0x8b1   :  { %3476 = vmatpush3.msra.mxu0 %v1349_v56 }
 0x8b2   :  { %3477 = vmatprep.subr.mxu0 %v1348_v57 }
 0x8b3   :  { %3478 = vmatpush3.msra.mxu0 %v1348_v57  ;;  %v3176_v57 = vld [vmem:[%s4287_s12] ss:$0 sm:$0xff] }
 0x935   :  { %v1310_v46 = vpop.xlane.xlu0 %1309 }
 0x936   :  { %v1313_v47 = vmul.f32 0.03125, %v1310_v46 }
 0x937   :  { %v1307_v48 = vpop.xlane.xlu1 %1306 }
 0x938   :  { %v1315_v49 = vsub.f32 %v1302_v30, %v1313_v47  ;;  %v1312_v50 = vmul.f32 0.03125, %v1307_v48  ;;  %v3181_v48 = vld [vmem:[%s4275_s2 + $0x38] sm:$0xff] }
 0x939   :  { %3501 = vmatprep.subr.mxu0 %v3181_v48 }
 0x93a   :  { %v1314_v51 = vsub.f32 %v1301_v44, %v1312_v50  ;;  %v1317_v52 = vmul.f32 %v1315_v49, %v1315_v49  ;;  %v3179_v50 = vld [vmem:[%s4275_s2 + $0x28] sm:$0xff] }
 0x93c   :  { %v1321_v53 = vsel %vm67_vm0, %v1317_v52, 0.0  ;;  %v1316_v54 = vmul.f32 %v1314_v51, %v1314_v51 }
 0x93d   :  { %1322 = vadd.xlane.f32.xlu0 %v1321_v53 }
 0x93e   :  { %v1318_v5 = vsel %vm67_vm0, %v1316_v54, 0.0 }
 0x93f   :  { %1319 = vadd.xlane.f32.xlu1 %v1318_v5 }
 0x9c6   :  { %v1323_v62 = vpop.xlane.xlu0 %1322 }
 0x9c7   :  { %v1325_v63 = vmul.f32 0.03125, %v1323_v62  ;;  %v3177_v62 = vld [vmem:[%s4288_s13] ss:$0 sm:$0xff] }
 0x9c8   :  { %v1320_v0 = vpop.xlane.xlu1 %1319 }
 0x9c9   :  { %v1327_v1 = vadd.f32 1e-05, %v1325_v63  ;;  %v1324_v3 = vmul.f32 0.03125, %v1320_v0 }
 0x9cb   :  { %3661 = vrsqrt.f32 %v1327_v1  ;;  %v1326_v4 = vadd.f32 1e-05, %v1324_v3  ;;  %v3188_v3 = vld [vmem:[%s4277_s3 + $0x1] ss:$0 sm:$0xff] }
 0x9cd   :  { %3663 = vrsqrt.f32 %v1326_v4 }
 0x9d8   :  { %v3662_v6 = vpop.eup %3661 }
 0x9d9   :  { %v1331_v9 = vmul.f32 %v3662_v6, %v1315_v49  ;;  %v3180_v49 = vld [vmem:[%s4275_s2 + $0x30] sm:$0xff] }
 0x9da   :  { %v3664_v11 = vpop.eup %3663 }
 0x9db   :  { %v1330_v12 = vmul.f32 %v3664_v11, %v1314_v51  ;;  %v1339_v8 = vmul.f32 %v3168_v7, %v1331_v9  ;;  %v3178_v51 = vld [vmem:[%s4275_s2 + $0x20] sm:$0xff] }
 0x9dd   :  { %v1338_v14 = vmul.f32 %v3168_v7, %v1330_v12  ;;  %v1347_v16 = vadd.f32 %v3169_v13, %v1339_v8 }
 0x9df   :  { %v1346_v15 = vadd.f32 %v3169_v13, %v1338_v14 }
 0x9e1   :  { %3479 = vmatprep.mubr.msk.f32.mxu0 %vm67_vm0, %v1346_v15 }
 0x9e2   :  { %3480 = vmatmul.mubr.msk.f32.vlgmr.msra.gmra.mxu0 %vm67_vm0, %v1347_v16 }
 0x9e3   :  { %3502 = vmatpush3.msra.mxu0 %v3181_v48 }
 0x9e4   :  { %3503 = vmatprep.subr.mxu0 %v3180_v49 }
 0x9e5   :  { %3504 = vmatpush3.msra.mxu0 %v3180_v49 }
 0x9e6   :  { %3505 = vmatprep.subr.mxu0 %v3179_v50 }
 0x9e7   :  { %3506 = vmatpush3.msra.mxu0 %v3179_v50 }
 0x9e8   :  { %3507 = vmatprep.subr.mxu0 %v3178_v51 }
 0x9e9   :  { %3508 = vmatpush3.msra.mxu0 %v3178_v51 }
 0xaa2   :  { %v3481_v24 = vpop.f32.mrf.mxu0 }
 0xaa3   :  { %v1446_v25 = vadd.f32 %v3481_v24, %v3170_v23 }
 0xaa4   :  { %v1440_v26 = vpop.f32.mrf.mxu0 }
 0xaa5   :  { %v1441_v27 = vadd.f32 %v3170_v23, %v1440_v26  ;;  %v1450_v10 = vmax.f32 %v1446_v25, 0.0 }
 0xaa7   :  { %v1449_v28 = vmax.f32 %v1441_v27, 0.0 }
 0xaa9   :  { %3498 = vmatprep.mubr.msk.f32.mxu1 %vm1457_vm3, %v1449_v28 }
 0xaaa   :  { %3499 = vmatmul.mubr.msk.f32.vlgmr.msra.gmra.mxu1 %vm1457_vm3, %v1450_v10 }
 0xb6a   :  { %v3500_v31 = vpop.f32.mrf.mxu1 }
 0xb6b   :  { %v1536_v33 = vadd.f32 %v3500_v31, %v3173_v29 }
 0xb6c   :  { %v1530_v34 = vpop.f32.mrf.mxu1 }
 0xb6d   :  { %v1531_v35 = vadd.f32 %v3173_v29, %v1530_v34  ;;  %v1540_v36 = vadd.f32 %v1536_v33, %v1347_v16 }
 0xb6f   :  { %v1546_v37 = vsel %vm67_vm0, %v1540_v36, 0.0  ;;  %v1539_v38 = vadd.f32 %v1531_v35, %v1346_v15 }
 0xb70   :  { %1547 = vadd.xlane.f32.xlu0 %v1546_v37 }
 0xb71   :  { %v1543_v39 = vsel %vm67_vm0, %v1539_v38, 0.0 }
 0xb72   :  { %1544 = vadd.xlane.f32.xlu1 %v1543_v39 }
 0xbf9   :  { %v1548_v40 = vpop.xlane.xlu0 %1547 }
 0xbfa   :  { %v1550_v41 = vmul.f32 0.03125, %v1548_v40 }
 0xbfb   :  { %v1545_v42 = vpop.xlane.xlu1 %1544 }
 0xbfc   :  { %v1552_v43 = vsub.f32 %v1540_v36, %v1550_v41  ;;  %v1549_v30 = vmul.f32 0.03125, %v1545_v42 }
 0xbfe   :  { %v1551_v32 = vsub.f32 %v1539_v38, %v1549_v30  ;;  %v1554_v44 = vmul.f32 %v1552_v43, %v1552_v43 }
 0xc00   :  { %v1558_v45 = vsel %vm67_vm0, %v1554_v44, 0.0  ;;  %v1553_v46 = vmul.f32 %v1551_v32, %v1551_v32 }
 0xc01   :  { %1559 = vadd.xlane.f32.xlu0 %v1558_v45 }
 0xc02   :  { %v1555_v47 = vsel %vm67_vm0, %v1553_v46, 0.0 }
 0xc03   :  { %1556 = vadd.xlane.f32.xlu1 %v1555_v47 }
 0xc8a   :  { %v1560_v52 = vpop.xlane.xlu0 %1559 }
 0xc8b   :  { %v1562_v53 = vmul.f32 0.03125, %v1560_v52 }
 0xc8c   :  { %v1557_v54 = vpop.xlane.xlu1 %1556 }
 0xc8d   :  { %v1564_v5 = vadd.f32 1e-05, %v1562_v53  ;;  %v1561_v2 = vmul.f32 0.03125, %v1557_v54 }
 0xc8f   :  { %3665 = vrsqrt.f32 %v1564_v5  ;;  %v1563_v55 = vadd.f32 1e-05, %v1561_v2 }
 0xc91   :  { %3667 = vrsqrt.f32 %v1563_v55 }
 0xc9c   :  { %v3666_v56 = vpop.eup %3665 }
 0xc9d   :  { %v1568_v58 = vmul.f32 %v3666_v56, %v1552_v43 }
 0xc9e   :  { %v3668_v59 = vpop.eup %3667 }
 0xc9f   :  { %v1567_v60 = vmul.f32 %v3668_v59, %v1551_v32  ;;  %v1576_v61 = vmul.f32 %v3176_v57, %v1568_v58  ;;  %v3183_v32 = vld [vmem:[%s4279_s4 + $0x20] sm:$0xff] }
 0xca1   :  { %v1575_v63 = vmul.f32 %v3176_v57, %v1567_v60  ;;  %v4053_v1 = vadd.f32 %v3177_v62, %v1576_v61 }
 0xca3   :  { %v4051_v0 = vadd.f32 %v3177_v62, %v1575_v63 }
 0xca5   :  { %3509 = vmatprep.mubr.msk.f32.mxu0 %vm67_vm0, %v4051_v0 }
 0xca6   :  { %3510 = vmatmul.mubr.msk.f32.vlgmr.msra.gmra.mxu0 %vm67_vm0, %v4053_v1 }
 0xd66   :  { %v3511_v4 = vpop.f32.mrf.mxu0 }
 0xd67   :  { %v4062_v6 = vadd.f32 %v3511_v4, %v3188_v3 }
 0xd68   :  { %v1677_v7 = vpop.f32.mrf.mxu0 }
 0xd69   :  { %v4064_v9 = vadd.f32 %v3188_v3, %v1677_v7  ;;  %1690 = vrot.lane.b32.xlu1 %v4062_v6, %s3712_s0  ;;  %v3184_v3 = vld [vmem:[%s4279_s4 + $0x28] sm:$0xff] }
 0xd6b   :  { %1688 = vrot.lane.b32.xlu0 %v4064_v9, %s3712_s0  ;;  %3516 = vmatprep.mubr.msk.f32.mxu0 %vm155_vm1, %v4064_v9 }
 0xddb   :  { %v1691_v11 = vpop.permute.xlu1 %1690 }
 0xddc   :  { %3512 = vmatprep.subr.msk.mxu0 %vm155_vm1, %v1691_v11 }
 0xddd   :  { %3513 = vmatpush3.xpose.msk.msra.mxu0 %vm155_vm1, %v1691_v11  ;;  %v1689_v12 = vpop.permute.xlu0 %1688 }
 0xdde   :  { %3514 = vmatprep.subr.msk.mxu0 %vm155_vm1, %v1689_v12 }
 0xde1   :  { %3515 = vmatpush3.xpose.msk.msra.mxu0 %vm155_vm1, %v1689_v12 }
 0xde4   :  { %3517 = vmatmul.mubr.msk.f32.vlgmr.msra.gmra.mxu0 %vm155_vm1, %v4062_v6 }
 0xea4   :  { %v3518_v8 = vpop.f32.mrf.mxu0 }
 0xea5   :  { %v1776_v13 = vmul.f32 0.35355338, %v3518_v8 }
 0xea6   :  { %v1766_v14 = vpop.f32.mrf.mxu0 }
 0xea7   :  { %v1775_v15 = vmul.f32 0.35355338, %v1766_v14  ;;  %v1778_v16 = vadd.f32 %v1776_v13, %v3859_v18 }
 0xea9   :  { %v1782_v17 = vsel %vm243_vm2, %v1778_v16, -inf  ;;  %v1777_v19 = vadd.f32 %v1775_v15, %v3864_v21 }
 0xeaa   :  { %1783 = vmax.xlane.f32.xlu0 %v1782_v17 }
 0xeab   :  { %v1779_v20 = vsel %vm243_vm2, %v1777_v19, -inf }
 0xeac   :  { %1780 = vmax.xlane.f32.xlu1 %v1779_v20 }
 0xebd   :  { %1803 = vrot.lane.b32.xlu1 %v4062_v6, %s3714_s17 }
 0xec1   :  { %1894 = vrot.lane.b32.xlu1 %v4062_v6, %s3711_s27 }
 0xec5   :  { %1892 = vrot.lane.b32.xlu1 %v4064_v9, %s3711_s27 }
 0xf33   :  { %v1784_v22 = vpop.xlane.xlu0 %1783 }
 0xf34   :  { %v1786_v23 = vsub.f32 %v1778_v16, %v1784_v22 }
 0xf35   :  { %v1781_v24 = vpop.xlane.xlu1 %1780 }
 0xf36   :  { %v1789_v25 = vmul.f32 1.442695, %v1786_v23  ;;  %v1785_v26 = vsub.f32 %v1777_v19, %v1781_v24 }
 0xf38   :  { %3669 = vpow2.f32 %v1789_v25  ;;  %v1787_v27 = vmul.f32 1.442695, %v1785_v26 }
 0xf39   :  { %v1804_v28 = vpop.permute.xlu1 %1803 }
 0xf3a   :  { %3671 = vpow2.f32 %v1787_v27  ;;  %3519 = vmatprep.subr.mxu1 %v1804_v28 }
 0xf3b   :  { %3520 = vmatpush3.msra.mxu1 %v1804_v28 }
 0xf3d   :  { %v1895_v34 = vpop.permute.xlu1 %1894 }
 0xf41   :  { %v1893_v35 = vpop.permute.xlu1 %1892 }
 0xf45   :  { %v3670_v10 = vpop.eup %3669 }
 0xf46   :  { %v1794_v29 = vsel %vm243_vm2, %v3670_v10, 0.0 }
 0xf47   :  { %v3672_v31 = vpop.eup %3671  ;;  %1795 = vadd.xlane.f32.xlu0 %v1794_v29  ;;  %v3709_v29 = vld [vmem:[%s4278_s1 + $0x8] sm:$0xff] }
 0xf48   :  { %v1791_v33 = vsel %vm243_vm2, %v3672_v31, 0.0 }
 0xf49   :  { %1792 = vadd.xlane.f32.xlu1 %v1791_v33 }
 0xf5a   :  { %1890 = vrot.lane.b32.xlu1 %v4062_v6, %s3713_s28 }
 0xf5d   :  { %1801 = vrot.lane.b32.xlu0 %v4064_v9, %s3714_s17 }
 0xf61   :  { %1888 = vrot.lane.b32.xlu0 %v4064_v9, %s3713_s28 }
 0xfd0   :  { %v1796_v36 = vpop.xlane.xlu0 %1795 }
 0xfd1   :  { %3673 = vrcp.f32 %v1796_v36 }
 0xfd2   :  { %v1793_v37 = vpop.xlane.xlu1 %1792 }
 0xfd3   :  { %3675 = vrcp.f32 %v1793_v37 }
 0xfd4   :  { %v1802_v38 = vpop.permute.xlu0 %1801 }
 0xfd5   :  { %3521 = vmatprep.subr.mxu1 %v1802_v38 }
 0xfd6   :  { %3522 = vmatpush3.msra.mxu1 %v1802_v38  ;;  %v1891_v30 = vpop.permute.xlu1 %1890 }
 0xfd7   :  { %3526 = vmatprep.subr.msk.mxu1 %vm155_vm1, %v1895_v34 }
 0xfd8   :  { %v1889_v43 = vpop.permute.xlu0 %1888 }
 0xfde   :  { %v3674_v39 = vpop.eup %3673 }
 0xfdf   :  { %v1800_v42 = vmul.f32 %v3674_v39, %v3670_v10 }
 0xfe0   :  { %v3676_v40 = vpop.eup %3675 }
 0xfe1   :  { %v1799_v41 = vmul.f32 %v3676_v40, %v3672_v31 }
 0xfe3   :  { %3523 = vmatprep.mubr.msk.f32.mxu1 %vm243_vm2, %v1799_v41 }
 0xfe4   :  { %3524 = vmatmul.mubr.msk.f32.vlgmr.msra.gmra.mxu1 %vm243_vm2, %v1800_v42 }
 0xfe5   :  { %3527 = vmatpush3.xpose.msk.msra.mxu1 %vm155_vm1, %v1895_v34  ;;  %3530 = vmatprep.mubr.msk.f32.mxu1 %vm155_vm1, %v1889_v43  ;;  %v3710_v34 = vld [vmem:[%s4278_s1] sm:$0xff]  ;;  %s4295_s1 = smov 40  }
 0xfe6   :  { %3528 = vmatprep.subr.msk.mxu1 %vm155_vm1, %v1893_v35 }
 0xfe9   :  { %3529 = vmatpush3.xpose.msk.msra.mxu1 %vm155_vm1, %v1893_v35 }
 0xfea   :  { %3545 = vmatprep.subr.mxu1 %v3183_v32 }
 0xfec   :  { %3531 = vmatmul.mubr.msk.f32.vlgmr.msra.gmra.mxu1 %vm155_vm1, %v1891_v30 }
 0xfed   :  { %3546 = vmatpush3.msra.mxu1 %v3183_v32 }
0x10a4   :  { %v3525_v44 = vpop.f32.mrf.mxu1 }
0x10a6   :  { %v1879_v45 = vpop.f32.mrf.mxu1 }
0x10a7   :  { %3547 = vmatprep.mubr.msk.f32.mxu1 %vm155_vm1, %v1879_v45 }
0x10a8   :  { %3548 = vmatmul.mubr.msk.f32.vlgmr.msra.gmra.mxu1 %vm155_vm1, %v3525_v44 }
0x10ac   :  { %v3532_v46 = vpop.f32.mrf.mxu1 }
0x10ad   :  { %v1980_v47 = vmul.f32 0.35355338, %v3532_v46 }
0x10ae   :  { %v1970_v48 = vpop.f32.mrf.mxu1 }
0x10af   :  { %v1979_v49 = vmul.f32 0.35355338, %v1970_v48  ;;  %v1982_v50 = vadd.f32 %v1980_v47, %v3859_v18 }
0x10b1   :  { %v1986_v51 = vsel %vm243_vm2, %v1982_v50, -inf  ;;  %v1981_v52 = vadd.f32 %v1979_v49, %v3864_v21 }
0x10b2   :  { %1987 = vmax.xlane.f32.xlu1 %v1986_v51 }
0x10b3   :  { %v1983_v53 = vsel %vm243_vm2, %v1981_v52, -inf }
0x10b4   :  { %1984 = vmax.xlane.f32.xlu0 %v1983_v53 }
0x10c3   :  { %2007 = vrot.lane.b32.xlu1 %v4062_v6, %s3715_s18 }
0x10c7   :  { %2260 = vrot.lane.b32.xlu1 %v4062_v6, %s3716_s19 }
0x10cb   :  { %2258 = vrot.lane.b32.xlu1 %v4064_v9, %s3716_s19 }
0x10cf   :  { %2256 = vrot.lane.b32.xlu1 %v4062_v6, %s3717_s20 }
0x10d3   :  { %2545 = vrot.lane.b32.xlu1 %v4064_v9, %s3718_s21 }
0x10d7   :  { %2543 = vrot.lane.b32.xlu1 %v4062_v6, %s3719_s22 }
0x113b   :  { %v1988_v18 = vpop.xlane.xlu1 %1987 }
0x113c   :  { %v1990_v21 = vsub.f32 %v1982_v50, %v1988_v18 }
0x113d   :  { %v1985_v54 = vpop.xlane.xlu0 %1984 }
0x113e   :  { %v1993_v5 = vmul.f32 1.442695, %v1990_v21  ;;  %v1989_v2 = vsub.f32 %v1981_v52, %v1985_v54 }
0x113f   :  { %v2008_v55 = vpop.permute.xlu1 %2007 }
0x1140   :  { %3677 = vpow2.f32 %v1993_v5  ;;  %v1991_v56 = vmul.f32 1.442695, %v1989_v2  ;;  %3533 = vmatprep.subr.mxu0 %v2008_v55 }
0x1141   :  { %3534 = vmatpush3.msra.mxu0 %v2008_v55 }
0x1142   :  { %3679 = vpow2.f32 %v1991_v56 }
0x1143   :  { %v2261_v8 = vpop.permute.xlu1 %2260 }
0x1147   :  { %v2259_v15 = vpop.permute.xlu1 %2258 }
0x114b   :  { %v2257_v19 = vpop.permute.xlu1 %2256 }
0x114d   :  { %v3678_v57 = vpop.eup %3677 }
0x114e   :  { %v1998_v58 = vsel %vm243_vm2, %v3678_v57, 0.0 }
0x114f   :  { %v3680_v59 = vpop.eup %3679  ;;  %1999 = vadd.xlane.f32.xlu0 %v1998_v58  ;;  %v2546_v22 = vpop.permute.xlu1 %2545  ;;  %v3185_v58 = vld [vmem:[%s4279_s4 + $0x30] sm:$0xff] }
0x1150   :  { %v1995_v60 = vsel %vm243_vm2, %v3680_v59, 0.0 }
0x1153   :  { %1996 = vadd.xlane.f32.xlu0 %v1995_v60  ;;  %v2544_v23 = vpop.permute.xlu1 %2543 }
0x1169   :  { %2005 = vrot.lane.b32.xlu0 %v4064_v9, %s3715_s18 }
0x116d   :  { %2254 = vrot.lane.b32.xlu0 %v4064_v9, %s3717_s20 }
0x1171   :  { %2547 = vrot.lane.b32.xlu0 %v4062_v6, %s3718_s21  ;;  %s4294_s21 = smov 48  }
0x1175   :  { %2541 = vrot.lane.b32.xlu0 %v4064_v9, %s3719_s22 }
0x11d8   :  { %v2000_v61 = vpop.xlane.xlu0 %1999 }
0x11d9   :  { %3681 = vrcp.f32 %v2000_v61 }
0x11dc   :  { %v1997_v62 = vpop.xlane.xlu0 %1996 }
0x11dd   :  { %3683 = vrcp.f32 %v1997_v62 }
0x11e0   :  { %v2006_v63 = vpop.permute.xlu0 %2005 }
0x11e1   :  { %3535 = vmatprep.subr.mxu0 %v2006_v63 }
0x11e2   :  { %3536 = vmatpush3.msra.mxu0 %v2006_v63 }
0x11e3   :  { %3540 = vmatprep.subr.mxu0 %v3184_v3 }
0x11e4   :  { %v2255_v13 = vpop.permute.xlu0 %2254 }
0x11e6   :  { %v3682_v4 = vpop.eup %3681 }
0x11e7   :  { %v2004_v12 = vmul.f32 %v3682_v4, %v3678_v57 }
0x11e8   :  { %v2548_v17 = vpop.permute.xlu0 %2547 }
0x11ea   :  { %v3684_v7 = vpop.eup %3683 }
0x11eb   :  { %v2003_v11 = vmul.f32 %v3684_v7, %v3680_v59 }
0x11ec   :  { %v2542_v20 = vpop.permute.xlu0 %2541 }
0x11ed   :  { %3537 = vmatprep.mubr.msk.f32.mxu0 %vm243_vm2, %v2003_v11 }
0x11ee   :  { %3538 = vmatmul.mubr.msk.f32.vlgmr.msra.gmra.mxu0 %vm243_vm2, %v2004_v12 }
0x11ef   :  { %3541 = vmatpush3.msra.mxu0 %v3184_v3 }
0x11f0   :  { %3550 = vmatprep.subr.msk.mxu0 %vm155_vm1, %v2261_v8 }
0x12ae   :  { %v3539_v14 = vpop.f32.mrf.mxu0 }
0x12b0   :  { %v2083_v16 = vpop.f32.mrf.mxu0 }
0x12b1   :  { %3542 = vmatprep.mubr.msk.f32.mxu0 %vm155_vm1, %v2083_v16 }
0x12b2   :  { %3543 = vmatmul.mubr.msk.f32.vlgmr.msra.gmra.mxu0 %vm155_vm1, %v3539_v14 }
0x12b3   :  { %3551 = vmatpush3.xpose.msk.msra.mxu0 %vm155_vm1, %v2261_v8  ;;  %3554 = vmatprep.mubr.msk.f32.mxu0 %vm155_vm1, %v2255_v13  ;;  %v3549_v8 = vpop.f32.mrf.mxu1 }
0x12b4   :  { %3552 = vmatprep.subr.msk.mxu0 %vm155_vm1, %v2259_v15 }
0x12b5   :  { %v2245_v13 = vpop.f32.mrf.mxu1 }
0x12b7   :  { %3553 = vmatpush3.xpose.msk.msra.mxu0 %vm155_vm1, %v2259_v15 }
0x12b8   :  { %3569 = vmatprep.subr.msk.mxu0 %vm155_vm1, %v2548_v17 }
0x12ba   :  { %3555 = vmatmul.mubr.msk.f32.vlgmr.msra.gmra.mxu0 %vm155_vm1, %v2257_v19 }
0x12bb   :  { %3570 = vmatpush3.xpose.msk.msra.mxu0 %vm155_vm1, %v2548_v17  ;;  %3573 = vmatprep.mubr.msk.f32.mxu0 %vm155_vm1, %v2542_v20 }
0x12bc   :  { %3571 = vmatprep.subr.msk.mxu0 %vm155_vm1, %v2546_v22 }
0x12bf   :  { %3572 = vmatpush3.xpose.msk.msra.mxu0 %vm155_vm1, %v2546_v22 }
0x12c2   :  { %3574 = vmatmul.mubr.msk.f32.vlgmr.msra.gmra.mxu0 %vm155_vm1, %v2544_v23  ;;  %v3186_v23 = vld [vmem:[%s4279_s4 + $0x38] sm:$0xff] }
0x1372   :  { %v4154_v24 = vpop.f32.mrf.mxu0 }
0x1374   :  { %v4156_v25 = vpop.f32.mrf.mxu0 }
0x137a   :  { %v3556_v26 = vpop.f32.mrf.mxu0 }
0x137b   :  { %v2346_v27 = vmul.f32 0.35355338, %v3556_v26  ;;  %v2251_v26 = vadd.f32 %v3549_v8, %v4154_v24  ;;  %v3236_v8 = vld [vmem:[%s4282_s10 + $0x58] sm:$0xff] }
0x137c   :  { %v2336_v28 = vpop.f32.mrf.mxu0 }
0x137d   :  { %v2345_v10 = vmul.f32 0.35355338, %v2336_v28  ;;  %v2348_v31 = vadd.f32 %v3709_v29, %v2346_v27  ;;  %v2246_v28 = vadd.f32 %v2245_v13, %v4156_v25  ;;  %v3235_v13 = vld [vmem:[%s4282_s10 + $0x50] sm:$0xff] }
0x137f   :  { %v2352_v33 = vsel %vm243_vm2, %v2348_v31, -inf  ;;  %v2347_v35 = vadd.f32 %v3710_v34, %v2345_v10 }
0x1380   :  { %2353 = vmax.xlane.f32.xlu1 %v2352_v33 }
0x1381   :  { %v2349_v36 = vsel %vm243_vm2, %v2347_v35, -inf }
0x1382   :  { %2350 = vmax.xlane.f32.xlu0 %v2349_v36  ;;  %v3575_v37 = vpop.f32.mrf.mxu0 }
0x1383   :  { %v2633_v18 = vmul.f32 0.35355338, %v3575_v37 }
0x1384   :  { %v2623_v38 = vpop.f32.mrf.mxu0 }
0x1385   :  { %v2632_v39 = vmul.f32 0.35355338, %v2623_v38  ;;  %v2635_v5 = vadd.f32 %v3709_v29, %v2633_v18  ;;  %v3240_v18 = vld [vmem:[%s4282_s10 + $0x78] sm:$0xff] }
0x1387   :  { %v2634_v40 = vadd.f32 %v3710_v34, %v2632_v39  ;;  %v2639_v2 = vsel %vm243_vm2, %v2635_v5, -inf }
0x1389   :  { %v2636_v41 = vsel %vm243_vm2, %v2634_v40, -inf }
0x1391   :  { %2373 = vrot.lane.b32.xlu1 %v4062_v6, %s4294_s21 }
0x13b5   :  { %2637 = vmax.xlane.f32.xlu1 %v2636_v41 }
0x1409   :  { %v2354_v42 = vpop.xlane.xlu1 %2353 }
0x140a   :  { %v2356_v43 = vsub.f32 %v2348_v31, %v2354_v42 }
0x140b   :  { %v2351_v30 = vpop.xlane.xlu0 %2350 }
0x140c   :  { %v2359_v32 = vmul.f32 1.442695, %v2356_v43  ;;  %v2355_v44 = vsub.f32 %v2347_v35, %v2351_v30  ;;  %v3223_v35 = vld [vmem:[%s4280_s5 + $0x1] ss:$0 sm:$0xff] }
0x140d   :  { %v2374_v45 = vpop.permute.xlu1 %2373 }
0x140e   :  { %3685 = vpow2.f32 %v2359_v32  ;;  %v2357_v46 = vmul.f32 1.442695, %v2355_v44  ;;  %3557 = vmatprep.subr.mxu1 %v2374_v45 }
0x140f   :  { %3558 = vmatpush3.msra.mxu1 %v2374_v45 }
0x1410   :  { %3687 = vpow2.f32 %v2357_v46 }
0x141b   :  { %v3686_v47 = vpop.eup %3685 }
0x141c   :  { %v2364_v48 = vsel %vm243_vm2, %v3686_v47, 0.0 }
0x141d   :  { %v3688_v49 = vpop.eup %3687  ;;  %2365 = vadd.xlane.f32.xlu0 %v2364_v48 }
0x141e   :  { %v2361_v50 = vsel %vm243_vm2, %v3688_v49, 0.0 }
0x1421   :  { %2362 = vadd.xlane.f32.xlu0 %v2361_v50 }
0x1437   :  { %2371 = vrot.lane.b32.xlu0 %v4064_v9, %s4294_s21 }
0x143e   :  { %v2638_v51 = vpop.xlane.xlu1 %2637 }
0x143f   :  { %v2642_v52 = vsub.f32 %v2634_v40, %v2638_v51  ;;  %v3230_v51 = vld [vmem:[%s4281_s8 + $0x30] sm:$0xff] }
0x1441   :  { %v2644_v53 = vmul.f32 1.442695, %v2642_v52  ;;  %v3229_v52 = vld [vmem:[%s4281_s8 + $0x28] sm:$0xff] }
0x1443   :  { %3689 = vpow2.f32 %v2644_v53  ;;  %v3228_v53 = vld [vmem:[%s4281_s8 + $0x20] sm:$0xff] }
0x1450   :  { %v3690_v21 = vpop.eup %3689 }
0x1451   :  { %v2648_v54 = vsel %vm243_vm2, %v3690_v21, 0.0 }
0x1452   :  { %2649 = vadd.xlane.f32.xlu1 %v2648_v54  ;;  %v3238_v54 = vld [vmem:[%s4282_s10 + $0x68] sm:$0xff] }
0x1456   :  { %2640 = vmax.xlane.f32.xlu0 %v2639_v2 }
0x1463   :  { %2660 = vrot.lane.b32.xlu1 %v4062_v6, %s4295_s1 }
0x14a6   :  { %v2366_v55 = vpop.xlane.xlu0 %2365 }
0x14a7   :  { %3691 = vrcp.f32 %v2366_v55 }
0x14aa   :  { %v2363_v56 = vpop.xlane.xlu0 %2362 }
0x14ab   :  { %3693 = vrcp.f32 %v2363_v56 }
0x14ae   :  { %v2372_v57 = vpop.permute.xlu0 %2371 }
0x14af   :  { %3559 = vmatprep.subr.mxu1 %v2372_v57 }
0x14b0   :  { %3560 = vmatpush3.msra.mxu1 %v2372_v57 }
0x14b1   :  { %3564 = vmatprep.subr.mxu1 %v3185_v58 }
0x14b4   :  { %v3692_v59 = vpop.eup %3691 }
0x14b5   :  { %v2370_v62 = vmul.f32 %v3692_v59, %v3686_v47 }
0x14b8   :  { %v3694_v60 = vpop.eup %3693 }
0x14b9   :  { %v2369_v61 = vmul.f32 %v3694_v60, %v3688_v49 }
0x14bb   :  { %3561 = vmatprep.mubr.msk.f32.mxu1 %vm243_vm2, %v2369_v61  ;;  %v3226_v61 = vld [vmem:[%s4283_s6 + $0x1] ss:$0 sm:$0xff] }
0x14bc   :  { %3562 = vmatmul.mubr.msk.f32.vlgmr.msra.gmra.mxu1 %vm243_vm2, %v2370_v62 }
0x14bd   :  { %3565 = vmatpush3.msra.mxu1 %v3185_v58 }
0x14db   :  { %v2650_v6 = vpop.xlane.xlu1 %2649 }
0x14df   :  { %v2661_v63 = vpop.permute.xlu1 %2660  ;;  %v2641_v3 = vpop.xlane.xlu0 %2640 }
0x14e0   :  { %v2643_v4 = vsub.f32 %v2635_v5, %v2641_v3  ;;  %3576 = vmatprep.subr.mxu1 %v2661_v63  ;;  %v3237_v5 = vld [vmem:[%s4282_s10 + $0x60] sm:$0xff] }
0x14e2   :  { %v2646_v7 = vmul.f32 1.442695, %v2643_v4  ;;  %v3227_v4 = vld [vmem:[%s4284_s7 + $0x1] ss:$0 sm:$0xff] }
0x14e4   :  { %3695 = vpow2.f32 %v2646_v7 }
0x14e5   :  { %3697 = vrcp.f32 %v2650_v6 }
0x14f1   :  { %v3696_v11 = vpop.eup %3695 }
0x14f2   :  { %v2651_v12 = vsel %vm243_vm2, %v3696_v11, 0.0  ;;  %v3698_v14 = vpop.eup %3697 }
0x14f3   :  { %2652 = vadd.xlane.f32.xlu0 %v2651_v12  ;;  %v2656_v19 = vmul.f32 %v3698_v14, %v3690_v21  ;;  %v3239_v21 = vld [vmem:[%s4282_s10 + $0x70] sm:$0xff]  ;;  %v3234_v14 = vld [vmem:[%s4282_s10 + $0x48] sm:$0xff] }
0x1509   :  { %2658 = vrot.lane.b32.xlu0 %v4064_v9, %s4295_s1 }
0x157c   :  { %v3563_v15 = vpop.f32.mrf.mxu1  ;;  %v2653_v16 = vpop.xlane.xlu0 %2652 }
0x157d   :  { %3699 = vrcp.f32 %v2653_v16  ;;  %v3242_v16 = vld [vmem:[%s4285_s9 + $0x1] ss:$0 sm:$0xff] }
0x157e   :  { %v2449_v17 = vpop.f32.mrf.mxu1 }
0x157f   :  { %3566 = vmatprep.mubr.msk.f32.mxu1 %vm155_vm1, %v2449_v17 }
0x1580   :  { %3567 = vmatmul.mubr.msk.f32.vlgmr.msra.gmra.mxu1 %vm155_vm1, %v3563_v15  ;;  %v2659_v20 = vpop.permute.xlu0 %2658  ;;  %v3233_v15 = vld [vmem:[%s4282_s10 + $0x40] sm:$0xff] }
0x1581   :  { %3577 = vmatpush3.msra.mxu1 %v2661_v63  ;;  %3580 = vmatprep.mubr.msk.f32.mxu1 %vm243_vm2, %v2656_v19 }
0x1582   :  { %3578 = vmatprep.subr.mxu1 %v2659_v20 }
0x1583   :  { %3579 = vmatpush3.msra.mxu1 %v2659_v20 }
0x1584   :  { %3583 = vmatprep.subr.mxu1 %v3186_v23 }
0x158a   :  { %v3700_v9 = vpop.eup %3699 }
0x158b   :  { %v2657_v22 = vmul.f32 %v3700_v9, %v3696_v11 }
0x158d   :  { %3581 = vmatmul.mubr.msk.f32.vlgmr.msra.gmra.mxu1 %vm243_vm2, %v2657_v22 }
0x158e   :  { %3584 = vmatpush3.msra.mxu1 %v3186_v23 }
0x158f   :  { %3599 = vmatprep.subr.mxu1 %v3240_v18 }
0x1640   :  { %v3568_v27 = vpop.f32.mrf.mxu1 }
0x1641   :  { %v2540_v10 = vadd.f32 %v3568_v27, %v2251_v26  ;;  %v3245_v26 = vld [vmem:[%s4286_s11 + $0x1] ss:$0 sm:$0xff] }
0x1642   :  { %v2530_v29 = vpop.f32.mrf.mxu1 }
0x1643   :  { %v2539_v31 = vadd.f32 %v2530_v29, %v2246_v28 }
0x164d   :  { %v3582_v33 = vpop.f32.mrf.mxu1 }
0x164f   :  { %v2736_v34 = vpop.f32.mrf.mxu1 }
0x1650   :  { %3585 = vmatprep.mubr.msk.f32.mxu1 %vm155_vm1, %v2736_v34 }
0x1651   :  { %3586 = vmatmul.mubr.msk.f32.vlgmr.msra.gmra.mxu1 %vm155_vm1, %v3582_v33 }
0x1652   :  { %3600 = vmatpush3.msra.mxu1 %v3240_v18 }
0x1653   :  { %3601 = vmatprep.subr.mxu1 %v3239_v21 }
0x1654   :  { %3602 = vmatpush3.msra.mxu1 %v3239_v21 }
0x1655   :  { %3603 = vmatprep.subr.mxu1 %v3238_v54 }
0x1656   :  { %3604 = vmatpush3.msra.mxu1 %v3238_v54 }
0x1657   :  { %3605 = vmatprep.subr.mxu1 %v3237_v5 }
0x1658   :  { %3606 = vmatpush3.msra.mxu1 %v3237_v5 }
0x1659   :  { %3607 = vmatprep.subr.mxu1 %v3236_v8 }
0x165a   :  { %3608 = vmatpush3.msra.mxu1 %v3236_v8 }
0x165b   :  { %3609 = vmatprep.subr.mxu1 %v3235_v13 }
0x165c   :  { %3610 = vmatpush3.msra.mxu1 %v3235_v13 }
0x165d   :  { %3611 = vmatprep.subr.mxu1 %v3234_v14 }
0x165e   :  { %3612 = vmatpush3.msra.mxu1 %v3234_v14 }
0x165f   :  { %3613 = vmatprep.subr.mxu1 %v3233_v15 }
0x1660   :  { %3614 = vmatpush3.msra.mxu1 %v3233_v15 }
0x1711   :  { %v3587_v36 = vpop.f32.mrf.mxu1 }
0x1712   :  { %v2827_v37 = vadd.f32 %v3587_v36, %v2540_v10 }
0x1713   :  { %v2817_v38 = vpop.f32.mrf.mxu1 }
0x1714   :  { %v2835_v24 = vadd.f32 %v3223_v35, %v2827_v37  ;;  %v2826_v39 = vadd.f32 %v2817_v38, %v2539_v31 }
0x1716   :  { %v2834_v40 = vadd.f32 %v3223_v35, %v2826_v39  ;;  %v2837_v25 = vadd.f32 %v2835_v24, %v4053_v1 }
0x1718   :  { %v2845_v41 = vsel %vm67_vm0, %v2837_v25, 0.0  ;;  %v2836_v42 = vadd.f32 %v2834_v40, %v4051_v0  ;;  %v3231_v0 = vld [vmem:[%s4281_s8 + $0x38] sm:$0xff] }
0x1719   :  { %2846 = vadd.xlane.f32.xlu0 %v2845_v41  ;;  %3588 = vmatprep.subr.mxu0 %v3231_v0 }
0x171a   :  { %v2842_v43 = vsel %vm67_vm0, %v2836_v42, 0.0  ;;  %3589 = vmatpush3.msra.mxu0 %v3231_v0  ;;  %v3251_v0 = vld [vmem:[%s4288_s13 + $0x1] ss:$0 sm:$0xff] }
0x171b   :  { %2843 = vadd.xlane.f32.xlu1 %v2842_v43  ;;  %3590 = vmatprep.subr.mxu0 %v3230_v51 }
0x171c   :  { %3591 = vmatpush3.msra.mxu0 %v3230_v51 }
0x171d   :  { %3592 = vmatprep.subr.mxu0 %v3229_v52 }
0x171e   :  { %3593 = vmatpush3.msra.mxu0 %v3229_v52 }
0x171f   :  { %3594 = vmatprep.subr.mxu0 %v3228_v53 }
0x1720   :  { %3595 = vmatpush3.msra.mxu0 %v3228_v53 }
0x17a2   :  { %v2847_v30 = vpop.xlane.xlu0 %2846 }
0x17a3   :  { %v2849_v32 = vmul.f32 0.03125, %v2847_v30 }
0x17a4   :  { %v2844_v44 = vpop.xlane.xlu1 %2843 }
0x17a5   :  { %v2851_v45 = vsub.f32 %v2837_v25, %v2849_v32  ;;  %v2848_v46 = vmul.f32 0.03125, %v2844_v44 }
0x17a7   :  { %v2850_v47 = vsub.f32 %v2836_v42, %v2848_v46  ;;  %v2853_v48 = vmul.f32 %v2851_v45, %v2851_v45 }
0x17a9   :  { %v2857_v49 = vsel %vm67_vm0, %v2853_v48, 0.0  ;;  %v2852_v50 = vmul.f32 %v2850_v47, %v2850_v47 }
0x17aa   :  { %2858 = vadd.xlane.f32.xlu0 %v2857_v49  ;;  %v3250_v49 = vld [vmem:[%s4287_s12 + $0x1] ss:$0 sm:$0xff] }
0x17ab   :  { %v2854_v1 = vsel %vm67_vm0, %v2852_v50, 0.0 }
0x17ac   :  { %2855 = vadd.xlane.f32.xlu1 %v2854_v1 }
0x1833   :  { %v2859_v2 = vpop.xlane.xlu0 %2858 }
0x1834   :  { %v2861_v55 = vmul.f32 0.03125, %v2859_v2 }
0x1835   :  { %v2856_v56 = vpop.xlane.xlu1 %2855 }
0x1836   :  { %v2863_v57 = vadd.f32 1e-05, %v2861_v55  ;;  %v2860_v58 = vmul.f32 0.03125, %v2856_v56 }
0x1838   :  { %3701 = vrsqrt.f32 %v2863_v57  ;;  %v2862_v59 = vadd.f32 1e-05, %v2860_v58 }
0x183a   :  { %3703 = vrsqrt.f32 %v2862_v59 }
0x1845   :  { %v3702_v60 = vpop.eup %3701 }
0x1846   :  { %v2867_v62 = vmul.f32 %v3702_v60, %v2851_v45 }
0x1847   :  { %v3704_v6 = vpop.eup %3703 }
0x1848   :  { %v2866_v63 = vmul.f32 %v3704_v6, %v2850_v47  ;;  %v2875_v3 = vmul.f32 %v3226_v61, %v2867_v62 }
0x184a   :  { %v2874_v7 = vmul.f32 %v3226_v61, %v2866_v63  ;;  %v2883_v12 = vadd.f32 %v3227_v4, %v2875_v3 }
0x184c   :  { %v2882_v11 = vadd.f32 %v3227_v4, %v2874_v7 }
0x184e   :  { %3596 = vmatprep.mubr.msk.f32.mxu0 %vm67_vm0, %v2882_v11 }
0x184f   :  { %3597 = vmatmul.mubr.msk.f32.vlgmr.msra.gmra.mxu0 %vm67_vm0, %v2883_v12 }
0x190f   :  { %v3598_v17 = vpop.f32.mrf.mxu0 }
0x1910   :  { %v2986_v19 = vadd.f32 %v3598_v17, %v3242_v16 }
0x1911   :  { %v2980_v20 = vpop.f32.mrf.mxu0 }
0x1912   :  { %v2981_v9 = vadd.f32 %v3242_v16, %v2980_v20  ;;  %v2990_v23 = vmax.f32 %v2986_v19, 0.0 }
0x1914   :  { %v2989_v22 = vmax.f32 %v2981_v9, 0.0 }
0x1916   :  { %3615 = vmatprep.mubr.msk.f32.mxu1 %vm1457_vm3, %v2989_v22 }
0x1917   :  { %3616 = vmatmul.mubr.msk.f32.vlgmr.msra.gmra.mxu1 %vm1457_vm3, %v2990_v23 }
0x19d7   :  { %v3617_v27 = vpop.f32.mrf.mxu1 }
0x19d8   :  { %v3075_v28 = vadd.f32 %v3617_v27, %v3245_v26 }
0x19d9   :  { %v3069_v10 = vpop.f32.mrf.mxu1 }
0x19da   :  { %v3070_v29 = vadd.f32 %v3245_v26, %v3069_v10  ;;  %v3079_v31 = vadd.f32 %v3075_v28, %v2883_v12 }
0x19dc   :  { %v3087_v33 = vsel %vm67_vm0, %v3079_v31, 0.0  ;;  %v3078_v34 = vadd.f32 %v3070_v29, %v2882_v11 }
0x19dd   :  { %3088 = vadd.xlane.f32.xlu0 %v3087_v33 }
0x19de   :  { %v3084_v35 = vsel %vm67_vm0, %v3078_v34, 0.0 }
0x19df   :  { %3085 = vadd.xlane.f32.xlu1 %v3084_v35 }
0x1a66   :  { %v3089_v36 = vpop.xlane.xlu0 %3088 }
0x1a67   :  { %v3091_v37 = vmul.f32 0.03125, %v3089_v36 }
0x1a68   :  { %v3086_v38 = vpop.xlane.xlu1 %3085 }
0x1a69   :  { %v3093_v24 = vsub.f32 %v3079_v31, %v3091_v37  ;;  %v3090_v39 = vmul.f32 0.03125, %v3086_v38 }
0x1a6b   :  { %v3092_v40 = vsub.f32 %v3078_v34, %v3090_v39  ;;  %v3095_v25 = vmul.f32 %v3093_v24, %v3093_v24 }
0x1a6d   :  { %v3099_v41 = vsel %vm67_vm0, %v3095_v25, 0.0  ;;  %v3094_v42 = vmul.f32 %v3092_v40, %v3092_v40 }
0x1a6e   :  { %3100 = vadd.xlane.f32.xlu0 %v3099_v41 }
0x1a6f   :  { %v3096_v43 = vsel %vm67_vm0, %v3094_v42, 0.0 }
0x1a70   :  { %3097 = vadd.xlane.f32.xlu1 %v3096_v43 }
0x1af7   :  { %v3101_v30 = vpop.xlane.xlu0 %3100 }
0x1af8   :  { %v3103_v32 = vmul.f32 0.03125, %v3101_v30 }
0x1af9   :  { %v3098_v44 = vpop.xlane.xlu1 %3097 }
0x1afa   :  { %v3105_v45 = vadd.f32 1e-05, %v3103_v32  ;;  %v3102_v46 = vmul.f32 0.03125, %v3098_v44 }
0x1afc   :  { %3705 = vrsqrt.f32 %v3105_v45  ;;  %v3104_v47 = vadd.f32 1e-05, %v3102_v46 }
0x1afe   :  { %3707 = vrsqrt.f32 %v3104_v47 }
0x1b09   :  { %v3706_v48 = vpop.eup %3705 }
0x1b0a   :  { %v3109_v50 = vmul.f32 %v3706_v48, %v3093_v24 }
0x1b0b   :  { %v3708_v1 = vpop.eup %3707 }
0x1b0c   :  { %v3117_v51 = vmul.f32 %v3250_v49, %v3109_v50  ;;  %v3108_v52 = vmul.f32 %v3708_v1, %v3092_v40 }
0x1b0e   :  { %v3125_v53 = vadd.f32 %v3251_v0, %v3117_v51  ;;  %v3116_v18 = vmul.f32 %v3250_v49, %v3108_v52 }
0x1b10   :  { %3127 = vst.msk [vmem:[%s4289_s14 + $0x8] sm:$0xff] %vm67_vm0, %v3125_v53  ;;  %v3124_v21 = vadd.f32 %v3251_v0, %v3116_v18 }
0x1b12   :  { %3126 = vst.msk [vmem:[%s4289_s14] sm:$0xff] %vm67_vm0, %v3124_v21 }

// kernel: _lambda_.3
= control target key start
LH: loop header
LB: loop body
LE: loop exit
PB: predicated region body
PF: predicated region fallthrough
CT: control target
= control target key end

     0   :  { %s8151_s0 = inlined_call_operand.vmem [shape: f32[16,32], index: 0, kind: input, shape index: {}]   ;;  %s8152_s1 = inlined_call_operand.vmem [shape: f32[16,32], index: 1, kind: input, shape index: {}]   ;;  %s8153_s2 = inlined_call_operand.vmem [shape: f32[16,16], index: 2, kind: input, shape index: {}]   ;;  %s8154_s3 = inlined_call_operand.vmem [shape: f32[2,32,96], index: 3, kind: input, shape index: {}]   ;;  %s8155_s4 = inlined_call_operand.vmem [shape: f32[2,1,96], index: 4, kind: input, shape index: {}, may-alias: {4,10}]   ;;  %s8156_s5 = inlined_call_operand.vmem [shape: f32[2,32,32], index: 5, kind: input, shape index: {}]   ;;  %s8157_s6 = inlined_call_operand.vmem [shape: f32[2,1,32], index: 6, kind: input, shape index: {}, may-alias: {6,8,12,14,18,20}]   ;;  %s8158_s7 = inlined_call_operand.vmem [shape: f32[2,1,32], index: 7, kind: input, shape index: {}, may-alias: {7,13,19}]   ;;  %s8159_s8 = inlined_call_operand.vmem [shape: f32[2,1,32], index: 8, kind: input, shape index: {}, may-alias: {6,8,12,14,18,20}]   ;;  %s8160_s9 = inlined_call_operand.vmem [shape: f32[2,32,96], index: 9, kind: input, shape index: {}]   ;;  %s8161_s10 = inlined_call_operand.vmem [shape: f32[2,1,96], index: 10, kind: input, shape index: {}, may-alias: {4,10}]   ;;  %s8162_s11 = inlined_call_operand.vmem [shape: f32[2,32,32], index: 11, kind: input, shape index: {}]   ;;  %s8163_s12 = inlined_call_operand.vmem [shape: f32[2,1,32], index: 12, kind: input, shape index: {}, may-alias: {6,8,12,14,18,20}]   ;;  %s8164_s13 = inlined_call_operand.vmem [shape: f32[2,1,32], index: 13, kind: input, shape index: {}, may-alias: {7,13,19}]   ;;  %s8165_s14 = inlined_call_operand.vmem [shape: f32[2,1,32], index: 14, kind: input, shape index: {}, may-alias: {6,8,12,14,18,20}]   ;;  %s8166_s15 = inlined_call_operand.vmem [shape: f32[2,32,64], index: 15, kind: input, shape index: {}]   ;;  %s8167_s16 = inlined_call_operand.vmem [shape: f32[2,1,64], index: 16, kind: input, shape index: {}]   ;;  %s8168_s17 = inlined_call_operand.vmem [shape: f32[2,64,32], index: 17, kind: input, shape index: {}]   ;;  %s8169_s18 = inlined_call_operand.vmem [shape: f32[2,1,32], index: 18, kind: input, shape index: {}, may-alias: {6,8,12,14,18,20}]   ;;  %s8170_s19 = inlined_call_operand.vmem [shape: f32[2,1,32], index: 19, kind: input, shape index: {}, may-alias: {7,13,19}]   ;;  %s8171_s20 = inlined_call_operand.vmem [shape: f32[2,1,32], index: 20, kind: input, shape index: {}, may-alias: {6,8,12,14,18,20}]   ;;  %s8172_s21 = inlined_call_operand.hbm [shape: f32[32,128], index: 21, kind: input, shape index: {}]   ;;  %s8173_s22 = inlined_call_operand.vmem [shape: f32[1,128], index: 22, kind: input, shape index: {}]   ;;  %s8174_s23 = inlined_call_operand.vmem [shape: f32[16,128], index: 23, kind: output, shape index: {}]  }
   0x1   :  { %8207 = sst [smem:[#allocation5_spill]] %s8151_s0 }
   0x2   :  { %8208 = sst [smem:[#allocation6_spill]] %s8152_s1 }
   0x3   :  { %8209 = sst [smem:[#allocation7_spill]] %s8153_s2 }
   0x4   :  { %8210 = sst [smem:[#allocation8_spill]] %s8154_s3 }
   0x5   :  { %8211 = sst [smem:[#allocation9_spill]] %s8155_s4 }
   0x6   :  { %8212 = sst [smem:[#allocation10_spill]] %s8156_s5 }
   0x7   :  { %8213 = sst [smem:[#allocation11_spill]] %s8157_s6 }
   0x8   :  { %8214 = sst [smem:[#allocation12_spill]] %s8158_s7 }
   0x9   :  { %8215 = sst [smem:[#allocation13_spill]] %s8163_s12 }
   0xa   :  { %8216 = sst [smem:[#allocation14_spill]] %s8173_s22 }
   0xb   :  { %8217 = sst [smem:[#allocation15_spill]] %s8174_s23 }
   0xc   :  { %28 = vsyncpa [#allocation3], 0  ;;  %s7149_s4 = smov [#allocation2]  }
   0xd   :  { %s76_s30 = sshll.u32 %s7149_s4, 4  ;;  %s77_s30 = int_to_ptr.vmem [resolvable:$true] %s76_s30 }
   0xe   :  { %s7135_s24 = scalar_lea.vmem %s77_s30, 512  ;;  %p7140_p1 = scmp.lt.s32.totalorder %s77_s30, %s77_s30 }
   0xf   :  { %p7136_p0 = scmp.ne.s32.totalorder %s77_s30, %s7135_s24  ;;  %p7141_p2 = scmp.lt.s32.totalorder %s7135_s24, %s7135_s24 }
  0x11   :  { %p7142_p3 = por %p7141_p2, %p7140_p1 }
  0x13   :  { %p7143_p4 = pnand %p7142_p3, %p7136_p0 }
  0x15   :  { %7146 = shalt.err (!%p7143_p4)
}
  0x16   :  { %s7150_s25 = smov 128   ;;  %s7151_s5 = smov 8  }
  0x17   :  { %82 = dma.hbm_to_vmem [thread:$0]  %s8172_s21, 512, %s77_s30, [#allocation3], %s7150_s25, %s7150_s25, %s7151_s5  }
  0x18   :  { %7147 = dma.done.wait [#allocation3], 512  }
  0x19   :  { %7148 = vsyncadd [#allocation3], 4294966784  ;;  %vm110_vm0 = vcmask 261120   ;;  %s8218_s27 = sld [smem:[#allocation8_spill]]  ;;  %vm198_vm1 = vcmask 64512   ;;  %s8201_s6 = smov 88  }
  0x1a   :  { %s8219_s0 = sld [smem:[#allocation5_spill]]  ;;  %s8203_s7 = smov 96   ;;  %vm286_vm2 = vcmask 130048   ;;  %vm2891_vm3 = vcmask 523264  }
  0x1b   :  { %s8220_s2 = sld [smem:[#allocation9_spill]]  ;;  %s8199_s28 = smov 120  }
  0x1c   :  { %s8189_s30 = smov 64   ;;  %s8183_s24 = smov 56  }
  0x1d   :  { %s8193_s25 = smov 80   ;;  %s8197_s5 = smov 112  }
  0x1e   :  { %s8191_s1 = smov 72   ;;  %s8195_s26 = smov 104  }
  0x1f   :  { %v97_v0 = vld [vmem:[%s8218_s27 + $0x18] sm:$0xff]  ;;  %v96_v1 = vld [vmem:[%s8218_s27 + $0x10] sm:$0xff]  ;;  %v95_v3 = vld [vmem:[%s8218_s27 + $0x8] sm:$0xff]  ;;  %s8222_s4 = sld [smem:[#allocation10_spill]]  ;;  %s8185_s29 = smov 40  }
  0x20   :  { %6515 = vmatprep.subr.mxu0 %v97_v0  ;;  %v7295_v2 = vld [vmem:[%s8219_s0] sm:$0xff]  ;;  %v7308_v5 = vld [vmem:[%s8219_s0 + $0x8] sm:$0xff]  ;;  %s8221_s0 = sld [smem:[#allocation7_spill]]  ;;  %s8226_s21 = smov 112  }
  0x21   :  { %6516 = vmatpush3.msra.mxu0 %v97_v0  ;;  %6523 = vmatprep.mubr.msk.f32.mxu0 %vm110_vm0, %v7295_v2  ;;  %v94_v4 = vld [vmem:[%s8218_s27] sm:$0xff]  ;;  %s8225_s3 = sld [smem:[#allocation12_spill]]  ;;  %s8236_s23 = smov 40  }
  0x22   :  { %6517 = vmatprep.subr.mxu0 %v96_v1  ;;  %v6050_v6 = vld [vmem:[%s8220_s2] ss:$0 sm:$0xff]  ;;  %s8238_s22 = sld [smem:[#allocation14_spill]] }
  0x23   :  { %6518 = vmatpush3.msra.mxu0 %v96_v1 }
  0x24   :  { %6519 = vmatprep.subr.mxu0 %v95_v3 }
  0x25   :  { %6520 = vmatpush3.msra.mxu0 %v95_v3 }
  0x26   :  { %6521 = vmatprep.subr.mxu0 %v94_v4  ;;  %v7348_v18 = vld [vmem:[%s8221_s0 + $0x8] sm:$0xff]  ;;  %v7353_v21 = vld [vmem:[%s8221_s0] sm:$0xff] }
  0x27   :  { %6522 = vmatpush3.msra.mxu0 %v94_v4  ;;  %v100_v4 = vld [vmem:[%s8222_s4 + $0x8] sm:$0xff] }
  0x28   :  { %6524 = vmatmul.mubr.msk.f32.vlgmr.msra.gmra.mxu0 %vm110_vm0, %v7308_v5 }
  0xe8   :  { %v6525_v7 = vpop.f32.mrf.mxu0 }
  0xe9   :  { %v7315_v8 = vadd.f32 %v6525_v7, %v6050_v6 }
  0xea   :  { %v183_v9 = vpop.f32.mrf.mxu0 }
  0xeb   :  { %v7317_v10 = vadd.f32 %v6050_v6, %v183_v9  ;;  %402 = vrot.lane.b32.xlu1 %v7315_v8, %s8201_s6  ;;  %196 = vrot.lane.b32.xlu0 %v7315_v8, %s8203_s7 }
  0xed   :  { %6530 = vmatprep.mubr.msk.f32.mxu1 %vm198_vm1, %v7317_v10 }
  0xef   :  { %400 = vrot.lane.b32.xlu1 %v7317_v10, %s8201_s6  ;;  %194 = vrot.lane.b32.xlu0 %v7317_v10, %s8203_s7 }
  0xf3   :  { %398 = vrot.lane.b32.xlu1 %v7315_v8, %s8199_s28  ;;  %396 = vrot.lane.b32.xlu0 %v7317_v10, %s8199_s28 }
 0x15d   :  { %v197_v11 = vpop.permute.xlu0 %196  ;;  %v403_v12 = vpop.permute.xlu1 %402 }
 0x15e   :  { %6526 = vmatprep.subr.msk.mxu1 %vm198_vm1, %v197_v11 }
 0x15f   :  { %6527 = vmatpush3.xpose.msk.msra.mxu1 %vm198_vm1, %v197_v11 }
 0x161   :  { %v195_v13 = vpop.permute.xlu0 %194  ;;  %v401_v15 = vpop.permute.xlu1 %400 }
 0x162   :  { %6528 = vmatprep.subr.msk.mxu1 %vm198_vm1, %v195_v13 }
 0x163   :  { %6529 = vmatpush3.xpose.msk.msra.mxu1 %vm198_vm1, %v195_v13  ;;  %v99_v13 = vld [vmem:[%s8222_s4] sm:$0xff] }
 0x164   :  { %6540 = vmatprep.subr.msk.mxu1 %vm198_vm1, %v403_v12 }
 0x165   :  { %v397_v14 = vpop.permute.xlu0 %396  ;;  %v399_v16 = vpop.permute.xlu1 %398 }
 0x166   :  { %6531 = vmatmul.mubr.msk.f32.vlgmr.msra.gmra.mxu1 %vm198_vm1, %v7315_v8 }
 0x167   :  { %6541 = vmatpush3.xpose.msk.msra.mxu1 %vm198_vm1, %v403_v12  ;;  %6544 = vmatprep.mubr.msk.f32.mxu1 %vm198_vm1, %v397_v14 }
 0x168   :  { %6542 = vmatprep.subr.msk.mxu1 %vm198_vm1, %v401_v15 }
 0x16b   :  { %6543 = vmatpush3.xpose.msk.msra.mxu1 %vm198_vm1, %v401_v15 }
 0x16c   :  { %6559 = vmatprep.subr.mxu1 %v99_v13 }
 0x16e   :  { %6545 = vmatmul.mubr.msk.f32.vlgmr.msra.gmra.mxu1 %vm198_vm1, %v399_v16 }
 0x16f   :  { %6560 = vmatpush3.msra.mxu1 %v99_v13 }
 0x226   :  { %v6532_v17 = vpop.f32.mrf.mxu1 }
 0x227   :  { %v283_v19 = vmul.f32 0.35355338, %v6532_v17 }
 0x228   :  { %v273_v20 = vpop.f32.mrf.mxu1 }
 0x229   :  { %v282_v22 = vmul.f32 0.35355338, %v273_v20  ;;  %v285_v23 = vadd.f32 %v283_v19, %v7348_v18 }
 0x22b   :  { %v290_v24 = vsel %vm286_vm2, %v285_v23, -inf  ;;  %v284_v25 = vadd.f32 %v282_v22, %v7353_v21 }
 0x22c   :  { %291 = vmax.xlane.f32.xlu1 %v290_v24 }
 0x22d   :  { %v287_v26 = vsel %vm286_vm2, %v284_v25, -inf }
 0x22e   :  { %v6546_v27 = vpop.f32.mrf.mxu1  ;;  %288 = vmax.xlane.f32.xlu0 %v287_v26 }
 0x22f   :  { %v488_v29 = vmul.f32 0.35355338, %v6546_v27 }
 0x230   :  { %v478_v28 = vpop.f32.mrf.mxu1 }
 0x231   :  { %v487_v30 = vmul.f32 0.35355338, %v478_v28  ;;  %v490_v33 = vadd.f32 %v488_v29, %v7348_v18 }
 0x233   :  { %v489_v31 = vadd.f32 %v487_v30, %v7353_v21  ;;  %v494_v34 = vsel %vm286_vm2, %v490_v33, -inf }
 0x235   :  { %v491_v32 = vsel %vm286_vm2, %v489_v31, -inf }
 0x236   :  { %492 = vmax.xlane.f32.xlu0 %v491_v32 }
 0x23a   :  { %495 = vmax.xlane.f32.xlu0 %v494_v34 }
 0x23d   :  { %311 = vrot.lane.b32.xlu1 %v7315_v8, %s8189_s30 }
 0x2b5   :  { %v292_v35 = vpop.xlane.xlu1 %291 }
 0x2b6   :  { %v294_v36 = vsub.f32 %v285_v23, %v292_v35 }
 0x2b7   :  { %v289_v37 = vpop.xlane.xlu0 %288 }
 0x2b8   :  { %v297_v38 = vmul.f32 1.442695, %v294_v36  ;;  %v293_v39 = vsub.f32 %v284_v25, %v289_v37 }
 0x2b9   :  { %v312_v40 = vpop.permute.xlu1 %311 }
 0x2ba   :  { %6970 = vpow2.f32 %v297_v38  ;;  %v295_v41 = vmul.f32 1.442695, %v293_v39  ;;  %6533 = vmatprep.subr.mxu0 %v312_v40 }
 0x2bb   :  { %6534 = vmatpush3.msra.mxu0 %v312_v40 }
 0x2bc   :  { %6972 = vpow2.f32 %v295_v41 }
 0x2bf   :  { %v493_v42 = vpop.xlane.xlu0 %492 }
 0x2c0   :  { %v497_v52 = vsub.f32 %v489_v31, %v493_v42 }
 0x2c2   :  { %v499_v53 = vmul.f32 1.442695, %v497_v52 }
 0x2c3   :  { %v496_v43 = vpop.xlane.xlu0 %495 }
 0x2c4   :  { %v498_v44 = vsub.f32 %v490_v33, %v496_v43 }
 0x2c6   :  { %v501_v45 = vmul.f32 1.442695, %v498_v44 }
 0x2c7   :  { %v6971_v46 = vpop.eup %6970 }
 0x2c8   :  { %6974 = vpow2.f32 %v501_v45  ;;  %v302_v47 = vsel %vm286_vm2, %v6971_v46, 0.0 }
 0x2c9   :  { %v6973_v48 = vpop.eup %6972  ;;  %303 = vadd.xlane.f32.xlu0 %v302_v47  ;;  %6976 = vpow2.f32 %v499_v53 }
 0x2ca   :  { %v299_v49 = vsel %vm286_vm2, %v6973_v48, 0.0 }
 0x2cb   :  { %300 = vadd.xlane.f32.xlu1 %v299_v49 }
 0x2d5   :  { %v6975_v50 = vpop.eup %6974 }
 0x2d6   :  { %v506_v51 = vsel %vm286_vm2, %v6975_v50, 0.0  ;;  %v6977_v54 = vpop.eup %6976 }
 0x2d7   :  { %507 = vadd.xlane.f32.xlu0 %v506_v51  ;;  %v503_v55 = vsel %vm286_vm2, %v6977_v54, 0.0 }
 0x2dc   :  { %515 = vrot.lane.b32.xlu1 %v7315_v8, %s8183_s24 }
 0x2ed   :  { %309 = vrot.lane.b32.xlu0 %v7317_v10, %s8189_s30  ;;  %s8223_s30 = sld [smem:[#allocation11_spill]] }
 0x2f1   :  { %768 = vrot.lane.b32.xlu0 %v7315_v8, %s8193_s25 }
 0x2f5   :  { %762 = vrot.lane.b32.xlu0 %v7317_v10, %s8197_s5 }
 0x2f9   :  { %1055 = vrot.lane.b32.xlu0 %v7315_v8, %s8191_s1 }
 0x2fd   :  { %1049 = vrot.lane.b32.xlu0 %v7317_v10, %s8195_s26 }
 0x300   :  { %504 = vadd.xlane.f32.xlu1 %v503_v55 }
 0x311   :  { %513 = vrot.lane.b32.xlu1 %v7317_v10, %s8183_s24  ;;  %s8187_s24 = smov 48  }
 0x315   :  { %766 = vrot.lane.b32.xlu1 %v7317_v10, %s8193_s25  ;;  %s8227_s25 = smov 104  }
 0x319   :  { %764 = vrot.lane.b32.xlu1 %v7315_v8, %s8197_s5  ;;  %s8228_s5 = smov 80  }
 0x31d   :  { %1053 = vrot.lane.b32.xlu1 %v7317_v10, %s8191_s1 }
 0x321   :  { %1051 = vrot.lane.b32.xlu1 %v7315_v8, %s8195_s26  ;;  %s8233_s26 = smov 120  }
 0x352   :  { %v304_v56 = vpop.xlane.xlu0 %303 }
 0x353   :  { %6978 = vrcp.f32 %v304_v56 }
 0x354   :  { %v301_v57 = vpop.xlane.xlu1 %300 }
 0x355   :  { %6980 = vrcp.f32 %v301_v57 }
 0x358   :  { %v516_v0 = vpop.permute.xlu1 %515 }
 0x360   :  { %v508_v58 = vpop.xlane.xlu0 %507  ;;  %v6979_v59 = vpop.eup %6978 }
 0x361   :  { %v308_v63 = vmul.f32 %v6979_v59, %v6971_v46  ;;  %6982 = vrcp.f32 %v508_v58 }
 0x362   :  { %v6981_v60 = vpop.eup %6980 }
 0x363   :  { %v307_v61 = vmul.f32 %v6981_v60, %v6973_v48 }
 0x364   :  { %v310_v62 = vpop.permute.xlu0 %309 }
 0x365   :  { %6535 = vmatprep.subr.mxu0 %v310_v62  ;;  %6537 = vmatprep.mubr.msk.f32.mxu0 %vm286_vm2, %v307_v61 }
 0x366   :  { %6536 = vmatpush3.msra.mxu0 %v310_v62 }
 0x367   :  { %6538 = vmatmul.mubr.msk.f32.vlgmr.msra.gmra.mxu0 %vm286_vm2, %v308_v63  ;;  %6547 = vmatprep.subr.mxu0 %v516_v0 }
 0x368   :  { %6548 = vmatpush3.msra.mxu0 %v516_v0  ;;  %v769_v12 = vpop.permute.xlu0 %768 }
 0x36c   :  { %v763_v16 = vpop.permute.xlu0 %762 }
 0x36e   :  { %v6983_v6 = vpop.eup %6982 }
 0x36f   :  { %v512_v11 = vmul.f32 %v6983_v6, %v6975_v50 }
 0x370   :  { %v1056_v22 = vpop.permute.xlu0 %1055 }
 0x374   :  { %v1050_v24 = vpop.permute.xlu0 %1049 }
 0x389   :  { %v505_v1 = vpop.xlane.xlu1 %504 }
 0x38a   :  { %6984 = vrcp.f32 %v505_v1 }
 0x38d   :  { %v514_v3 = vpop.permute.xlu1 %513 }
 0x38e   :  { %6549 = vmatprep.subr.mxu0 %v514_v3 }
 0x38f   :  { %6550 = vmatpush3.msra.mxu0 %v514_v3  ;;  %v101_v3 = vld [vmem:[%s8222_s4 + $0x10] sm:$0xff] }
 0x390   :  { %6554 = vmatprep.subr.mxu0 %v100_v4 }
 0x391   :  { %v767_v19 = vpop.permute.xlu1 %766 }
 0x395   :  { %v765_v23 = vpop.permute.xlu1 %764 }
 0x397   :  { %v6985_v7 = vpop.eup %6984 }
 0x398   :  { %v511_v9 = vmul.f32 %v6985_v7, %v6977_v54 }
 0x399   :  { %v1054_v25 = vpop.permute.xlu1 %1053 }
 0x39a   :  { %6551 = vmatprep.mubr.msk.f32.mxu0 %vm286_vm2, %v511_v9 }
 0x39b   :  { %6552 = vmatmul.mubr.msk.f32.vlgmr.msra.gmra.mxu0 %vm286_vm2, %v512_v11 }
 0x39c   :  { %6555 = vmatpush3.msra.mxu0 %v100_v4 }
 0x39d   :  { %6564 = vmatprep.subr.msk.mxu0 %vm198_vm1, %v769_v12  ;;  %v1052_v26 = vpop.permute.xlu1 %1051 }
 0x427   :  { %v6539_v14 = vpop.f32.mrf.mxu0 }
 0x429   :  { %v387_v15 = vpop.f32.mrf.mxu0 }
 0x42a   :  { %6561 = vmatprep.mubr.msk.f32.mxu1 %vm198_vm1, %v387_v15 }
 0x42b   :  { %6562 = vmatmul.mubr.msk.f32.vlgmr.msra.gmra.mxu1 %vm198_vm1, %v6539_v14 }
 0x45b   :  { %v6553_v17 = vpop.f32.mrf.mxu0 }
 0x45d   :  { %v591_v20 = vpop.f32.mrf.mxu0 }
 0x45e   :  { %6556 = vmatprep.mubr.msk.f32.mxu0 %vm198_vm1, %v591_v20 }
 0x45f   :  { %6557 = vmatmul.mubr.msk.f32.vlgmr.msra.gmra.mxu0 %vm198_vm1, %v6553_v17 }
 0x460   :  { %6565 = vmatpush3.xpose.msk.msra.mxu0 %vm198_vm1, %v769_v12  ;;  %6568 = vmatprep.mubr.msk.f32.mxu0 %vm198_vm1, %v763_v16 }
 0x461   :  { %6566 = vmatprep.subr.msk.mxu0 %vm198_vm1, %v767_v19 }
 0x464   :  { %6567 = vmatpush3.xpose.msk.msra.mxu0 %vm198_vm1, %v767_v19 }
 0x465   :  { %6583 = vmatprep.subr.msk.mxu0 %vm198_vm1, %v1056_v22 }
 0x467   :  { %6569 = vmatmul.mubr.msk.f32.vlgmr.msra.gmra.mxu0 %vm198_vm1, %v765_v23 }
 0x468   :  { %6584 = vmatpush3.xpose.msk.msra.mxu0 %vm198_vm1, %v1056_v22  ;;  %6587 = vmatprep.mubr.msk.f32.mxu0 %vm198_vm1, %v1050_v24 }
 0x469   :  { %6585 = vmatprep.subr.msk.mxu0 %vm198_vm1, %v1054_v25 }
 0x46c   :  { %6586 = vmatpush3.xpose.msk.msra.mxu0 %vm198_vm1, %v1054_v25 }
 0x46f   :  { %6588 = vmatmul.mubr.msk.f32.vlgmr.msra.gmra.mxu0 %vm198_vm1, %v1052_v26 }
 0x4eb   :  { %v6563_v27 = vpop.f32.mrf.mxu1 }
 0x4ed   :  { %v753_v17 = vpop.f32.mrf.mxu1 }
 0x51f   :  { %v6558_v28 = vpop.f32.mrf.mxu0 }
 0x520   :  { %v7417_v29 = vadd.f32 %v6563_v27, %v6558_v28  ;;  %v102_v27 = vld [vmem:[%s8222_s4 + $0x18] sm:$0xff] }
 0x521   :  { %v7419_v30 = vpop.f32.mrf.mxu0 }
 0x527   :  { %v6570_v31 = vpop.f32.mrf.mxu0 }
 0x528   :  { %v854_v32 = vmul.f32 0.35355338, %v6570_v31  ;;  %v754_v31 = vadd.f32 %v753_v17, %v7419_v30  ;;  %v6085_v30 = vld [vmem:[%s8223_s30] ss:$0 sm:$0xff] }
 0x529   :  { %v844_v33 = vpop.f32.mrf.mxu0 }
 0x52a   :  { %v853_v34 = vmul.f32 0.35355338, %v844_v33  ;;  %v856_v35 = vadd.f32 %v854_v32, %v7348_v18 }
 0x52c   :  { %v860_v36 = vsel %vm286_vm2, %v856_v35, -inf  ;;  %v855_v37 = vadd.f32 %v853_v34, %v7353_v21 }
 0x52d   :  { %861 = vmax.xlane.f32.xlu1 %v860_v36 }
 0x52e   :  { %v857_v38 = vsel %vm286_vm2, %v855_v37, -inf }
 0x52f   :  { %858 = vmax.xlane.f32.xlu0 %v857_v38  ;;  %v6589_v39 = vpop.f32.mrf.mxu0 }
 0x530   :  { %v1141_v58 = vmul.f32 0.35355338, %v6589_v39 }
 0x531   :  { %v1131_v40 = vpop.f32.mrf.mxu0 }
 0x532   :  { %v1140_v41 = vmul.f32 0.35355338, %v1131_v40  ;;  %v1143_v61 = vadd.f32 %v1141_v58, %v7348_v18 }
 0x534   :  { %v1142_v42 = vadd.f32 %v1140_v41, %v7353_v21  ;;  %v1147_v62 = vsel %vm286_vm2, %v1143_v61, -inf }
 0x536   :  { %v1144_v43 = vsel %vm286_vm2, %v1142_v42, -inf }
 0x53e   :  { %881 = vrot.lane.b32.xlu1 %v7315_v8, %s8187_s24 }
 0x562   :  { %1145 = vmax.xlane.f32.xlu1 %v1144_v43 }
 0x5b6   :  { %v862_v44 = vpop.xlane.xlu1 %861 }
 0x5b7   :  { %v864_v45 = vsub.f32 %v856_v35, %v862_v44 }
 0x5b8   :  { %v859_v46 = vpop.xlane.xlu0 %858 }
 0x5b9   :  { %v867_v47 = vmul.f32 1.442695, %v864_v45  ;;  %v863_v48 = vsub.f32 %v855_v37, %v859_v46  ;;  %v1394_v37 = vld [vmem:[%s8160_s9 + $0x18] sm:$0xff] }
 0x5ba   :  { %v882_v49 = vpop.permute.xlu1 %881  ;;  %6602 = vmatprep.subr.mxu0 %v1394_v37 }
 0x5bb   :  { %6986 = vpow2.f32 %v867_v47  ;;  %v865_v50 = vmul.f32 1.442695, %v863_v48  ;;  %6571 = vmatprep.subr.mxu1 %v882_v49  ;;  %6603 = vmatpush3.msra.mxu0 %v1394_v37  ;;  %v1393_v47 = vld [vmem:[%s8160_s9 + $0x10] sm:$0xff]  ;;  %v1392_v48 = vld [vmem:[%s8160_s9 + $0x8] sm:$0xff] }
 0x5bc   :  { %6572 = vmatpush3.msra.mxu1 %v882_v49  ;;  %6604 = vmatprep.subr.mxu0 %v1393_v47 }
 0x5bd   :  { %6988 = vpow2.f32 %v865_v50  ;;  %6605 = vmatpush3.msra.mxu0 %v1393_v47 }
 0x5be   :  { %6606 = vmatprep.subr.mxu0 %v1392_v48 }
 0x5bf   :  { %6607 = vmatpush3.msra.mxu0 %v1392_v48 }
 0x5c8   :  { %v6987_v51 = vpop.eup %6986 }
 0x5c9   :  { %v872_v52 = vsel %vm286_vm2, %v6987_v51, 0.0 }
 0x5ca   :  { %v6989_v53 = vpop.eup %6988  ;;  %873 = vadd.xlane.f32.xlu0 %v872_v52 }
 0x5cb   :  { %v869_v54 = vsel %vm286_vm2, %v6989_v53, 0.0 }
 0x5ce   :  { %870 = vadd.xlane.f32.xlu0 %v869_v54 }
 0x5e4   :  { %879 = vrot.lane.b32.xlu0 %v7317_v10, %s8187_s24  ;;  %s8224_s24 = sld [smem:[#allocation6_spill]] }
 0x5eb   :  { %v1146_v55 = vpop.xlane.xlu1 %1145 }
 0x5ec   :  { %v1150_v56 = vsub.f32 %v1142_v42, %v1146_v55 }
 0x5ee   :  { %v1152_v57 = vmul.f32 1.442695, %v1150_v56 }
 0x5f0   :  { %6990 = vpow2.f32 %v1152_v57 }
 0x5fd   :  { %v6991_v59 = vpop.eup %6990 }
 0x5fe   :  { %v1156_v60 = vsel %vm286_vm2, %v6991_v59, 0.0 }
 0x5ff   :  { %1157 = vadd.xlane.f32.xlu1 %v1156_v60  ;;  %v6088_v60 = vld [vmem:[%s8161_s10] ss:$0 sm:$0xff] }
 0x603   :  { %1148 = vmax.xlane.f32.xlu0 %v1147_v62 }
 0x610   :  { %1168 = vrot.lane.b32.xlu1 %v7315_v8, %s8185_s29 }
 0x653   :  { %v874_v63 = vpop.xlane.xlu0 %873 }
 0x654   :  { %6992 = vrcp.f32 %v874_v63 }
 0x657   :  { %v871_v0 = vpop.xlane.xlu0 %870 }
 0x658   :  { %6994 = vrcp.f32 %v871_v0 }
 0x65b   :  { %v880_v1 = vpop.permute.xlu0 %879 }
 0x65c   :  { %6573 = vmatprep.subr.mxu1 %v880_v1 }
 0x65d   :  { %6574 = vmatpush3.msra.mxu1 %v880_v1 }
 0x65e   :  { %6578 = vmatprep.subr.mxu1 %v101_v3 }
 0x661   :  { %v6993_v4 = vpop.eup %6992 }
 0x662   :  { %v878_v9 = vmul.f32 %v6993_v4, %v6987_v51 }
 0x665   :  { %v6995_v6 = vpop.eup %6994 }
 0x666   :  { %v877_v7 = vmul.f32 %v6995_v6, %v6989_v53 }
 0x668   :  { %6575 = vmatprep.mubr.msk.f32.mxu1 %vm286_vm2, %v877_v7 }
 0x669   :  { %6576 = vmatmul.mubr.msk.f32.vlgmr.msra.gmra.mxu1 %vm286_vm2, %v878_v9  ;;  %v91_v9 = vld [vmem:[%s8224_s24 + $0x8] sm:$0xff] }
 0x66a   :  { %6579 = vmatpush3.msra.mxu1 %v101_v3 }
 0x688   :  { %v1158_v8 = vpop.xlane.xlu1 %1157 }
 0x68c   :  { %v1169_v11 = vpop.permute.xlu1 %1168  ;;  %v1149_v12 = vpop.xlane.xlu0 %1148 }
 0x68d   :  { %v1151_v13 = vsub.f32 %v1143_v61, %v1149_v12  ;;  %6590 = vmatprep.subr.mxu1 %v1169_v11 }
 0x68f   :  { %v1154_v14 = vmul.f32 1.442695, %v1151_v13 }
 0x691   :  { %6996 = vpow2.f32 %v1154_v14 }
 0x692   :  { %6998 = vrcp.f32 %v1158_v8 }
 0x69e   :  { %v6997_v15 = vpop.eup %6996 }
 0x69f   :  { %v1159_v16 = vsel %vm286_vm2, %v6997_v15, 0.0  ;;  %v6999_v19 = vpop.eup %6998 }
 0x6a0   :  { %1160 = vadd.xlane.f32.xlu0 %v1159_v16  ;;  %v1164_v24 = vmul.f32 %v6999_v19, %v6991_v59  ;;  %v90_v59 = vld [vmem:[%s8224_s24] sm:$0xff] }
 0x6a1   :  { %v6087_v16 = vld [vmem:[%s8159_s8] ss:$0 sm:$0xff] }
 0x6b6   :  { %1166 = vrot.lane.b32.xlu0 %v7317_v10, %s8185_s29  ;;  %s8229_s29 = smov 72  }
 0x729   :  { %v6577_v20 = vpop.f32.mrf.mxu1  ;;  %v1161_v22 = vpop.xlane.xlu0 %1160 }
 0x72a   :  { %7000 = vrcp.f32 %v1161_v22 }
 0x72b   :  { %v957_v23 = vpop.f32.mrf.mxu1 }
 0x72c   :  { %6580 = vmatprep.mubr.msk.f32.mxu1 %vm198_vm1, %v957_v23 }
 0x72d   :  { %6581 = vmatmul.mubr.msk.f32.vlgmr.msra.gmra.mxu1 %vm198_vm1, %v6577_v20  ;;  %v1167_v25 = vpop.permute.xlu0 %1166 }
 0x72e   :  { %6591 = vmatpush3.msra.mxu1 %v1169_v11  ;;  %6594 = vmatprep.mubr.msk.f32.mxu1 %vm286_vm2, %v1164_v24  ;;  %v6086_v11 = vld [vmem:[%s8225_s3] ss:$0 sm:$0xff] }
 0x72f   :  { %6592 = vmatprep.subr.mxu1 %v1167_v25 }
 0x730   :  { %6593 = vmatpush3.msra.mxu1 %v1167_v25 }
 0x731   :  { %6597 = vmatprep.subr.mxu1 %v102_v27 }
 0x737   :  { %v7001_v26 = vpop.eup %7000 }
 0x738   :  { %v1165_v10 = vmul.f32 %v7001_v26, %v6997_v15 }
 0x73a   :  { %6595 = vmatmul.mubr.msk.f32.vlgmr.msra.gmra.mxu1 %vm286_vm2, %v1165_v10 }
 0x73b   :  { %6598 = vmatpush3.msra.mxu1 %v102_v27 }
 0x7ed   :  { %v6582_v28 = vpop.f32.mrf.mxu1 }
 0x7ee   :  { %v1048_v32 = vadd.f32 %v6582_v28, %v7417_v29 }
 0x7ef   :  { %v1038_v33 = vpop.f32.mrf.mxu1 }
 0x7f0   :  { %v1047_v34 = vadd.f32 %v1038_v33, %v754_v31 }
 0x7fa   :  { %v6596_v35 = vpop.f32.mrf.mxu1 }
 0x7fc   :  { %v1244_v36 = vpop.f32.mrf.mxu1 }
 0x7fd   :  { %6599 = vmatprep.mubr.msk.f32.mxu1 %vm198_vm1, %v1244_v36 }
 0x7fe   :  { %6600 = vmatmul.mubr.msk.f32.vlgmr.msra.gmra.mxu1 %vm198_vm1, %v6596_v35 }
 0x7ff   :  { %6621 = vmatprep.mubr.msk.f32.mxu1 %vm110_vm0, %v90_v59 }
 0x8be   :  { %v6601_v38 = vpop.f32.mrf.mxu1 }
 0x8bf   :  { %v1335_v29 = vadd.f32 %v6601_v38, %v1048_v32 }
 0x8c0   :  { %v1325_v39 = vpop.f32.mrf.mxu1 }
 0x8c1   :  { %v1343_v40 = vadd.f32 %v6085_v30, %v1335_v29  ;;  %v1334_v41 = vadd.f32 %v1325_v39, %v1047_v34 }
 0x8c3   :  { %v1342_v42 = vadd.f32 %v6085_v30, %v1334_v41  ;;  %v1345_v43 = vadd.f32 %v1343_v40, %v7308_v5 }
 0x8c5   :  { %v1351_v44 = vsel %vm110_vm0, %v1345_v43, 0.0  ;;  %v1344_v45 = vadd.f32 %v1342_v42, %v7295_v2  ;;  %v1391_v2 = vld [vmem:[%s8160_s9] sm:$0xff] }
 0x8c6   :  { %1352 = vadd.xlane.f32.xlu0 %v1351_v44  ;;  %6608 = vmatprep.subr.mxu0 %v1391_v2 }
 0x8c7   :  { %v1348_v46 = vsel %vm110_vm0, %v1344_v45, 0.0  ;;  %6609 = vmatpush3.msra.mxu0 %v1391_v2 }
 0x8c8   :  { %1349 = vadd.xlane.f32.xlu1 %v1348_v46 }
 0x8d9   :  { %1498 = vrot.lane.b32.xlu1 %v1394_v37, %s8203_s7 }
 0x8dd   :  { %1494 = vrot.lane.b32.xlu1 %v1392_v48, %s8203_s7 }
 0x94f   :  { %v1353_v5 = vpop.xlane.xlu0 %1352 }
 0x950   :  { %v1356_v49 = vmul.f32 0.03125, %v1353_v5 }
 0x951   :  { %v1350_v50 = vpop.xlane.xlu1 %1349 }
 0x952   :  { %v1358_v51 = vsub.f32 %v1345_v43, %v1356_v49  ;;  %v1355_v52 = vmul.f32 0.03125, %v1350_v50 }
 0x954   :  { %v1357_v53 = vsub.f32 %v1344_v45, %v1355_v52  ;;  %v1360_v54 = vmul.f32 %v1358_v51, %v1358_v51 }
 0x955   :  { %v1499_v55 = vpop.permute.xlu1 %1498 }
 0x956   :  { %v1364_v56 = vsel %vm110_vm0, %v1360_v54, 0.0  ;;  %v1359_v57 = vmul.f32 %v1357_v53, %v1357_v53  ;;  %6613 = vmatprep.subr.mxu1 %v1499_v55 }
 0x957   :  { %1365 = vadd.xlane.f32.xlu0 %v1364_v56  ;;  %6614 = vmatpush3.msra.mxu1 %v1499_v55 }
 0x958   :  { %v1361_v58 = vsel %vm110_vm0, %v1359_v57, 0.0 }
 0x959   :  { %1362 = vadd.xlane.f32.xlu1 %v1361_v58  ;;  %v1495_v61 = vpop.permute.xlu1 %1494  ;;  %v1396_v58 = vld [vmem:[%s8162_s11] sm:$0xff] }
 0x96a   :  { %1492 = vrot.lane.b32.xlu1 %v1391_v2, %s8203_s7 }
 0x96d   :  { %1496 = vrot.lane.b32.xlu0 %v1393_v47, %s8203_s7 }
 0x971   :  { %1504 = vrot.lane.b32.xlu0 %v6088_v60, %s8203_s7 }
 0x9e0   :  { %v1366_v62 = vpop.xlane.xlu0 %1365 }
 0x9e1   :  { %v1368_v63 = vmul.f32 0.03125, %v1366_v62 }
 0x9e2   :  { %v1363_v0 = vpop.xlane.xlu1 %1362 }
 0x9e3   :  { %v1370_v1 = vadd.f32 1e-05, %v1368_v63  ;;  %v1367_v3 = vmul.f32 0.03125, %v1363_v0 }
 0x9e4   :  { %v1497_v4 = vpop.permute.xlu0 %1496 }
 0x9e5   :  { %7002 = vrsqrt.f32 %v1370_v1  ;;  %v1369_v6 = vadd.f32 1e-05, %v1367_v3  ;;  %6615 = vmatprep.subr.mxu1 %v1497_v4 }
 0x9e6   :  { %6616 = vmatpush3.msra.mxu1 %v1497_v4  ;;  %v1493_v7 = vpop.permute.xlu1 %1492 }
 0x9e7   :  { %7004 = vrsqrt.f32 %v1369_v6  ;;  %6617 = vmatprep.subr.mxu1 %v1495_v61 }
 0x9e8   :  { %6618 = vmatpush3.msra.mxu1 %v1495_v61  ;;  %v1505_v22 = vpop.permute.xlu0 %1504 }
 0x9e9   :  { %6619 = vmatprep.subr.mxu1 %v1493_v7 }
 0x9ea   :  { %6620 = vmatpush3.msra.mxu1 %v1493_v7 }
 0x9eb   :  { %6622 = vmatmul.mubr.msk.f32.vlgmr.msra.gmra.mxu1 %vm110_vm0, %v91_v9 }
 0x9f2   :  { %v7003_v8 = vpop.eup %7002 }
 0x9f3   :  { %v1374_v12 = vmul.f32 %v7003_v8, %v1358_v51 }
 0x9f4   :  { %v7005_v13 = vpop.eup %7004 }
 0x9f5   :  { %v1373_v14 = vmul.f32 %v7005_v13, %v1357_v53  ;;  %v1382_v15 = vmul.f32 %v6086_v11, %v1374_v12 }
 0x9f7   :  { %v1381_v17 = vmul.f32 %v6086_v11, %v1373_v14  ;;  %v7502_v20 = vadd.f32 %v6087_v16, %v1382_v15 }
 0x9f9   :  { %v7500_v19 = vadd.f32 %v6087_v16, %v1381_v17 }
 0x9fb   :  { %6610 = vmatprep.mubr.msk.f32.mxu0 %vm110_vm0, %v7500_v19 }
 0x9fc   :  { %6611 = vmatmul.mubr.msk.f32.vlgmr.msra.gmra.mxu0 %vm110_vm0, %v7502_v20 }
 0xaab   :  { %v6623_v23 = vpop.f32.mrf.mxu1 }
 0xaac   :  { %v7508_v24 = vadd.f32 %v6623_v23, %v1505_v22 }
 0xaad   :  { %v1579_v25 = vpop.f32.mrf.mxu1 }
 0xaae   :  { %6624 = vmatprep.subr.msk.mxu0 %vm198_vm1, %v7508_v24  ;;  %v7512_v26 = vadd.f32 %v1579_v25, %v1505_v22 }
 0xaaf   :  { %6625 = vmatpush3.xpose.msk.msra.mxu0 %vm198_vm1, %v7508_v24 }
 0xab0   :  { %6626 = vmatprep.subr.msk.mxu0 %vm198_vm1, %v7512_v26 }
 0xab3   :  { %6627 = vmatpush3.xpose.msk.msra.mxu0 %vm198_vm1, %v7512_v26 }
 0xabc   :  { %v6612_v10 = vpop.f32.mrf.mxu0 }
 0xabd   :  { %v7522_v31 = vadd.f32 %v6612_v10, %v6088_v60 }
 0xabe   :  { %v1479_v27 = vpop.f32.mrf.mxu0 }
 0xabf   :  { %v7520_v28 = vadd.f32 %v6088_v60, %v1479_v27  ;;  %v1397_v27 = vld [vmem:[%s8162_s11 + $0x8] sm:$0xff] }
 0xac1   :  { %6628 = vmatprep.mubr.msk.f32.mxu0 %vm198_vm1, %v7520_v28 }
 0xac2   :  { %6629 = vmatmul.mubr.msk.f32.vlgmr.msra.gmra.mxu0 %vm198_vm1, %v7522_v31 }
 0xb82   :  { %v6630_v32 = vpop.f32.mrf.mxu0 }
 0xb83   :  { %v1676_v33 = vmul.f32 0.35355338, %v6630_v32 }
 0xb84   :  { %v1666_v34 = vpop.f32.mrf.mxu0 }
 0xb85   :  { %v1675_v35 = vmul.f32 0.35355338, %v1666_v34  ;;  %v1678_v36 = vadd.f32 %v1676_v33, %v7348_v18 }
 0xb87   :  { %v1682_v37 = vsel %vm286_vm2, %v1678_v36, -inf  ;;  %v1677_v30 = vadd.f32 %v1675_v35, %v7353_v21 }
 0xb88   :  { %1683 = vmax.xlane.f32.xlu0 %v1682_v37 }
 0xb89   :  { %v1679_v38 = vsel %vm286_vm2, %v1677_v30, -inf }
 0xb8a   :  { %1680 = vmax.xlane.f32.xlu1 %v1679_v38 }
 0xc11   :  { %v1684_v29 = vpop.xlane.xlu0 %1683 }
 0xc12   :  { %v1686_v39 = vsub.f32 %v1678_v36, %v1684_v29 }
 0xc13   :  { %v1681_v40 = vpop.xlane.xlu1 %1680 }
 0xc14   :  { %v1689_v41 = vmul.f32 1.442695, %v1686_v39  ;;  %v1685_v42 = vsub.f32 %v1677_v30, %v1681_v40 }
 0xc16   :  { %7006 = vpow2.f32 %v1689_v41  ;;  %v1687_v43 = vmul.f32 1.442695, %v1685_v42 }
 0xc18   :  { %7008 = vpow2.f32 %v1687_v43 }
 0xc23   :  { %v7007_v44 = vpop.eup %7006 }
 0xc24   :  { %v1694_v45 = vsel %vm286_vm2, %v7007_v44, 0.0 }
 0xc25   :  { %v7009_v46 = vpop.eup %7008  ;;  %1695 = vadd.xlane.f32.xlu1 %v1694_v45 }
 0xc26   :  { %v1691_v47 = vsel %vm286_vm2, %v7009_v46, 0.0 }
 0xc27   :  { %1692 = vadd.xlane.f32.xlu0 %v1691_v47 }
 0xc36   :  { %1701 = vrot.lane.b32.xlu1 %v7512_v26, %s8203_s7 }
 0xc3a   :  { %1794 = vrot.lane.b32.xlu1 %v7508_v24, %s8199_s28 }
 0xc3d   :  { %1703 = vrot.lane.b32.xlu0 %v7508_v24, %s8203_s7  ;;  %s8230_s7 = smov 96  }
 0xc3e   :  { %1788 = vrot.lane.b32.xlu1 %v7520_v28, %s8199_s28 }
 0xc41   :  { %1792 = vrot.lane.b32.xlu0 %v7512_v26, %s8199_s28 }
 0xc45   :  { %1790 = vrot.lane.b32.xlu0 %v7522_v31, %s8199_s28  ;;  %s8231_s28 = smov 64  }
 0xcae   :  { %v1696_v48 = vpop.xlane.xlu1 %1695 }
 0xcaf   :  { %7010 = vrcp.f32 %v1696_v48 }
 0xcb0   :  { %v1693_v2 = vpop.xlane.xlu0 %1692 }
 0xcb1   :  { %7012 = vrcp.f32 %v1693_v2 }
 0xcb2   :  { %v1702_v5 = vpop.permute.xlu1 %1701 }
 0xcb4   :  { %v1704_v49 = vpop.permute.xlu0 %1703 }
 0xcb5   :  { %6631 = vmatprep.subr.mxu1 %v1704_v49 }
 0xcb6   :  { %6632 = vmatpush3.msra.mxu1 %v1704_v49  ;;  %v1795_v50 = vpop.permute.xlu1 %1794 }
 0xcb7   :  { %6633 = vmatprep.subr.mxu1 %v1702_v5 }
 0xcb8   :  { %6634 = vmatpush3.msra.mxu1 %v1702_v5  ;;  %v1793_v56 = vpop.permute.xlu0 %1792 }
 0xcb9   :  { %6638 = vmatprep.subr.msk.mxu1 %vm198_vm1, %v1795_v50 }
 0xcba   :  { %v1789_v55 = vpop.permute.xlu1 %1788 }
 0xcbc   :  { %v7011_v51 = vpop.eup %7010  ;;  %v1791_v57 = vpop.permute.xlu0 %1790 }
 0xcbd   :  { %v1700_v54 = vmul.f32 %v7011_v51, %v7007_v44 }
 0xcbe   :  { %v7013_v52 = vpop.eup %7012 }
 0xcbf   :  { %v1699_v53 = vmul.f32 %v7013_v52, %v7009_v46 }
 0xcc1   :  { %6635 = vmatprep.mubr.msk.f32.mxu1 %vm286_vm2, %v1699_v53 }
 0xcc2   :  { %6636 = vmatmul.mubr.msk.f32.vlgmr.msra.gmra.mxu1 %vm286_vm2, %v1700_v54 }
 0xcc3   :  { %6639 = vmatpush3.xpose.msk.msra.mxu1 %vm198_vm1, %v1795_v50  ;;  %6642 = vmatprep.mubr.msk.f32.mxu1 %vm198_vm1, %v1789_v55 }
 0xcc4   :  { %6640 = vmatprep.subr.msk.mxu1 %vm198_vm1, %v1793_v56 }
 0xcc7   :  { %6641 = vmatpush3.xpose.msk.msra.mxu1 %vm198_vm1, %v1793_v56 }
 0xcc8   :  { %6657 = vmatprep.subr.mxu1 %v1396_v58 }
 0xcca   :  { %6643 = vmatmul.mubr.msk.f32.vlgmr.msra.gmra.mxu1 %vm198_vm1, %v1791_v57 }
 0xccb   :  { %6658 = vmatpush3.msra.mxu1 %v1396_v58 }
 0xd82   :  { %v6637_v59 = vpop.f32.mrf.mxu1 }
 0xd84   :  { %v1779_v60 = vpop.f32.mrf.mxu1 }
 0xd85   :  { %6659 = vmatprep.mubr.msk.f32.mxu1 %vm198_vm1, %v1779_v60 }
 0xd86   :  { %6660 = vmatmul.mubr.msk.f32.vlgmr.msra.gmra.mxu1 %vm198_vm1, %v6637_v59 }
 0xd8a   :  { %v6644_v61 = vpop.f32.mrf.mxu1 }
 0xd8b   :  { %v1880_v62 = vmul.f32 0.35355338, %v6644_v61 }
 0xd8c   :  { %v1870_v63 = vpop.f32.mrf.mxu1 }
 0xd8d   :  { %v1879_v0 = vmul.f32 0.35355338, %v1870_v63  ;;  %v1882_v1 = vadd.f32 %v1880_v62, %v7348_v18 }
 0xd8f   :  { %v1886_v3 = vsel %vm286_vm2, %v1882_v1, -inf  ;;  %v1881_v4 = vadd.f32 %v1879_v0, %v7353_v21 }
 0xd90   :  { %1887 = vmax.xlane.f32.xlu0 %v1886_v3 }
 0xd91   :  { %v1883_v6 = vsel %vm286_vm2, %v1881_v4, -inf }
 0xd92   :  { %1884 = vmax.xlane.f32.xlu1 %v1883_v6 }
 0xe19   :  { %v1888_v7 = vpop.xlane.xlu0 %1887 }
 0xe1a   :  { %v1890_v9 = vsub.f32 %v1882_v1, %v1888_v7 }
 0xe1b   :  { %v1885_v8 = vpop.xlane.xlu1 %1884 }
 0xe1c   :  { %v1893_v11 = vmul.f32 1.442695, %v1890_v9  ;;  %v1889_v12 = vsub.f32 %v1881_v4, %v1885_v8 }
 0xe1e   :  { %7014 = vpow2.f32 %v1893_v11  ;;  %v1891_v13 = vmul.f32 1.442695, %v1889_v12 }
 0xe20   :  { %7016 = vpow2.f32 %v1891_v13 }
 0xe2b   :  { %v7015_v14 = vpop.eup %7014 }
 0xe2c   :  { %v1898_v15 = vsel %vm286_vm2, %v7015_v14, 0.0 }
 0xe2d   :  { %v7017_v16 = vpop.eup %7016  ;;  %1899 = vadd.xlane.f32.xlu1 %v1898_v15 }
 0xe2e   :  { %v1895_v17 = vsel %vm286_vm2, %v7017_v16, 0.0 }
 0xe2f   :  { %1896 = vadd.xlane.f32.xlu0 %v1895_v17 }
 0xe3e   :  { %1905 = vrot.lane.b32.xlu1 %v7512_v26, %s8201_s6 }
 0xe42   :  { %2160 = vrot.lane.b32.xlu1 %v7508_v24, %s8226_s21 }
 0xe45   :  { %1907 = vrot.lane.b32.xlu0 %v7508_v24, %s8201_s6  ;;  %s8235_s6 = smov 48  }
 0xe46   :  { %2154 = vrot.lane.b32.xlu1 %v7520_v28, %s8226_s21 }
 0xe49   :  { %2158 = vrot.lane.b32.xlu0 %v7512_v26, %s8226_s21 }
 0xe4a   :  { %2447 = vrot.lane.b32.xlu1 %v7508_v24, %s8227_s25 }
 0xe4d   :  { %2156 = vrot.lane.b32.xlu0 %v7522_v31, %s8226_s21 }
 0xe4e   :  { %2441 = vrot.lane.b32.xlu1 %v7520_v28, %s8227_s25 }
 0xe51   :  { %2445 = vrot.lane.b32.xlu0 %v7512_v26, %s8227_s25 }
 0xe55   :  { %2443 = vrot.lane.b32.xlu0 %v7522_v31, %s8227_s25 }
 0xeb6   :  { %v1900_v22 = vpop.xlane.xlu1 %1899 }
 0xeb7   :  { %7018 = vrcp.f32 %v1900_v22 }
 0xeb8   :  { %v1897_v23 = vpop.xlane.xlu0 %1896 }
 0xeb9   :  { %7020 = vrcp.f32 %v1897_v23 }
 0xeba   :  { %v1906_v10 = vpop.permute.xlu1 %1905 }
 0xebc   :  { %v1908_v25 = vpop.permute.xlu0 %1907 }
 0xebd   :  { %6645 = vmatprep.subr.mxu0 %v1908_v25 }
 0xebe   :  { %6646 = vmatpush3.msra.mxu0 %v1908_v25  ;;  %v2161_v31 = vpop.permute.xlu1 %2160 }
 0xebf   :  { %6647 = vmatprep.subr.mxu0 %v1906_v10 }
 0xec0   :  { %6648 = vmatpush3.msra.mxu0 %v1906_v10  ;;  %v2159_v37 = vpop.permute.xlu0 %2158 }
 0xec1   :  { %6652 = vmatprep.subr.mxu0 %v1397_v27 }
 0xec2   :  { %v2155_v35 = vpop.permute.xlu1 %2154 }
 0xec4   :  { %v7019_v28 = vpop.eup %7018  ;;  %v2157_v29 = vpop.permute.xlu0 %2156 }
 0xec5   :  { %v1904_v34 = vmul.f32 %v7019_v28, %v7015_v14  ;;  %v1398_v28 = vld [vmem:[%s8162_s11 + $0x10] sm:$0xff] }
 0xec6   :  { %v7021_v32 = vpop.eup %7020  ;;  %v2448_v38 = vpop.permute.xlu1 %2447 }
 0xec7   :  { %v1903_v33 = vmul.f32 %v7021_v32, %v7017_v16  ;;  %v6661_v32 = vpop.f32.mrf.mxu1 }
 0xec8   :  { %v2446_v40 = vpop.permute.xlu0 %2445 }
 0xec9   :  { %6649 = vmatprep.mubr.msk.f32.mxu0 %vm286_vm2, %v1903_v33  ;;  %v2145_v33 = vpop.f32.mrf.mxu1 }
 0xeca   :  { %6650 = vmatmul.mubr.msk.f32.vlgmr.msra.gmra.mxu0 %vm286_vm2, %v1904_v34  ;;  %v2442_v39 = vpop.permute.xlu1 %2441 }
 0xecb   :  { %6653 = vmatpush3.msra.mxu0 %v1397_v27 }
 0xecc   :  { %6662 = vmatprep.subr.msk.mxu0 %vm198_vm1, %v2161_v31  ;;  %v2444_v41 = vpop.permute.xlu0 %2443 }
 0xf8a   :  { %v6651_v36 = vpop.f32.mrf.mxu0 }
 0xf8c   :  { %v1983_v30 = vpop.f32.mrf.mxu0 }
 0xf8d   :  { %6654 = vmatprep.mubr.msk.f32.mxu0 %vm198_vm1, %v1983_v30 }
 0xf8e   :  { %6655 = vmatmul.mubr.msk.f32.vlgmr.msra.gmra.mxu0 %vm198_vm1, %v6651_v36 }
 0xf8f   :  { %6663 = vmatpush3.xpose.msk.msra.mxu0 %vm198_vm1, %v2161_v31  ;;  %6666 = vmatprep.mubr.msk.f32.mxu0 %vm198_vm1, %v2155_v35 }
 0xf90   :  { %6664 = vmatprep.subr.msk.mxu0 %vm198_vm1, %v2159_v37 }
 0xf93   :  { %6665 = vmatpush3.xpose.msk.msra.mxu0 %vm198_vm1, %v2159_v37 }
 0xf94   :  { %6681 = vmatprep.subr.msk.mxu0 %vm198_vm1, %v2448_v38 }
 0xf96   :  { %6667 = vmatmul.mubr.msk.f32.vlgmr.msra.gmra.mxu0 %vm198_vm1, %v2157_v29 }
 0xf97   :  { %6682 = vmatpush3.xpose.msk.msra.mxu0 %vm198_vm1, %v2448_v38  ;;  %6685 = vmatprep.mubr.msk.f32.mxu0 %vm198_vm1, %v2442_v39  ;;  %v1399_v39 = vld [vmem:[%s8162_s11 + $0x18] sm:$0xff] }
 0xf98   :  { %6683 = vmatprep.subr.msk.mxu0 %vm198_vm1, %v2446_v40 }
 0xf9b   :  { %6684 = vmatpush3.xpose.msk.msra.mxu0 %vm198_vm1, %v2446_v40 }
 0xf9e   :  { %6686 = vmatmul.mubr.msk.f32.vlgmr.msra.gmra.mxu0 %vm198_vm1, %v2444_v41 }
0x104e   :  { %v7604_v42 = vpop.f32.mrf.mxu0 }
0x104f   :  { %v2151_v40 = vadd.f32 %v6661_v32, %v7604_v42 }
0x1050   :  { %v7606_v43 = vpop.f32.mrf.mxu0 }
0x1056   :  { %v6668_v44 = vpop.f32.mrf.mxu0 }
0x1057   :  { %v2246_v45 = vmul.f32 0.35355338, %v6668_v44  ;;  %v2146_v44 = vadd.f32 %v2145_v33, %v7606_v43 }
0x1058   :  { %v2236_v46 = vpop.f32.mrf.mxu0 }
0x1059   :  { %v2245_v47 = vmul.f32 0.35355338, %v2236_v46  ;;  %v2248_v48 = vadd.f32 %v2246_v45, %v7348_v18 }
0x105b   :  { %v2252_v2 = vsel %vm286_vm2, %v2248_v48, -inf  ;;  %v2247_v5 = vadd.f32 %v2245_v47, %v7353_v21 }
0x105c   :  { %2253 = vmax.xlane.f32.xlu0 %v2252_v2 }
0x105d   :  { %v2249_v49 = vsel %vm286_vm2, %v2247_v5, -inf }
0x105e   :  { %2250 = vmax.xlane.f32.xlu1 %v2249_v49  ;;  %v6687_v60 = vpop.f32.mrf.mxu0 }
0x105f   :  { %v2533_v63 = vmul.f32 0.35355338, %v6687_v60 }
0x1060   :  { %v2523_v61 = vpop.f32.mrf.mxu0 }
0x1061   :  { %v2532_v62 = vmul.f32 0.35355338, %v2523_v61  ;;  %v2535_v1 = vadd.f32 %v2533_v63, %v7348_v18 }
0x1063   :  { %v2534_v0 = vadd.f32 %v2532_v62, %v7353_v21  ;;  %v2539_v4 = vsel %vm286_vm2, %v2535_v1, -inf }
0x1065   :  { %v2536_v3 = vsel %vm286_vm2, %v2534_v0, -inf }
0x10e5   :  { %v2254_v50 = vpop.xlane.xlu0 %2253 }
0x10e6   :  { %v2256_v51 = vsub.f32 %v2248_v48, %v2254_v50 }
0x10e7   :  { %v2251_v52 = vpop.xlane.xlu1 %2250 }
0x10e8   :  { %v2259_v53 = vmul.f32 1.442695, %v2256_v51  ;;  %v2255_v54 = vsub.f32 %v2247_v5, %v2251_v52  ;;  %v6125_v5 = vld [vmem:[%s8163_s12] ss:$0 sm:$0xff] }
0x10ea   :  { %7022 = vpow2.f32 %v2259_v53  ;;  %v2257_v55 = vmul.f32 1.442695, %v2255_v54 }
0x10ec   :  { %7024 = vpow2.f32 %v2257_v55 }
0x10f7   :  { %v7023_v56 = vpop.eup %7022 }
0x10f8   :  { %v2264_v57 = vsel %vm286_vm2, %v7023_v56, 0.0 }
0x10f9   :  { %v7025_v58 = vpop.eup %7024  ;;  %2265 = vadd.xlane.f32.xlu1 %v2264_v57 }
0x10fa   :  { %v2261_v59 = vsel %vm286_vm2, %v7025_v58, 0.0 }
0x10fb   :  { %2262 = vadd.xlane.f32.xlu0 %v2261_v59 }
0x110a   :  { %2271 = vrot.lane.b32.xlu1 %v7512_v26, %s8228_s5 }
0x1111   :  { %2273 = vrot.lane.b32.xlu0 %v7508_v24, %s8228_s5 }
0x112e   :  { %2537 = vmax.xlane.f32.xlu1 %v2536_v3  ;;  %v2784_v3 = vld [vmem:[%s8166_s15 + $0x10] sm:$0xff] }
0x1130   :  { %2540 = vmax.xlane.f32.xlu0 %v2539_v4  ;;  %v2783_v4 = vld [vmem:[%s8166_s15 + $0x8] sm:$0xff] }
0x1182   :  { %v2266_v6 = vpop.xlane.xlu1 %2265 }
0x1183   :  { %7026 = vrcp.f32 %v2266_v6  ;;  %v2782_v6 = vld [vmem:[%s8166_s15] sm:$0xff] }
0x1184   :  { %v2263_v7 = vpop.xlane.xlu0 %2262 }
0x1185   :  { %7028 = vrcp.f32 %v2263_v7  ;;  %v2794_v7 = vld [vmem:[%s8168_s17 + $0x38] sm:$0xff] }
0x1186   :  { %v2272_v8 = vpop.permute.xlu1 %2271 }
0x1188   :  { %v2274_v9 = vpop.permute.xlu0 %2273 }
0x1189   :  { %6669 = vmatprep.subr.mxu1 %v2274_v9 }
0x118a   :  { %6670 = vmatpush3.msra.mxu1 %v2274_v9  ;;  %v2793_v9 = vld [vmem:[%s8168_s17 + $0x30] sm:$0xff] }
0x118b   :  { %6671 = vmatprep.subr.mxu1 %v2272_v8 }
0x118c   :  { %6672 = vmatpush3.msra.mxu1 %v2272_v8  ;;  %v2792_v8 = vld [vmem:[%s8168_s17 + $0x28] sm:$0xff] }
0x118d   :  { %6676 = vmatprep.subr.mxu1 %v1398_v28 }
0x1190   :  { %v7027_v11 = vpop.eup %7026 }
0x1191   :  { %v2270_v18 = vmul.f32 %v7027_v11, %v7023_v56  ;;  %v2791_v11 = vld [vmem:[%s8168_s17 + $0x20] sm:$0xff] }
0x1192   :  { %v7029_v21 = vpop.eup %7028 }
0x1193   :  { %v2269_v12 = vmul.f32 %v7029_v21, %v7025_v58 }
0x1195   :  { %6673 = vmatprep.mubr.msk.f32.mxu1 %vm286_vm2, %v2269_v12 }
0x1196   :  { %6674 = vmatmul.mubr.msk.f32.vlgmr.msra.gmra.mxu1 %vm286_vm2, %v2270_v18 }
0x1197   :  { %6677 = vmatpush3.msra.mxu1 %v1398_v28 }
0x11b7   :  { %v2538_v13 = vpop.xlane.xlu1 %2537 }
0x11b8   :  { %v2542_v14 = vsub.f32 %v2534_v0, %v2538_v13 }
0x11b9   :  { %v2541_v15 = vpop.xlane.xlu0 %2540 }
0x11ba   :  { %v2544_v16 = vmul.f32 1.442695, %v2542_v14  ;;  %v2543_v17 = vsub.f32 %v2535_v1, %v2541_v15 }
0x11bc   :  { %7030 = vpow2.f32 %v2544_v16  ;;  %v2546_v22 = vmul.f32 1.442695, %v2543_v17  ;;  %v6126_v17 = vld [vmem:[%s8164_s13] ss:$0 sm:$0xff] }
0x11be   :  { %7032 = vpow2.f32 %v2546_v22 }
0x11c9   :  { %v7031_v23 = vpop.eup %7030 }
0x11ca   :  { %v2548_v25 = vsel %vm286_vm2, %v7031_v23, 0.0 }
0x11cb   :  { %v7033_v10 = vpop.eup %7032  ;;  %2549 = vadd.xlane.f32.xlu0 %v2548_v25 }
0x11cc   :  { %v2551_v27 = vsel %vm286_vm2, %v7033_v10, 0.0 }
0x11cd   :  { %2552 = vadd.xlane.f32.xlu1 %v2551_v27  ;;  %v6127_v27 = vld [vmem:[%s8165_s14] ss:$0 sm:$0xff] }
0x11de   :  { %2558 = vrot.lane.b32.xlu1 %v7512_v26, %s8229_s29 }
0x11e1   :  { %2560 = vrot.lane.b32.xlu0 %v7508_v24, %s8229_s29 }
0x1254   :  { %v2550_v34 = vpop.xlane.xlu0 %2549 }
0x1255   :  { %7034 = vrcp.f32 %v2550_v34  ;;  %v2790_v34 = vld [vmem:[%s8168_s17 + $0x18] sm:$0xff] }
0x1256   :  { %v6675_v31 = vpop.f32.mrf.mxu1  ;;  %v2553_v35 = vpop.xlane.xlu1 %2552 }
0x1257   :  { %7036 = vrcp.f32 %v2553_v35  ;;  %v2788_v35 = vld [vmem:[%s8168_s17 + $0x8] sm:$0xff] }
0x1258   :  { %v2349_v36 = vpop.f32.mrf.mxu1  ;;  %v2561_v37 = vpop.permute.xlu0 %2560 }
0x1259   :  { %6678 = vmatprep.mubr.msk.f32.mxu1 %vm198_vm1, %v2349_v36  ;;  %6688 = vmatprep.subr.mxu1 %v2561_v37  ;;  %v2787_v36 = vld [vmem:[%s8168_s17] sm:$0xff] }
0x125a   :  { %6679 = vmatmul.mubr.msk.f32.vlgmr.msra.gmra.mxu1 %vm198_vm1, %v6675_v31  ;;  %v2559_v30 = vpop.permute.xlu1 %2558  ;;  %v2789_v31 = vld [vmem:[%s8168_s17 + $0x10] sm:$0xff] }
0x125b   :  { %6689 = vmatpush3.msra.mxu1 %v2561_v37  ;;  %v6128_v37 = vld [vmem:[%s8167_s16] ss:$0 sm:$0xff] }
0x125c   :  { %6690 = vmatprep.subr.mxu1 %v2559_v30 }
0x125d   :  { %6691 = vmatpush3.msra.mxu1 %v2559_v30 }
0x125e   :  { %6695 = vmatprep.subr.mxu1 %v1399_v39 }
0x1262   :  { %v7035_v26 = vpop.eup %7034 }
0x1263   :  { %v2556_v24 = vmul.f32 %v7035_v26, %v7031_v23 }
0x1264   :  { %v7037_v38 = vpop.eup %7036 }
0x1265   :  { %6692 = vmatprep.mubr.msk.f32.mxu1 %vm286_vm2, %v2556_v24  ;;  %v2557_v29 = vmul.f32 %v7037_v38, %v7033_v10 }
0x1267   :  { %6693 = vmatmul.mubr.msk.f32.vlgmr.msra.gmra.mxu1 %vm286_vm2, %v2557_v29 }
0x1268   :  { %6696 = vmatpush3.msra.mxu1 %v1399_v39 }
0x1269   :  { %6711 = vmatprep.subr.mxu1 %v2794_v7 }
0x131a   :  { %v6680_v41 = vpop.f32.mrf.mxu1 }
0x131b   :  { %v2440_v45 = vadd.f32 %v6680_v41, %v2151_v40  ;;  %v6131_v40 = vld [vmem:[%s8169_s18] ss:$0 sm:$0xff] }
0x131c   :  { %v2430_v46 = vpop.f32.mrf.mxu1 }
0x131d   :  { %v2439_v47 = vadd.f32 %v2430_v46, %v2146_v44 }
0x1327   :  { %v6694_v48 = vpop.f32.mrf.mxu1 }
0x1329   :  { %v2636_v2 = vpop.f32.mrf.mxu1 }
0x132a   :  { %6697 = vmatprep.mubr.msk.f32.mxu1 %vm198_vm1, %v2636_v2 }
0x132b   :  { %6698 = vmatmul.mubr.msk.f32.vlgmr.msra.gmra.mxu1 %vm198_vm1, %v6694_v48 }
0x132c   :  { %6712 = vmatpush3.msra.mxu1 %v2794_v7 }
0x132d   :  { %6713 = vmatprep.subr.mxu1 %v2793_v9 }
0x132e   :  { %6714 = vmatpush3.msra.mxu1 %v2793_v9 }
0x132f   :  { %6715 = vmatprep.subr.mxu1 %v2792_v8 }
0x1330   :  { %6716 = vmatpush3.msra.mxu1 %v2792_v8  ;;  %v6135_v8 = vld [vmem:[%s8171_s20] ss:$0 sm:$0xff] }
0x1331   :  { %6717 = vmatprep.subr.mxu1 %v2791_v11 }
0x1332   :  { %6718 = vmatpush3.msra.mxu1 %v2791_v11 }
0x1333   :  { %6719 = vmatprep.subr.mxu1 %v2790_v34 }
0x1334   :  { %6720 = vmatpush3.msra.mxu1 %v2790_v34  ;;  %v7764_v34 = vld [vmem:[%s8221_s0] sm:$0xff] }
0x1335   :  { %6721 = vmatprep.subr.mxu1 %v2789_v31 }
0x1336   :  { %6722 = vmatpush3.msra.mxu1 %v2789_v31 }
0x1337   :  { %6723 = vmatprep.subr.mxu1 %v2788_v35 }
0x1338   :  { %6724 = vmatpush3.msra.mxu1 %v2788_v35 }
0x1339   :  { %6725 = vmatprep.subr.mxu1 %v2787_v36 }
0x133a   :  { %6726 = vmatpush3.msra.mxu1 %v2787_v36 }
0x13eb   :  { %v6699_v49 = vpop.f32.mrf.mxu1 }
0x13ec   :  { %v2727_v50 = vadd.f32 %v6699_v49, %v2440_v45 }
0x13ed   :  { %v2717_v51 = vpop.f32.mrf.mxu1 }
0x13ee   :  { %v2735_v42 = vadd.f32 %v6125_v5, %v2727_v50  ;;  %v2726_v52 = vadd.f32 %v2717_v51, %v2439_v47 }
0x13f0   :  { %v2734_v53 = vadd.f32 %v6125_v5, %v2726_v52  ;;  %v2737_v43 = vadd.f32 %v2735_v42, %v7502_v20 }
0x13f2   :  { %v2743_v54 = vsel %vm110_vm0, %v2737_v43, 0.0  ;;  %v2736_v55 = vadd.f32 %v2734_v53, %v7500_v19  ;;  %v2785_v19 = vld [vmem:[%s8166_s15 + $0x18] sm:$0xff] }
0x13f3   :  { %2744 = vadd.xlane.f32.xlu0 %v2743_v54  ;;  %6700 = vmatprep.subr.mxu0 %v2785_v19 }
0x13f4   :  { %v2740_v56 = vsel %vm110_vm0, %v2736_v55, 0.0  ;;  %6701 = vmatpush3.msra.mxu0 %v2785_v19 }
0x13f5   :  { %2741 = vadd.xlane.f32.xlu1 %v2740_v56  ;;  %6702 = vmatprep.subr.mxu0 %v2784_v3 }
0x13f6   :  { %6703 = vmatpush3.msra.mxu0 %v2784_v3  ;;  %v6134_v3 = vld [vmem:[%s8170_s19] ss:$0 sm:$0xff] }
0x13f7   :  { %6704 = vmatprep.subr.mxu0 %v2783_v4 }
0x13f8   :  { %6705 = vmatpush3.msra.mxu0 %v2783_v4 }
0x13f9   :  { %6706 = vmatprep.subr.mxu0 %v2782_v6 }
0x13fa   :  { %6707 = vmatpush3.msra.mxu0 %v2782_v6 }
0x147c   :  { %v2745_v57 = vpop.xlane.xlu0 %2744 }
0x147d   :  { %v2747_v58 = vmul.f32 0.03125, %v2745_v57  ;;  %v6139_v57 = vld [vmem:[%s8218_s27 + $0x38] sm:$0xff] }
0x147e   :  { %v2742_v59 = vpop.xlane.xlu1 %2741  ;;  %6730 = vmatprep.subr.mxu0 %v6139_v57 }
0x147f   :  { %v2749_v60 = vsub.f32 %v2737_v43, %v2747_v58  ;;  %v2746_v61 = vmul.f32 0.03125, %v2742_v59  ;;  %v6138_v58 = vld [vmem:[%s8218_s27 + $0x30] sm:$0xff]  ;;  %v6137_v59 = vld [vmem:[%s8218_s27 + $0x28] sm:$0xff] }
0x1481   :  { %v2748_v62 = vsub.f32 %v2736_v55, %v2746_v61  ;;  %v2751_v63 = vmul.f32 %v2749_v60, %v2749_v60 }
0x1483   :  { %v2755_v0 = vsel %vm110_vm0, %v2751_v63, 0.0  ;;  %v2750_v1 = vmul.f32 %v2748_v62, %v2748_v62 }
0x1484   :  { %2756 = vadd.xlane.f32.xlu1 %v2755_v0 }
0x1485   :  { %v2752_v20 = vsel %vm110_vm0, %v2750_v1, 0.0 }
0x1486   :  { %2753 = vadd.xlane.f32.xlu0 %v2752_v20 }
0x150d   :  { %v2757_v21 = vpop.xlane.xlu1 %2756 }
0x150e   :  { %v2759_v12 = vmul.f32 0.03125, %v2757_v21 }
0x150f   :  { %v2754_v18 = vpop.xlane.xlu0 %2753 }
0x1510   :  { %v2761_v13 = vadd.f32 1e-05, %v2759_v12  ;;  %v2758_v14 = vmul.f32 0.03125, %v2754_v18  ;;  %v6146_v18 = vld [vmem:[%s8220_s2 + $0x1] ss:$0 sm:$0xff]  ;;  %s8234_s2 = smov 56  }
0x1512   :  { %7038 = vrsqrt.f32 %v2761_v13  ;;  %v2760_v15 = vadd.f32 1e-05, %v2758_v14 }
0x1514   :  { %7040 = vrsqrt.f32 %v2760_v15 }
0x151f   :  { %v7039_v16 = vpop.eup %7038 }
0x1520   :  { %v2765_v22 = vmul.f32 %v7039_v16, %v2749_v60  ;;  %v6136_v60 = vld [vmem:[%s8218_s27 + $0x20] sm:$0xff]  ;;  %s8232_s27 = smov 88  }
0x1521   :  { %v7041_v23 = vpop.eup %7040 }
0x1522   :  { %v2764_v25 = vmul.f32 %v7041_v23, %v2748_v62  ;;  %v2773_v10 = vmul.f32 %v6126_v17, %v2765_v22 }
0x1524   :  { %v2772_v28 = vmul.f32 %v6126_v17, %v2764_v25  ;;  %v2781_v33 = vadd.f32 %v6127_v27, %v2773_v10 }
0x1526   :  { %v2780_v32 = vadd.f32 %v6127_v27, %v2772_v28  ;;  %v7757_v28 = vld [vmem:[%s8221_s0 + $0x8] sm:$0xff] }
0x1528   :  { %6708 = vmatprep.mubr.msk.f32.mxu0 %vm110_vm0, %v2780_v32 }
0x1529   :  { %6709 = vmatmul.mubr.msk.f32.vlgmr.msra.gmra.mxu0 %vm110_vm0, %v2781_v33 }
0x152a   :  { %6731 = vmatpush3.msra.mxu0 %v6139_v57 }
0x152b   :  { %6732 = vmatprep.subr.mxu0 %v6138_v58 }
0x152c   :  { %6733 = vmatpush3.msra.mxu0 %v6138_v58 }
0x152d   :  { %6734 = vmatprep.subr.mxu0 %v6137_v59 }
0x152e   :  { %6735 = vmatpush3.msra.mxu0 %v6137_v59 }
0x152f   :  { %6736 = vmatprep.subr.mxu0 %v6136_v60 }
0x1530   :  { %6737 = vmatpush3.msra.mxu0 %v6136_v60 }
0x15e9   :  { %v6710_v30 = vpop.f32.mrf.mxu0 }
0x15ea   :  { %v2880_v26 = vadd.f32 %v6710_v30, %v6128_v37 }
0x15eb   :  { %v2874_v24 = vpop.f32.mrf.mxu0 }
0x15ec   :  { %v2875_v38 = vadd.f32 %v6128_v37, %v2874_v24  ;;  %v2884_v39 = vmax.f32 %v2880_v26, 0.0 }
0x15ee   :  { %v2883_v29 = vmax.f32 %v2875_v38, 0.0 }
0x15f0   :  { %6727 = vmatprep.mubr.msk.f32.mxu1 %vm2891_vm3, %v2883_v29 }
0x15f1   :  { %6728 = vmatmul.mubr.msk.f32.vlgmr.msra.gmra.mxu1 %vm2891_vm3, %v2884_v39 }
0x16b1   :  { %v6729_v41 = vpop.f32.mrf.mxu1 }
0x16b2   :  { %v2970_v44 = vadd.f32 %v6729_v41, %v6131_v40 }
0x16b3   :  { %v2964_v45 = vpop.f32.mrf.mxu1 }
0x16b4   :  { %v2965_v46 = vadd.f32 %v6131_v40, %v2964_v45  ;;  %v2974_v47 = vadd.f32 %v2970_v44, %v2781_v33 }
0x16b6   :  { %v2980_v48 = vsel %vm110_vm0, %v2974_v47, 0.0  ;;  %v2973_v2 = vadd.f32 %v2965_v46, %v2780_v32 }
0x16b7   :  { %2981 = vadd.xlane.f32.xlu1 %v2980_v48 }
0x16b8   :  { %v2977_v5 = vsel %vm110_vm0, %v2973_v2, 0.0 }
0x16b9   :  { %2978 = vadd.xlane.f32.xlu0 %v2977_v5 }
0x1740   :  { %v2982_v49 = vpop.xlane.xlu1 %2981 }
0x1741   :  { %v2984_v50 = vmul.f32 0.03125, %v2982_v49 }
0x1742   :  { %v2979_v51 = vpop.xlane.xlu0 %2978 }
0x1743   :  { %v2986_v42 = vsub.f32 %v2974_v47, %v2984_v50  ;;  %v2983_v52 = vmul.f32 0.03125, %v2979_v51 }
0x1745   :  { %v2985_v53 = vsub.f32 %v2973_v2, %v2983_v52  ;;  %v2988_v43 = vmul.f32 %v2986_v42, %v2986_v42 }
0x1747   :  { %v2992_v54 = vsel %vm110_vm0, %v2988_v43, 0.0  ;;  %v2987_v55 = vmul.f32 %v2985_v53, %v2985_v53 }
0x1748   :  { %2993 = vadd.xlane.f32.xlu1 %v2992_v54 }
0x1749   :  { %v2989_v56 = vsel %vm110_vm0, %v2987_v55, 0.0 }
0x174a   :  { %2990 = vadd.xlane.f32.xlu0 %v2989_v56 }
0x17d1   :  { %v2994_v61 = vpop.xlane.xlu1 %2993 }
0x17d2   :  { %v2996_v62 = vmul.f32 0.03125, %v2994_v61 }
0x17d3   :  { %v2991_v63 = vpop.xlane.xlu0 %2990 }
0x17d4   :  { %v2998_v0 = vadd.f32 1e-05, %v2996_v62  ;;  %v2995_v1 = vmul.f32 0.03125, %v2991_v63 }
0x17d6   :  { %7042 = vrsqrt.f32 %v2998_v0  ;;  %v2997_v20 = vadd.f32 1e-05, %v2995_v1 }
0x17d8   :  { %7044 = vrsqrt.f32 %v2997_v20 }
0x17e3   :  { %v7043_v19 = vpop.eup %7042 }
0x17e4   :  { %v3002_v4 = vmul.f32 %v7043_v19, %v2986_v42 }
0x17e5   :  { %v7045_v6 = vpop.eup %7044 }
0x17e6   :  { %v3001_v7 = vmul.f32 %v7045_v6, %v2985_v53  ;;  %v3010_v9 = vmul.f32 %v6134_v3, %v3002_v4  ;;  %v6141_v53 = vld [vmem:[%s8222_s4 + $0x20] sm:$0xff] }
0x17e8   :  { %v3009_v11 = vmul.f32 %v6134_v3, %v3001_v7  ;;  %v7729_v12 = vadd.f32 %v6135_v8, %v3010_v9 }
0x17ea   :  { %v7727_v21 = vadd.f32 %v6135_v8, %v3009_v11 }
0x17ec   :  { %6738 = vmatprep.mubr.msk.f32.mxu0 %vm110_vm0, %v7727_v21 }
0x17ed   :  { %6739 = vmatmul.mubr.msk.f32.vlgmr.msra.gmra.mxu0 %vm110_vm0, %v7729_v12 }
0x18ad   :  { %v6740_v13 = vpop.f32.mrf.mxu0 }
0x18ae   :  { %v7738_v14 = vadd.f32 %v6740_v13, %v6146_v18 }
0x18af   :  { %v3111_v15 = vpop.f32.mrf.mxu0 }
0x18b0   :  { %v7740_v16 = vadd.f32 %v6146_v18, %v3111_v15  ;;  %3124 = vrot.lane.b32.xlu0 %v7738_v14, %s8230_s7  ;;  %v6142_v15 = vld [vmem:[%s8222_s4 + $0x28] sm:$0xff] }
0x18b2   :  { %3122 = vrot.lane.b32.xlu1 %v7740_v16, %s8230_s7  ;;  %6745 = vmatprep.mubr.msk.f32.mxu0 %vm198_vm1, %v7740_v16 }
0x1922   :  { %v3125_v17 = vpop.permute.xlu0 %3124 }
0x1923   :  { %6741 = vmatprep.subr.msk.mxu0 %vm198_vm1, %v3125_v17 }
0x1924   :  { %6742 = vmatpush3.xpose.msk.msra.mxu0 %vm198_vm1, %v3125_v17  ;;  %v3123_v22 = vpop.permute.xlu1 %3122 }
0x1925   :  { %6743 = vmatprep.subr.msk.mxu0 %vm198_vm1, %v3123_v22 }
0x1928   :  { %6744 = vmatpush3.xpose.msk.msra.mxu0 %vm198_vm1, %v3123_v22 }
0x192b   :  { %6746 = vmatmul.mubr.msk.f32.vlgmr.msra.gmra.mxu0 %vm198_vm1, %v7738_v14 }
0x19eb   :  { %v6747_v23 = vpop.f32.mrf.mxu0 }
0x19ec   :  { %v3210_v25 = vmul.f32 0.35355338, %v6747_v23 }
0x19ed   :  { %v3200_v10 = vpop.f32.mrf.mxu0 }
0x19ee   :  { %v3209_v27 = vmul.f32 0.35355338, %v3200_v10  ;;  %v3212_v32 = vadd.f32 %v7757_v28, %v3210_v25 }
0x19f0   :  { %v3216_v33 = vsel %vm286_vm2, %v3212_v32, -inf  ;;  %v3211_v31 = vadd.f32 %v7764_v34, %v3209_v27 }
0x19f1   :  { %3217 = vmax.xlane.f32.xlu0 %v3216_v33 }
0x19f2   :  { %v3213_v35 = vsel %vm286_vm2, %v3211_v31, -inf }
0x19f3   :  { %3214 = vmax.xlane.f32.xlu1 %v3213_v35 }
0x1a7a   :  { %v3218_v36 = vpop.xlane.xlu0 %3217 }
0x1a7b   :  { %v3220_v37 = vsub.f32 %v3212_v32, %v3218_v36 }
0x1a7c   :  { %v3215_v30 = vpop.xlane.xlu1 %3214 }
0x1a7d   :  { %v3223_v26 = vmul.f32 1.442695, %v3220_v37  ;;  %v3219_v24 = vsub.f32 %v3211_v31, %v3215_v30 }
0x1a7f   :  { %7046 = vpow2.f32 %v3223_v26  ;;  %v3221_v38 = vmul.f32 1.442695, %v3219_v24 }
0x1a81   :  { %7048 = vpow2.f32 %v3221_v38 }
0x1a8c   :  { %v7047_v29 = vpop.eup %7046 }
0x1a8d   :  { %v3228_v39 = vsel %vm286_vm2, %v7047_v29, 0.0 }
0x1a8e   :  { %v7049_v40 = vpop.eup %7048  ;;  %3229 = vadd.xlane.f32.xlu1 %v3228_v39 }
0x1a8f   :  { %v3225_v41 = vsel %vm286_vm2, %v7049_v40, 0.0 }
0x1a90   :  { %3226 = vadd.xlane.f32.xlu0 %v3225_v41 }
0x1a9f   :  { %3235 = vrot.lane.b32.xlu1 %v7740_v16, %s8231_s28 }
0x1aa3   :  { %3328 = vrot.lane.b32.xlu1 %v7738_v14, %s8232_s27 }
0x1aa6   :  { %3237 = vrot.lane.b32.xlu0 %v7738_v14, %s8231_s28 }
0x1aa7   :  { %3322 = vrot.lane.b32.xlu1 %v7740_v16, %s8233_s26 }
0x1aaa   :  { %3326 = vrot.lane.b32.xlu0 %v7740_v16, %s8232_s27 }
0x1aae   :  { %3324 = vrot.lane.b32.xlu0 %v7738_v14, %s8233_s26 }
0x1b17   :  { %v3230_v44 = vpop.xlane.xlu1 %3229 }
0x1b18   :  { %7050 = vrcp.f32 %v3230_v44 }
0x1b19   :  { %v3227_v45 = vpop.xlane.xlu0 %3226 }
0x1b1a   :  { %7052 = vrcp.f32 %v3227_v45 }
0x1b1b   :  { %v3236_v46 = vpop.permute.xlu1 %3235 }
0x1b1d   :  { %v3238_v47 = vpop.permute.xlu0 %3237 }
0x1b1e   :  { %6748 = vmatprep.subr.mxu1 %v3238_v47 }
0x1b1f   :  { %6749 = vmatpush3.msra.mxu1 %v3238_v47  ;;  %v3329_v48 = vpop.permute.xlu1 %3328 }
0x1b20   :  { %6750 = vmatprep.subr.mxu1 %v3236_v46 }
0x1b21   :  { %6751 = vmatpush3.msra.mxu1 %v3236_v46  ;;  %v3327_v42 = vpop.permute.xlu0 %3326 }
0x1b22   :  { %6755 = vmatprep.subr.msk.mxu1 %vm198_vm1, %v3329_v48 }
0x1b23   :  { %v3323_v51 = vpop.permute.xlu1 %3322 }
0x1b25   :  { %v7051_v2 = vpop.eup %7050  ;;  %v3325_v52 = vpop.permute.xlu0 %3324 }
0x1b26   :  { %v3234_v50 = vmul.f32 %v7051_v2, %v7047_v29 }
0x1b27   :  { %v7053_v5 = vpop.eup %7052 }
0x1b28   :  { %v3233_v49 = vmul.f32 %v7053_v5, %v7049_v40 }
0x1b2a   :  { %6752 = vmatprep.mubr.msk.f32.mxu1 %vm286_vm2, %v3233_v49 }
0x1b2b   :  { %6753 = vmatmul.mubr.msk.f32.vlgmr.msra.gmra.mxu1 %vm286_vm2, %v3234_v50 }
0x1b2c   :  { %6756 = vmatpush3.xpose.msk.msra.mxu1 %vm198_vm1, %v3329_v48  ;;  %6759 = vmatprep.mubr.msk.f32.mxu1 %vm198_vm1, %v3323_v51 }
0x1b2d   :  { %6757 = vmatprep.subr.msk.mxu1 %vm198_vm1, %v3327_v42 }
0x1b30   :  { %6758 = vmatpush3.xpose.msk.msra.mxu1 %vm198_vm1, %v3327_v42 }
0x1b31   :  { %6774 = vmatprep.subr.mxu1 %v6141_v53 }
0x1b33   :  { %6760 = vmatmul.mubr.msk.f32.vlgmr.msra.gmra.mxu1 %vm198_vm1, %v3325_v52 }
0x1b34   :  { %6775 = vmatpush3.msra.mxu1 %v6141_v53 }
0x1beb   :  { %v6754_v43 = vpop.f32.mrf.mxu1 }
0x1bed   :  { %v3313_v54 = vpop.f32.mrf.mxu1 }
0x1bee   :  { %6776 = vmatprep.mubr.msk.f32.mxu1 %vm198_vm1, %v3313_v54 }
0x1bef   :  { %6777 = vmatmul.mubr.msk.f32.vlgmr.msra.gmra.mxu1 %vm198_vm1, %v6754_v43 }
0x1bf3   :  { %v6761_v55 = vpop.f32.mrf.mxu1 }
0x1bf4   :  { %v3414_v56 = vmul.f32 0.35355338, %v6761_v55 }
0x1bf5   :  { %v3404_v57 = vpop.f32.mrf.mxu1 }
0x1bf6   :  { %v3416_v58 = vadd.f32 %v7757_v28, %v3414_v56  ;;  %v3413_v59 = vmul.f32 0.35355338, %v3404_v57 }
0x1bf8   :  { %v3415_v60 = vadd.f32 %v7764_v34, %v3413_v59  ;;  %v3420_v61 = vsel %vm286_vm2, %v3416_v58, -inf }
0x1bf9   :  { %3421 = vmax.xlane.f32.xlu0 %v3420_v61 }
0x1bfa   :  { %v3417_v62 = vsel %vm286_vm2, %v3415_v60, -inf }
0x1bfb   :  { %3418 = vmax.xlane.f32.xlu1 %v3417_v62 }
0x1c82   :  { %v3422_v63 = vpop.xlane.xlu0 %3421 }
0x1c83   :  { %v3424_v0 = vsub.f32 %v3416_v58, %v3422_v63 }
0x1c84   :  { %v3419_v1 = vpop.xlane.xlu1 %3418 }
0x1c85   :  { %v3427_v20 = vmul.f32 1.442695, %v3424_v0  ;;  %v3423_v19 = vsub.f32 %v3415_v60, %v3419_v1 }
0x1c87   :  { %7054 = vpow2.f32 %v3427_v20  ;;  %v3425_v3 = vmul.f32 1.442695, %v3423_v19 }
0x1c89   :  { %7056 = vpow2.f32 %v3425_v3 }
0x1c94   :  { %v7055_v4 = vpop.eup %7054 }
0x1c95   :  { %v3432_v6 = vsel %vm286_vm2, %v7055_v4, 0.0 }
0x1c96   :  { %v7057_v7 = vpop.eup %7056  ;;  %3433 = vadd.xlane.f32.xlu1 %v3432_v6 }
0x1c97   :  { %v3429_v9 = vsel %vm286_vm2, %v7057_v7, 0.0 }
0x1c98   :  { %3430 = vadd.xlane.f32.xlu0 %v3429_v9 }
0x1ca7   :  { %3439 = vrot.lane.b32.xlu1 %v7740_v16, %s8234_s2 }
0x1cab   :  { %3694 = vrot.lane.b32.xlu1 %v7738_v14, %s8228_s5 }
0x1cae   :  { %3441 = vrot.lane.b32.xlu0 %v7738_v14, %s8234_s2 }
0x1caf   :  { %3688 = vrot.lane.b32.xlu1 %v7740_v16, %s8226_s21 }
0x1cb2   :  { %3692 = vrot.lane.b32.xlu0 %v7740_v16, %s8228_s5 }
0x1cb3   :  { %3981 = vrot.lane.b32.xlu1 %v7738_v14, %s8229_s29 }
0x1cb6   :  { %3690 = vrot.lane.b32.xlu0 %v7738_v14, %s8226_s21 }
0x1cb7   :  { %3975 = vrot.lane.b32.xlu1 %v7740_v16, %s8227_s25 }
0x1cba   :  { %3979 = vrot.lane.b32.xlu0 %v7740_v16, %s8229_s29 }
0x1cbe   :  { %3977 = vrot.lane.b32.xlu0 %v7738_v14, %s8227_s25 }
0x1d1f   :  { %v3434_v8 = vpop.xlane.xlu1 %3433 }
0x1d20   :  { %7058 = vrcp.f32 %v3434_v8 }
0x1d21   :  { %v3431_v11 = vpop.xlane.xlu0 %3430 }
0x1d22   :  { %7060 = vrcp.f32 %v3431_v11 }
0x1d23   :  { %v3440_v13 = vpop.permute.xlu1 %3439 }
0x1d25   :  { %v3442_v18 = vpop.permute.xlu0 %3441 }
0x1d26   :  { %6762 = vmatprep.subr.mxu0 %v3442_v18 }
0x1d27   :  { %6763 = vmatpush3.msra.mxu0 %v3442_v18  ;;  %v3695_v10 = vpop.permute.xlu1 %3694 }
0x1d28   :  { %6764 = vmatprep.subr.mxu0 %v3440_v13 }
0x1d29   :  { %6765 = vmatpush3.msra.mxu0 %v3440_v13  ;;  %v3693_v33 = vpop.permute.xlu0 %3692 }
0x1d2a   :  { %6769 = vmatprep.subr.mxu0 %v6142_v15 }
0x1d2b   :  { %v3689_v27 = vpop.permute.xlu1 %3688 }
0x1d2d   :  { %v7059_v17 = vpop.eup %7058  ;;  %v3691_v36 = vpop.permute.xlu0 %3690 }
0x1d2e   :  { %v3438_v25 = vmul.f32 %v7059_v17, %v7055_v4 }
0x1d2f   :  { %v7061_v22 = vpop.eup %7060  ;;  %v3982_v35 = vpop.permute.xlu1 %3981 }
0x1d30   :  { %v3437_v23 = vmul.f32 %v7061_v22, %v7057_v7 }
0x1d31   :  { %v3980_v30 = vpop.permute.xlu0 %3979 }
0x1d32   :  { %6766 = vmatprep.mubr.msk.f32.mxu0 %vm286_vm2, %v3437_v23  ;;  %v6143_v23 = vld [vmem:[%s8222_s4 + $0x30] sm:$0xff] }
0x1d33   :  { %6767 = vmatmul.mubr.msk.f32.vlgmr.msra.gmra.mxu0 %vm286_vm2, %v3438_v25  ;;  %v3976_v37 = vpop.permute.xlu1 %3975  ;;  %v6778_v25 = vpop.f32.mrf.mxu1 }
0x1d34   :  { %6770 = vmatpush3.msra.mxu0 %v6142_v15 }
0x1d35   :  { %6779 = vmatprep.subr.msk.mxu0 %vm198_vm1, %v3695_v10  ;;  %v3978_v26 = vpop.permute.xlu0 %3977 }
0x1df3   :  { %v6768_v32 = vpop.f32.mrf.mxu0 }
0x1df5   :  { %v3517_v31 = vpop.f32.mrf.mxu0 }
0x1df6   :  { %6771 = vmatprep.mubr.msk.f32.mxu0 %vm198_vm1, %v3517_v31 }
0x1df7   :  { %6772 = vmatmul.mubr.msk.f32.vlgmr.msra.gmra.mxu0 %vm198_vm1, %v6768_v32 }
0x1df8   :  { %6780 = vmatpush3.xpose.msk.msra.mxu0 %vm198_vm1, %v3695_v10  ;;  %6783 = vmatprep.mubr.msk.f32.mxu0 %vm198_vm1, %v3689_v27  ;;  %v3679_v10 = vpop.f32.mrf.mxu1 }
0x1df9   :  { %6781 = vmatprep.subr.msk.mxu0 %vm198_vm1, %v3693_v33 }
0x1dfc   :  { %6782 = vmatpush3.xpose.msk.msra.mxu0 %vm198_vm1, %v3693_v33 }
0x1dfd   :  { %6798 = vmatprep.subr.msk.mxu0 %vm198_vm1, %v3982_v35 }
0x1dff   :  { %6784 = vmatmul.mubr.msk.f32.vlgmr.msra.gmra.mxu0 %vm198_vm1, %v3691_v36 }
0x1e00   :  { %6799 = vmatpush3.xpose.msk.msra.mxu0 %vm198_vm1, %v3982_v35  ;;  %6802 = vmatprep.mubr.msk.f32.mxu0 %vm198_vm1, %v3976_v37 }
0x1e01   :  { %6800 = vmatprep.subr.msk.mxu0 %vm198_vm1, %v3980_v30 }
0x1e04   :  { %6801 = vmatpush3.xpose.msk.msra.mxu0 %vm198_vm1, %v3980_v30 }
0x1e07   :  { %6803 = vmatmul.mubr.msk.f32.vlgmr.msra.gmra.mxu0 %vm198_vm1, %v3978_v26  ;;  %v6144_v26 = vld [vmem:[%s8222_s4 + $0x38] sm:$0xff] }
0x1eb7   :  { %v7840_v24 = vpop.f32.mrf.mxu0 }
0x1eb9   :  { %v7842_v38 = vpop.f32.mrf.mxu0 }
0x1ebf   :  { %v6785_v29 = vpop.f32.mrf.mxu0 }
0x1ec0   :  { %v3780_v39 = vmul.f32 0.35355338, %v6785_v29  ;;  %v3685_v29 = vadd.f32 %v6778_v25, %v7840_v24  ;;  %v6189_v24 = vld [vmem:[%s8160_s9 + $0x38] sm:$0xff] }
0x1ec1   :  { %v3770_v40 = vpop.f32.mrf.mxu0  ;;  %6817 = vmatprep.subr.mxu0 %v6189_v24 }
0x1ec2   :  { %v3782_v41 = vadd.f32 %v7757_v28, %v3780_v39  ;;  %v3779_v44 = vmul.f32 0.35355338, %v3770_v40  ;;  %v3680_v40 = vadd.f32 %v3679_v10, %v7842_v38  ;;  %6818 = vmatpush3.msra.mxu0 %v6189_v24  ;;  %v6188_v38 = vld [vmem:[%s8160_s9 + $0x30] sm:$0xff] }
0x1ec3   :  { %6819 = vmatprep.subr.mxu0 %v6188_v38 }
0x1ec4   :  { %v3781_v45 = vadd.f32 %v7764_v34, %v3779_v44  ;;  %v3786_v46 = vsel %vm286_vm2, %v3782_v41, -inf  ;;  %6820 = vmatpush3.msra.mxu0 %v6188_v38 }
0x1ec5   :  { %3787 = vmax.xlane.f32.xlu0 %v3786_v46 }
0x1ec6   :  { %v3783_v47 = vsel %vm286_vm2, %v3781_v45, -inf }
0x1ec7   :  { %3784 = vmax.xlane.f32.xlu1 %v3783_v47  ;;  %v6804_v54 = vpop.f32.mrf.mxu0 }
0x1ec8   :  { %v4067_v57 = vmul.f32 0.35355338, %v6804_v54 }
0x1ec9   :  { %v4057_v55 = vpop.f32.mrf.mxu0 }
0x1eca   :  { %v4066_v56 = vmul.f32 0.35355338, %v4057_v55  ;;  %v4069_v59 = vadd.f32 %v7757_v28, %v4067_v57 }
0x1ecc   :  { %v4068_v58 = vadd.f32 %v7764_v34, %v4066_v56  ;;  %v4073_v61 = vsel %vm286_vm2, %v4069_v59, -inf  ;;  %v6187_v56 = vld [vmem:[%s8160_s9 + $0x28] sm:$0xff] }
0x1ecd   :  { %6821 = vmatprep.subr.mxu0 %v6187_v56 }
0x1ece   :  { %v4070_v60 = vsel %vm286_vm2, %v4068_v58, -inf  ;;  %6822 = vmatpush3.msra.mxu0 %v6187_v56 }
0x1f4e   :  { %v3788_v48 = vpop.xlane.xlu0 %3787 }
0x1f4f   :  { %v3790_v2 = vsub.f32 %v3782_v41, %v3788_v48  ;;  %v7124_v48 = vld [vmem:[%s8224_s24] sm:$0xff] }
0x1f50   :  { %v3785_v5 = vpop.xlane.xlu1 %3784 }
0x1f51   :  { %v3793_v49 = vmul.f32 1.442695, %v3790_v2  ;;  %v3789_v50 = vsub.f32 %v3781_v45, %v3785_v5  ;;  %v6181_v2 = vld [vmem:[%s8223_s30 + $0x1] ss:$0 sm:$0xff] }
0x1f53   :  { %7062 = vpow2.f32 %v3793_v49  ;;  %v3791_v51 = vmul.f32 1.442695, %v3789_v50 }
0x1f55   :  { %7064 = vpow2.f32 %v3791_v51 }
0x1f60   :  { %v7063_v42 = vpop.eup %7062 }
0x1f61   :  { %v3798_v52 = vsel %vm286_vm2, %v7063_v42, 0.0 }
0x1f62   :  { %v7065_v53 = vpop.eup %7064  ;;  %3799 = vadd.xlane.f32.xlu1 %v3798_v52 }
0x1f63   :  { %v3795_v43 = vsel %vm286_vm2, %v7065_v53, 0.0 }
0x1f64   :  { %3796 = vadd.xlane.f32.xlu0 %v3795_v43 }
0x1f73   :  { %3805 = vrot.lane.b32.xlu1 %v7740_v16, %s8235_s6 }
0x1f7a   :  { %3807 = vrot.lane.b32.xlu0 %v7738_v14, %s8235_s6  ;;  %s8237_s6 = sld [smem:[#allocation13_spill]] }
0x1f97   :  { %4071 = vmax.xlane.f32.xlu1 %v4070_v60 }
0x1f99   :  { %4074 = vmax.xlane.f32.xlu0 %v4073_v61 }
0x1feb   :  { %v3800_v62 = vpop.xlane.xlu1 %3799 }
0x1fec   :  { %7066 = vrcp.f32 %v3800_v62 }
0x1fed   :  { %v3797_v63 = vpop.xlane.xlu0 %3796 }
0x1fee   :  { %7068 = vrcp.f32 %v3797_v63 }
0x1fef   :  { %v3806_v1 = vpop.permute.xlu1 %3805 }
0x1ff1   :  { %v3808_v0 = vpop.permute.xlu0 %3807 }
0x1ff2   :  { %6786 = vmatprep.subr.mxu1 %v3808_v0 }
0x1ff3   :  { %6787 = vmatpush3.msra.mxu1 %v3808_v0 }
0x1ff4   :  { %6788 = vmatprep.subr.mxu1 %v3806_v1 }
0x1ff5   :  { %6789 = vmatpush3.msra.mxu1 %v3806_v1 }
0x1ff6   :  { %6793 = vmatprep.subr.mxu1 %v6143_v23 }
0x1ff9   :  { %v7067_v20 = vpop.eup %7066 }
0x1ffa   :  { %v3804_v4 = vmul.f32 %v7067_v20, %v7063_v42 }
0x1ffb   :  { %v7069_v19 = vpop.eup %7068 }
0x1ffc   :  { %v3803_v3 = vmul.f32 %v7069_v19, %v7065_v53 }
0x1ffe   :  { %6790 = vmatprep.mubr.msk.f32.mxu1 %vm286_vm2, %v3803_v3  ;;  %v6196_v3 = vld [vmem:[%s8161_s10 + $0x1] ss:$0 sm:$0xff] }
0x1fff   :  { %6791 = vmatmul.mubr.msk.f32.vlgmr.msra.gmra.mxu1 %vm286_vm2, %v3804_v4 }
0x2000   :  { %6794 = vmatpush3.msra.mxu1 %v6143_v23 }
0x2020   :  { %v4072_v6 = vpop.xlane.xlu1 %4071 }
0x2021   :  { %v4076_v7 = vsub.f32 %v4068_v58, %v4072_v6 }
0x2022   :  { %v4075_v9 = vpop.xlane.xlu0 %4074 }
0x2023   :  { %v4078_v8 = vmul.f32 1.442695, %v4076_v7  ;;  %v4077_v11 = vsub.f32 %v4069_v59, %v4075_v9 }
0x2025   :  { %7070 = vpow2.f32 %v4078_v8  ;;  %v4080_v18 = vmul.f32 1.442695, %v4077_v11 }
0x2027   :  { %7072 = vpow2.f32 %v4080_v18 }
0x2032   :  { %v7071_v13 = vpop.eup %7070 }
0x2033   :  { %v4082_v15 = vsel %vm286_vm2, %v7071_v13, 0.0 }
0x2034   :  { %v7073_v17 = vpop.eup %7072  ;;  %4083 = vadd.xlane.f32.xlu0 %v4082_v15  ;;  %v7125_v15 = vld [vmem:[%s8224_s24 + $0x8] sm:$0xff]  ;;  %s8239_s24 = sld [smem:[#allocation15_spill]] }
0x2035   :  { %v4085_v22 = vsel %vm286_vm2, %v7073_v17, 0.0 }
0x2036   :  { %4086 = vadd.xlane.f32.xlu1 %v4085_v22  ;;  %v6184_v22 = vld [vmem:[%s8225_s3 + $0x1] ss:$0 sm:$0xff] }
0x2047   :  { %4092 = vrot.lane.b32.xlu1 %v7740_v16, %s8236_s23 }
0x204a   :  { %4094 = vrot.lane.b32.xlu0 %v7738_v14, %s8236_s23 }
0x20bd   :  { %v4084_v27 = vpop.xlane.xlu0 %4083 }
0x20be   :  { %7074 = vrcp.f32 %v4084_v27 }
0x20bf   :  { %v6792_v32 = vpop.f32.mrf.mxu1  ;;  %v4087_v33 = vpop.xlane.xlu1 %4086 }
0x20c0   :  { %7076 = vrcp.f32 %v4087_v33 }
0x20c1   :  { %v3883_v31 = vpop.f32.mrf.mxu1  ;;  %v4095_v35 = vpop.permute.xlu0 %4094 }
0x20c2   :  { %6795 = vmatprep.mubr.msk.f32.mxu1 %vm198_vm1, %v3883_v31  ;;  %6805 = vmatprep.subr.mxu1 %v4095_v35 }
0x20c3   :  { %6796 = vmatmul.mubr.msk.f32.vlgmr.msra.gmra.mxu1 %vm198_vm1, %v6792_v32  ;;  %v4093_v36 = vpop.permute.xlu1 %4092  ;;  %v6185_v32 = vld [vmem:[%s8159_s8 + $0x1] ss:$0 sm:$0xff] }
0x20c4   :  { %6806 = vmatpush3.msra.mxu1 %v4095_v35 }
0x20c5   :  { %6807 = vmatprep.subr.mxu1 %v4093_v36 }
0x20c6   :  { %6808 = vmatpush3.msra.mxu1 %v4093_v36 }
0x20c7   :  { %6812 = vmatprep.subr.mxu1 %v6144_v26 }
0x20cb   :  { %v7075_v16 = vpop.eup %7074 }
0x20cc   :  { %v4090_v14 = vmul.f32 %v7075_v16, %v7071_v13 }
0x20cd   :  { %v7077_v37 = vpop.eup %7076 }
0x20ce   :  { %6809 = vmatprep.mubr.msk.f32.mxu1 %vm286_vm2, %v4090_v14  ;;  %v4091_v30 = vmul.f32 %v7077_v37, %v7073_v17 }
0x20d0   :  { %6810 = vmatmul.mubr.msk.f32.vlgmr.msra.gmra.mxu1 %vm286_vm2, %v4091_v30 }
0x20d1   :  { %6813 = vmatpush3.msra.mxu1 %v6144_v26 }
0x2183   :  { %v6797_v39 = vpop.f32.mrf.mxu1 }
0x2184   :  { %v3974_v41 = vadd.f32 %v6797_v39, %v3685_v29 }
0x2185   :  { %v3964_v44 = vpop.f32.mrf.mxu1 }
0x2186   :  { %v3973_v45 = vadd.f32 %v3964_v44, %v3680_v40 }
0x2190   :  { %v6811_v46 = vpop.f32.mrf.mxu1 }
0x2192   :  { %v4170_v47 = vpop.f32.mrf.mxu1 }
0x2193   :  { %6814 = vmatprep.mubr.msk.f32.mxu1 %vm198_vm1, %v4170_v47 }
0x2194   :  { %6815 = vmatmul.mubr.msk.f32.vlgmr.msra.gmra.mxu1 %vm198_vm1, %v6811_v46 }
0x2195   :  { %6836 = vmatprep.mubr.msk.f32.mxu1 %vm110_vm0, %v7124_v48 }
0x2254   :  { %v6816_v5 = vpop.f32.mrf.mxu1 }
0x2255   :  { %v4261_v49 = vadd.f32 %v6816_v5, %v3974_v41 }
0x2256   :  { %v4251_v50 = vpop.f32.mrf.mxu1 }
0x2257   :  { %v4269_v51 = vadd.f32 %v6181_v2, %v4261_v49  ;;  %v4260_v42 = vadd.f32 %v4251_v50, %v3973_v45 }
0x2259   :  { %v4268_v52 = vadd.f32 %v6181_v2, %v4260_v42  ;;  %v4271_v53 = vadd.f32 %v4269_v51, %v7729_v12  ;;  %v6186_v12 = vld [vmem:[%s8160_s9 + $0x20] sm:$0xff] }
0x225a   :  { %6823 = vmatprep.subr.mxu0 %v6186_v12 }
0x225b   :  { %v4279_v43 = vsel %vm110_vm0, %v4271_v53, 0.0  ;;  %v4270_v54 = vadd.f32 %v4268_v52, %v7727_v21  ;;  %6824 = vmatpush3.msra.mxu0 %v6186_v12 }
0x225c   :  { %4280 = vadd.xlane.f32.xlu0 %v4279_v43 }
0x225d   :  { %v4276_v55 = vsel %vm110_vm0, %v4270_v54, 0.0 }
0x225e   :  { %4277 = vadd.xlane.f32.xlu1 %v4276_v55 }
0x226f   :  { %4427 = vrot.lane.b32.xlu1 %v6188_v38, %s8230_s7 }
0x2272   :  { %4429 = vrot.lane.b32.xlu0 %v6189_v24, %s8230_s7 }
0x22e5   :  { %v4281_v21 = vpop.xlane.xlu0 %4280 }
0x22e6   :  { %v4283_v57 = vmul.f32 0.03125, %v4281_v21 }
0x22e7   :  { %v4278_v58 = vpop.xlane.xlu1 %4277 }
0x22e8   :  { %v4285_v59 = vsub.f32 %v4271_v53, %v4283_v57  ;;  %v4282_v60 = vmul.f32 0.03125, %v4278_v58 }
0x22e9   :  { %v4430_v61 = vpop.permute.xlu0 %4429 }
0x22ea   :  { %v4284_v62 = vsub.f32 %v4270_v54, %v4282_v60  ;;  %v4287_v63 = vmul.f32 %v4285_v59, %v4285_v59  ;;  %6828 = vmatprep.subr.mxu1 %v4430_v61 }
0x22eb   :  { %6829 = vmatpush3.msra.mxu1 %v4430_v61  ;;  %v4428_v0 = vpop.permute.xlu1 %4427 }
0x22ec   :  { %v4291_v1 = vsel %vm110_vm0, %v4287_v63, 0.0  ;;  %v4286_v20 = vmul.f32 %v4284_v62, %v4284_v62  ;;  %6830 = vmatprep.subr.mxu1 %v4428_v0 }
0x22ed   :  { %4292 = vadd.xlane.f32.xlu1 %v4291_v1  ;;  %6831 = vmatpush3.msra.mxu1 %v4428_v0  ;;  %v6191_v1 = vld [vmem:[%s8162_s11 + $0x20] sm:$0xff] }
0x22ee   :  { %v4288_v19 = vsel %vm110_vm0, %v4286_v20, 0.0 }
0x22ef   :  { %4289 = vadd.xlane.f32.xlu0 %v4288_v19 }
0x22fe   :  { %4425 = vrot.lane.b32.xlu1 %v6187_v56, %s8230_s7 }
0x2302   :  { %4435 = vrot.lane.b32.xlu1 %v6196_v3, %s8230_s7 }
0x2305   :  { %4423 = vrot.lane.b32.xlu0 %v6186_v12, %s8230_s7 }
0x2376   :  { %v4293_v4 = vpop.xlane.xlu1 %4292 }
0x2377   :  { %v4295_v6 = vmul.f32 0.03125, %v4293_v4 }
0x2378   :  { %v4290_v7 = vpop.xlane.xlu0 %4289 }
0x2379   :  { %v4297_v9 = vadd.f32 1e-05, %v4295_v6  ;;  %v4294_v8 = vmul.f32 0.03125, %v4290_v7 }
0x237a   :  { %v4426_v11 = vpop.permute.xlu1 %4425 }
0x237b   :  { %7078 = vrsqrt.f32 %v4297_v9  ;;  %v4296_v18 = vadd.f32 1e-05, %v4294_v8  ;;  %6832 = vmatprep.subr.mxu1 %v4426_v11 }
0x237c   :  { %v4424_v13 = vpop.permute.xlu0 %4423  ;;  %6833 = vmatpush3.msra.mxu1 %v4426_v11 }
0x237d   :  { %7080 = vrsqrt.f32 %v4296_v18  ;;  %6834 = vmatprep.subr.mxu1 %v4424_v13 }
0x237e   :  { %6835 = vmatpush3.msra.mxu1 %v4424_v13  ;;  %v4436_v36 = vpop.permute.xlu1 %4435 }
0x237f   :  { %6837 = vmatmul.mubr.msk.f32.vlgmr.msra.gmra.mxu1 %vm110_vm0, %v7125_v15 }
0x2388   :  { %v7079_v17 = vpop.eup %7078 }
0x2389   :  { %v4301_v23 = vmul.f32 %v7079_v17, %v4285_v59 }
0x238a   :  { %v7081_v25 = vpop.eup %7080 }
0x238b   :  { %v4300_v10 = vmul.f32 %v7081_v25, %v4284_v62  ;;  %v4309_v27 = vmul.f32 %v6184_v22, %v4301_v23 }
0x238d   :  { %v4308_v33 = vmul.f32 %v6184_v22, %v4300_v10  ;;  %v7925_v35 = vadd.f32 %v6185_v32, %v4309_v27 }
0x238f   :  { %v7923_v31 = vadd.f32 %v6185_v32, %v4308_v33 }
0x2391   :  { %6825 = vmatprep.mubr.msk.f32.mxu0 %vm110_vm0, %v7923_v31 }
0x2392   :  { %6826 = vmatmul.mubr.msk.f32.vlgmr.msra.gmra.mxu0 %vm110_vm0, %v7925_v35 }
0x243f   :  { %v6838_v16 = vpop.f32.mrf.mxu1 }
0x2440   :  { %v7931_v14 = vadd.f32 %v6838_v16, %v4436_v36 }
0x2441   :  { %v4504_v37 = vpop.f32.mrf.mxu1 }
0x2442   :  { %6839 = vmatprep.subr.msk.mxu0 %vm198_vm1, %v7931_v14  ;;  %v7935_v30 = vadd.f32 %v4504_v37, %v4436_v36 }
0x2443   :  { %6840 = vmatpush3.xpose.msk.msra.mxu0 %vm198_vm1, %v7931_v14 }
0x2444   :  { %6841 = vmatprep.subr.msk.mxu0 %vm198_vm1, %v7935_v30 }
0x2447   :  { %6842 = vmatpush3.xpose.msk.msra.mxu0 %vm198_vm1, %v7935_v30 }
0x2452   :  { %v6827_v26 = vpop.f32.mrf.mxu0 }
0x2453   :  { %v7945_v40 = vadd.f32 %v6827_v26, %v6196_v3 }
0x2454   :  { %v4410_v29 = vpop.f32.mrf.mxu0 }
0x2455   :  { %v7943_v39 = vadd.f32 %v6196_v3, %v4410_v29  ;;  %v6192_v29 = vld [vmem:[%s8162_s11 + $0x28] sm:$0xff] }
0x2457   :  { %6843 = vmatprep.mubr.msk.f32.mxu0 %vm198_vm1, %v7943_v39 }
0x2458   :  { %6844 = vmatmul.mubr.msk.f32.vlgmr.msra.gmra.mxu0 %vm198_vm1, %v7945_v40 }
0x2518   :  { %v6845_v41 = vpop.f32.mrf.mxu0 }
0x2519   :  { %v4601_v44 = vmul.f32 0.35355338, %v6845_v41 }
0x251a   :  { %v4591_v45 = vpop.f32.mrf.mxu0 }
0x251b   :  { %v4603_v46 = vadd.f32 %v7757_v28, %v4601_v44  ;;  %v4600_v47 = vmul.f32 0.35355338, %v4591_v45 }
0x251d   :  { %v4602_v48 = vadd.f32 %v7764_v34, %v4600_v47  ;;  %v4607_v24 = vsel %vm286_vm2, %v4603_v46, -inf }
0x251e   :  { %4608 = vmax.xlane.f32.xlu1 %v4607_v24 }
0x251f   :  { %v4604_v38 = vsel %vm286_vm2, %v4602_v48, -inf }
0x2520   :  { %4605 = vmax.xlane.f32.xlu0 %v4604_v38 }
0x252f   :  { %4628 = vrot.lane.b32.xlu1 %v7931_v14, %s8230_s7 }
0x2533   :  { %4719 = vrot.lane.b32.xlu1 %v7931_v14, %s8233_s26 }
0x2537   :  { %4717 = vrot.lane.b32.xlu1 %v7935_v30, %s8233_s26 }
0x253b   :  { %4715 = vrot.lane.b32.xlu1 %v7945_v40, %s8233_s26 }
0x25a7   :  { %v4609_v2 = vpop.xlane.xlu1 %4608 }
0x25a8   :  { %v4611_v5 = vsub.f32 %v4603_v46, %v4609_v2 }
0x25a9   :  { %v4606_v49 = vpop.xlane.xlu0 %4605 }
0x25aa   :  { %v4614_v50 = vmul.f32 1.442695, %v4611_v5  ;;  %v4610_v51 = vsub.f32 %v4602_v48, %v4606_v49 }
0x25ab   :  { %v4629_v42 = vpop.permute.xlu1 %4628 }
0x25ac   :  { %7082 = vpow2.f32 %v4614_v50  ;;  %v4612_v52 = vmul.f32 1.442695, %v4610_v51  ;;  %6846 = vmatprep.subr.mxu1 %v4629_v42 }
0x25ad   :  { %6847 = vmatpush3.msra.mxu1 %v4629_v42 }
0x25ae   :  { %7084 = vpow2.f32 %v4612_v52 }
0x25af   :  { %v4720_v57 = vpop.permute.xlu1 %4719 }
0x25b3   :  { %v4718_v63 = vpop.permute.xlu1 %4717 }
0x25b7   :  { %v4716_v0 = vpop.permute.xlu1 %4715 }
0x25b9   :  { %v7083_v53 = vpop.eup %7082 }
0x25ba   :  { %v4619_v43 = vsel %vm286_vm2, %v7083_v53, 0.0 }
0x25bb   :  { %v7085_v54 = vpop.eup %7084  ;;  %4620 = vadd.xlane.f32.xlu0 %v4619_v43 }
0x25bc   :  { %v4616_v55 = vsel %vm286_vm2, %v7085_v54, 0.0 }
0x25bf   :  { %4617 = vadd.xlane.f32.xlu0 %v4616_v55 }
0x25d5   :  { %4626 = vrot.lane.b32.xlu0 %v7935_v30, %s8230_s7 }
0x25d9   :  { %4713 = vrot.lane.b32.xlu0 %v7943_v39, %s8233_s26 }
0x2644   :  { %v4621_v56 = vpop.xlane.xlu0 %4620 }
0x2645   :  { %7086 = vrcp.f32 %v4621_v56 }
0x2648   :  { %v4618_v12 = vpop.xlane.xlu0 %4617 }
0x2649   :  { %7088 = vrcp.f32 %v4618_v12 }
0x264c   :  { %v4627_v21 = vpop.permute.xlu0 %4626 }
0x264d   :  { %6848 = vmatprep.subr.mxu1 %v4627_v21 }
0x264e   :  { %6849 = vmatpush3.msra.mxu1 %v4627_v21 }
0x264f   :  { %6853 = vmatprep.subr.msk.mxu1 %vm198_vm1, %v4720_v57 }
0x2650   :  { %v4714_v62 = vpop.permute.xlu0 %4713 }
0x2652   :  { %v7087_v58 = vpop.eup %7086 }
0x2653   :  { %v4625_v61 = vmul.f32 %v7087_v58, %v7083_v53 }
0x2656   :  { %v7089_v59 = vpop.eup %7088 }
0x2657   :  { %v4624_v60 = vmul.f32 %v7089_v59, %v7085_v54 }
0x2659   :  { %6850 = vmatprep.mubr.msk.f32.mxu1 %vm286_vm2, %v4624_v60 }
0x265a   :  { %6851 = vmatmul.mubr.msk.f32.vlgmr.msra.gmra.mxu1 %vm286_vm2, %v4625_v61 }
0x265b   :  { %6854 = vmatpush3.xpose.msk.msra.mxu1 %vm198_vm1, %v4720_v57  ;;  %6857 = vmatprep.mubr.msk.f32.mxu1 %vm198_vm1, %v4714_v62 }
0x265c   :  { %6855 = vmatprep.subr.msk.mxu1 %vm198_vm1, %v4718_v63 }
0x265f   :  { %6856 = vmatpush3.xpose.msk.msra.mxu1 %vm198_vm1, %v4718_v63 }
0x2660   :  { %6872 = vmatprep.subr.mxu1 %v6191_v1 }
0x2662   :  { %6858 = vmatmul.mubr.msk.f32.vlgmr.msra.gmra.mxu1 %vm198_vm1, %v4716_v0 }
0x2663   :  { %6873 = vmatpush3.msra.mxu1 %v6191_v1 }
0x271a   :  { %v6852_v20 = vpop.f32.mrf.mxu1 }
0x271c   :  { %v4704_v19 = vpop.f32.mrf.mxu1 }
0x271d   :  { %6874 = vmatprep.mubr.msk.f32.mxu1 %vm198_vm1, %v4704_v19 }
0x271e   :  { %6875 = vmatmul.mubr.msk.f32.vlgmr.msra.gmra.mxu1 %vm198_vm1, %v6852_v20 }
0x2722   :  { %v6859_v3 = vpop.f32.mrf.mxu1 }
0x2723   :  { %v4805_v4 = vmul.f32 0.35355338, %v6859_v3 }
0x2724   :  { %v4795_v6 = vpop.f32.mrf.mxu1 }
0x2725   :  { %v4807_v7 = vadd.f32 %v7757_v28, %v4805_v4  ;;  %v4804_v9 = vmul.f32 0.35355338, %v4795_v6 }
0x2727   :  { %v4806_v8 = vadd.f32 %v7764_v34, %v4804_v9  ;;  %v4811_v11 = vsel %vm286_vm2, %v4807_v7, -inf }
0x2728   :  { %4812 = vmax.xlane.f32.xlu1 %v4811_v11 }
0x2729   :  { %v4808_v18 = vsel %vm286_vm2, %v4806_v8, -inf }
0x272a   :  { %4809 = vmax.xlane.f32.xlu0 %v4808_v18 }
0x2739   :  { %4832 = vrot.lane.b32.xlu1 %v7931_v14, %s8232_s27 }
0x273d   :  { %5085 = vrot.lane.b32.xlu1 %v7931_v14, %s8226_s21 }
0x2741   :  { %5083 = vrot.lane.b32.xlu1 %v7935_v30, %s8226_s21 }
0x2745   :  { %5081 = vrot.lane.b32.xlu1 %v7945_v40, %s8226_s21 }
0x2749   :  { %5370 = vrot.lane.b32.xlu1 %v7935_v30, %s8227_s25 }
0x274d   :  { %5368 = vrot.lane.b32.xlu1 %v7945_v40, %s8227_s25 }
0x27b1   :  { %v4813_v13 = vpop.xlane.xlu1 %4812 }
0x27b2   :  { %v4815_v15 = vsub.f32 %v4807_v7, %v4813_v13  ;;  %v7126_v13 = vld [vmem:[%s8221_s0 + $0x8] sm:$0xff] }
0x27b3   :  { %v4810_v17 = vpop.xlane.xlu0 %4809 }
0x27b4   :  { %v4818_v22 = vmul.f32 1.442695, %v4815_v15  ;;  %v4814_v23 = vsub.f32 %v4806_v8, %v4810_v17 }
0x27b5   :  { %v4833_v25 = vpop.permute.xlu1 %4832 }
0x27b6   :  { %7090 = vpow2.f32 %v4818_v22  ;;  %v4816_v10 = vmul.f32 1.442695, %v4814_v23  ;;  %6860 = vmatprep.subr.mxu0 %v4833_v25 }
0x27b7   :  { %6861 = vmatpush3.msra.mxu0 %v4833_v25 }
0x27b8   :  { %7092 = vpow2.f32 %v4816_v10 }
0x27c3   :  { %v7091_v27 = vpop.eup %7090 }
0x27c4   :  { %v4823_v32 = vsel %vm286_vm2, %v7091_v27, 0.0 }
0x27c5   :  { %v7093_v33 = vpop.eup %7092  ;;  %4824 = vadd.xlane.f32.xlu0 %v4823_v32 }
0x27c6   :  { %v4820_v36 = vsel %vm286_vm2, %v7093_v33, 0.0 }
0x27c9   :  { %4821 = vadd.xlane.f32.xlu0 %v4820_v36 }
0x27df   :  { %4830 = vrot.lane.b32.xlu0 %v7935_v30, %s8232_s27 }
0x27e3   :  { %5079 = vrot.lane.b32.xlu0 %v7943_v39, %s8226_s21 }
0x27e7   :  { %5372 = vrot.lane.b32.xlu0 %v7931_v14, %s8227_s25 }
0x27eb   :  { %5366 = vrot.lane.b32.xlu0 %v7943_v39, %s8227_s25  ;;  %v5086_v39 = vpop.permute.xlu1 %5085 }
0x27ef   :  { %v5084_v48 = vpop.permute.xlu1 %5083 }
0x27f3   :  { %v5082_v2 = vpop.permute.xlu1 %5081 }
0x27f7   :  { %v5371_v49 = vpop.permute.xlu1 %5370 }
0x27fb   :  { %v5369_v50 = vpop.permute.xlu1 %5368 }
0x284e   :  { %v4825_v16 = vpop.xlane.xlu0 %4824 }
0x284f   :  { %7094 = vrcp.f32 %v4825_v16 }
0x2852   :  { %v4822_v37 = vpop.xlane.xlu0 %4821 }
0x2853   :  { %7096 = vrcp.f32 %v4822_v37 }
0x2856   :  { %v4831_v26 = vpop.permute.xlu0 %4830 }
0x2857   :  { %6862 = vmatprep.subr.mxu0 %v4831_v26 }
0x2858   :  { %6863 = vmatpush3.msra.mxu0 %v4831_v26 }
0x2859   :  { %6867 = vmatprep.subr.mxu0 %v6192_v29 }
0x285a   :  { %v5080_v46 = vpop.permute.xlu0 %5079 }
0x285c   :  { %v7095_v40 = vpop.eup %7094 }
0x285d   :  { %v4829_v45 = vmul.f32 %v7095_v40, %v7091_v27  ;;  %v6193_v27 = vld [vmem:[%s8162_s11 + $0x30] sm:$0xff] }
0x285e   :  { %v5373_v38 = vpop.permute.xlu0 %5372 }
0x2860   :  { %v7097_v41 = vpop.eup %7096 }
0x2861   :  { %v4828_v44 = vmul.f32 %v7097_v41, %v7093_v33 }
0x2862   :  { %v5367_v5 = vpop.permute.xlu0 %5366 }
0x2863   :  { %6864 = vmatprep.mubr.msk.f32.mxu0 %vm286_vm2, %v4828_v44 }
0x2864   :  { %6865 = vmatmul.mubr.msk.f32.vlgmr.msra.gmra.mxu0 %vm286_vm2, %v4829_v45  ;;  %v6876_v45 = vpop.f32.mrf.mxu1 }
0x2865   :  { %6868 = vmatpush3.msra.mxu0 %v6192_v29 }
0x2866   :  { %6877 = vmatprep.subr.msk.mxu0 %vm198_vm1, %v5086_v39 }
0x2924   :  { %v6866_v47 = vpop.f32.mrf.mxu0 }
0x2926   :  { %v4908_v24 = vpop.f32.mrf.mxu0 }
0x2927   :  { %6869 = vmatprep.mubr.msk.f32.mxu0 %vm198_vm1, %v4908_v24 }
0x2928   :  { %6870 = vmatmul.mubr.msk.f32.vlgmr.msra.gmra.mxu0 %vm198_vm1, %v6866_v47 }
0x2929   :  { %6878 = vmatpush3.xpose.msk.msra.mxu0 %vm198_vm1, %v5086_v39  ;;  %6881 = vmatprep.mubr.msk.f32.mxu0 %vm198_vm1, %v5080_v46  ;;  %v5070_v39 = vpop.f32.mrf.mxu1 }
0x292a   :  { %6879 = vmatprep.subr.msk.mxu0 %vm198_vm1, %v5084_v48 }
0x292d   :  { %6880 = vmatpush3.xpose.msk.msra.mxu0 %vm198_vm1, %v5084_v48 }
0x292e   :  { %6896 = vmatprep.subr.msk.mxu0 %vm198_vm1, %v5373_v38 }
0x2930   :  { %6882 = vmatmul.mubr.msk.f32.vlgmr.msra.gmra.mxu0 %vm198_vm1, %v5082_v2 }
0x2931   :  { %6897 = vmatpush3.xpose.msk.msra.mxu0 %vm198_vm1, %v5373_v38  ;;  %6900 = vmatprep.mubr.msk.f32.mxu0 %vm198_vm1, %v5367_v5 }
0x2932   :  { %6898 = vmatprep.subr.msk.mxu0 %vm198_vm1, %v5371_v49 }
0x2935   :  { %6899 = vmatpush3.xpose.msk.msra.mxu0 %vm198_vm1, %v5371_v49  ;;  %v6194_v49 = vld [vmem:[%s8162_s11 + $0x38] sm:$0xff] }
0x2938   :  { %6901 = vmatmul.mubr.msk.f32.vlgmr.msra.gmra.mxu0 %vm198_vm1, %v5369_v50 }
0x29e8   :  { %v8027_v51 = vpop.f32.mrf.mxu0 }
0x29e9   :  { %v5076_v50 = vadd.f32 %v6876_v45, %v8027_v51  ;;  %v6246_v45 = vld [vmem:[%s8168_s17 + $0x58] sm:$0xff] }
0x29ea   :  { %v8029_v42 = vpop.f32.mrf.mxu0 }
0x29f0   :  { %v6883_v52 = vpop.f32.mrf.mxu0 }
0x29f1   :  { %v5171_v53 = vmul.f32 0.35355338, %v6883_v52 }
0x29f2   :  { %v5161_v43 = vpop.f32.mrf.mxu0 }
0x29f3   :  { %v5173_v54 = vadd.f32 %v7757_v28, %v5171_v53  ;;  %v5170_v55 = vmul.f32 0.35355338, %v5161_v43  ;;  %v5071_v53 = vadd.f32 %v5070_v39, %v8029_v42  ;;  %v6245_v39 = vld [vmem:[%s8168_s17 + $0x50] sm:$0xff] }
0x29f5   :  { %v5172_v56 = vadd.f32 %v7764_v34, %v5170_v55  ;;  %v5177_v12 = vsel %vm286_vm2, %v5173_v54, -inf }
0x29f6   :  { %5178 = vmax.xlane.f32.xlu1 %v5177_v12 }
0x29f7   :  { %v5174_v21 = vsel %vm286_vm2, %v5172_v56, -inf }
0x29f8   :  { %5175 = vmax.xlane.f32.xlu0 %v5174_v21  ;;  %v6902_v57 = vpop.f32.mrf.mxu0  ;;  %v6233_v21 = vld [vmem:[%s8237_s6 + $0x1] ss:$0 sm:$0xff] }
0x29f9   :  { %v5458_v11 = vmul.f32 0.35355338, %v6902_v57 }
0x29fa   :  { %v5448_v58 = vpop.f32.mrf.mxu0 }
0x29fb   :  { %v5457_v59 = vmul.f32 0.35355338, %v5448_v58  ;;  %v5460_v15 = vadd.f32 %v7126_v13, %v5458_v11  ;;  %v6238_v11 = vld [vmem:[%s8166_s15 + $0x20] sm:$0xff]  ;;  %v6249_v13 = vld [vmem:[%s8168_s17 + $0x70] sm:$0xff] }
0x29fd   :  { %v5459_v60 = vadd.f32 %v7764_v34, %v5457_v59  ;;  %v5464_v22 = vsel %vm286_vm2, %v5460_v15, -inf }
0x29ff   :  { %v5461_v61 = vsel %vm286_vm2, %v5459_v60, -inf }
0x2a07   :  { %5198 = vrot.lane.b32.xlu1 %v7931_v14, %s8228_s5 }
0x2a2b   :  { %5462 = vmax.xlane.f32.xlu1 %v5461_v61 }
0x2a7f   :  { %v5179_v28 = vpop.xlane.xlu1 %5178 }
0x2a80   :  { %v5181_v62 = vsub.f32 %v5173_v54, %v5179_v28 }
0x2a81   :  { %v5176_v63 = vpop.xlane.xlu0 %5175 }
0x2a82   :  { %v5184_v0 = vmul.f32 1.442695, %v5181_v62  ;;  %v5180_v1 = vsub.f32 %v5172_v56, %v5176_v63 }
0x2a83   :  { %v5199_v20 = vpop.permute.xlu1 %5198 }
0x2a84   :  { %7098 = vpow2.f32 %v5184_v0  ;;  %v5182_v19 = vmul.f32 1.442695, %v5180_v1  ;;  %6884 = vmatprep.subr.mxu1 %v5199_v20 }
0x2a85   :  { %6885 = vmatpush3.msra.mxu1 %v5199_v20 }
0x2a86   :  { %7100 = vpow2.f32 %v5182_v19 }
0x2a91   :  { %v7099_v3 = vpop.eup %7098 }
0x2a92   :  { %v5189_v4 = vsel %vm286_vm2, %v7099_v3, 0.0 }
0x2a93   :  { %v7101_v6 = vpop.eup %7100  ;;  %5190 = vadd.xlane.f32.xlu0 %v5189_v4 }
0x2a94   :  { %v5186_v34 = vsel %vm286_vm2, %v7101_v6, 0.0 }
0x2a97   :  { %5187 = vadd.xlane.f32.xlu0 %v5186_v34 }
0x2aad   :  { %5196 = vrot.lane.b32.xlu0 %v7935_v30, %s8228_s5 }
0x2ab4   :  { %v5463_v7 = vpop.xlane.xlu1 %5462 }
0x2ab5   :  { %v5467_v9 = vsub.f32 %v5459_v60, %v5463_v7 }
0x2ab7   :  { %v5469_v8 = vmul.f32 1.442695, %v5467_v9  ;;  %v6240_v9 = vld [vmem:[%s8166_s15 + $0x30] sm:$0xff] }
0x2ab9   :  { %7102 = vpow2.f32 %v5469_v8  ;;  %v6239_v8 = vld [vmem:[%s8166_s15 + $0x28] sm:$0xff] }
0x2ac6   :  { %v7103_v18 = vpop.eup %7102 }
0x2ac7   :  { %v5473_v17 = vsel %vm286_vm2, %v7103_v18, 0.0 }
0x2ac8   :  { %5474 = vadd.xlane.f32.xlu1 %v5473_v17  ;;  %v6247_v17 = vld [vmem:[%s8168_s17 + $0x60] sm:$0xff] }
0x2acc   :  { %5465 = vmax.xlane.f32.xlu0 %v5464_v22 }
0x2ad9   :  { %5485 = vrot.lane.b32.xlu1 %v7931_v14, %s8229_s29 }
0x2b1c   :  { %v5191_v23 = vpop.xlane.xlu0 %5190 }
0x2b1d   :  { %7104 = vrcp.f32 %v5191_v23 }
0x2b20   :  { %v5188_v25 = vpop.xlane.xlu0 %5187 }
0x2b21   :  { %7106 = vrcp.f32 %v5188_v25 }
0x2b24   :  { %v5197_v10 = vpop.permute.xlu0 %5196 }
0x2b25   :  { %6886 = vmatprep.subr.mxu1 %v5197_v10 }
0x2b26   :  { %6887 = vmatpush3.msra.mxu1 %v5197_v10 }
0x2b27   :  { %6891 = vmatprep.subr.mxu1 %v6193_v27 }
0x2b2a   :  { %v7105_v32 = vpop.eup %7104 }
0x2b2b   :  { %v5195_v16 = vmul.f32 %v7105_v32, %v7099_v3 }
0x2b2e   :  { %v7107_v33 = vpop.eup %7106 }
0x2b2f   :  { %v5194_v36 = vmul.f32 %v7107_v33, %v7101_v6 }
0x2b31   :  { %6888 = vmatprep.mubr.msk.f32.mxu1 %vm286_vm2, %v5194_v36  ;;  %v6236_v36 = vld [vmem:[%s8164_s13 + $0x1] ss:$0 sm:$0xff] }
0x2b32   :  { %6889 = vmatmul.mubr.msk.f32.vlgmr.msra.gmra.mxu1 %vm286_vm2, %v5195_v16 }
0x2b33   :  { %6892 = vmatpush3.msra.mxu1 %v6193_v27 }
0x2b51   :  { %v5475_v14 = vpop.xlane.xlu1 %5474 }
0x2b55   :  { %v5486_v37 = vpop.permute.xlu1 %5485  ;;  %v5466_v26 = vpop.xlane.xlu0 %5465 }
0x2b56   :  { %v5468_v29 = vsub.f32 %v5460_v15, %v5466_v26  ;;  %6903 = vmatprep.subr.mxu1 %v5486_v37  ;;  %v6248_v15 = vld [vmem:[%s8168_s17 + $0x68] sm:$0xff] }
0x2b58   :  { %v5471_v40 = vmul.f32 1.442695, %v5468_v29  ;;  %v6237_v29 = vld [vmem:[%s8165_s14 + $0x1] ss:$0 sm:$0xff] }
0x2b5a   :  { %7108 = vpow2.f32 %v5471_v40 }
0x2b5b   :  { %7110 = vrcp.f32 %v5475_v14 }
0x2b67   :  { %v7109_v41 = vpop.eup %7108 }
0x2b68   :  { %v5476_v44 = vsel %vm286_vm2, %v7109_v41, 0.0  ;;  %v7111_v46 = vpop.eup %7110 }
0x2b69   :  { %5477 = vadd.xlane.f32.xlu0 %v5476_v44  ;;  %v5481_v38 = vmul.f32 %v7111_v46, %v7103_v18  ;;  %v6250_v18 = vld [vmem:[%s8168_s17 + $0x78] sm:$0xff]  ;;  %v6244_v46 = vld [vmem:[%s8168_s17 + $0x48] sm:$0xff] }
0x2b7f   :  { %5483 = vrot.lane.b32.xlu0 %v7935_v30, %s8229_s29 }
0x2bf2   :  { %v6890_v47 = vpop.f32.mrf.mxu1  ;;  %v5478_v48 = vpop.xlane.xlu0 %5477 }
0x2bf3   :  { %7112 = vrcp.f32 %v5478_v48  ;;  %v6252_v48 = vld [vmem:[%s8167_s16 + $0x1] ss:$0 sm:$0xff] }
0x2bf4   :  { %v5274_v24 = vpop.f32.mrf.mxu1 }
0x2bf5   :  { %6893 = vmatprep.mubr.msk.f32.mxu1 %vm198_vm1, %v5274_v24 }
0x2bf6   :  { %6894 = vmatmul.mubr.msk.f32.vlgmr.msra.gmra.mxu1 %vm198_vm1, %v6890_v47  ;;  %v5484_v2 = vpop.permute.xlu0 %5483  ;;  %v6243_v47 = vld [vmem:[%s8168_s17 + $0x40] sm:$0xff] }
0x2bf7   :  { %6904 = vmatpush3.msra.mxu1 %v5486_v37  ;;  %6907 = vmatprep.mubr.msk.f32.mxu1 %vm286_vm2, %v5481_v38 }
0x2bf8   :  { %6905 = vmatprep.subr.mxu1 %v5484_v2 }
0x2bf9   :  { %6906 = vmatpush3.msra.mxu1 %v5484_v2 }
0x2bfa   :  { %6910 = vmatprep.subr.mxu1 %v6194_v49 }
0x2c00   :  { %v7113_v30 = vpop.eup %7112 }
0x2c01   :  { %v5482_v5 = vmul.f32 %v7113_v30, %v7109_v41 }
0x2c03   :  { %6908 = vmatmul.mubr.msk.f32.vlgmr.msra.gmra.mxu1 %vm286_vm2, %v5482_v5 }
0x2c04   :  { %6911 = vmatpush3.msra.mxu1 %v6194_v49 }
0x2c05   :  { %6926 = vmatprep.subr.mxu1 %v6250_v18 }
0x2cb6   :  { %v6895_v52 = vpop.f32.mrf.mxu1 }
0x2cb7   :  { %v5365_v43 = vadd.f32 %v6895_v52, %v5076_v50  ;;  %v6255_v50 = vld [vmem:[%s8169_s18 + $0x1] ss:$0 sm:$0xff] }
0x2cb8   :  { %v5355_v54 = vpop.f32.mrf.mxu1 }
0x2cb9   :  { %v5364_v55 = vadd.f32 %v5355_v54, %v5071_v53 }
0x2cc3   :  { %v6909_v56 = vpop.f32.mrf.mxu1 }
0x2cc5   :  { %v5561_v12 = vpop.f32.mrf.mxu1 }
0x2cc6   :  { %6912 = vmatprep.mubr.msk.f32.mxu1 %vm198_vm1, %v5561_v12 }
0x2cc7   :  { %6913 = vmatmul.mubr.msk.f32.vlgmr.msra.gmra.mxu1 %vm198_vm1, %v6909_v56 }
0x2cc8   :  { %6927 = vmatpush3.msra.mxu1 %v6250_v18 }
0x2cc9   :  { %6928 = vmatprep.subr.mxu1 %v6249_v13 }
0x2cca   :  { %6929 = vmatpush3.msra.mxu1 %v6249_v13 }
0x2ccb   :  { %6930 = vmatprep.subr.mxu1 %v6248_v15 }
0x2ccc   :  { %6931 = vmatpush3.msra.mxu1 %v6248_v15  ;;  %v6261_v15 = vld [vmem:[%s8171_s20 + $0x1] ss:$0 sm:$0xff] }
0x2ccd   :  { %6932 = vmatprep.subr.mxu1 %v6247_v17 }
0x2cce   :  { %6933 = vmatpush3.msra.mxu1 %v6247_v17 }
0x2ccf   :  { %6934 = vmatprep.subr.mxu1 %v6246_v45 }
0x2cd0   :  { %6935 = vmatpush3.msra.mxu1 %v6246_v45 }
0x2cd1   :  { %6936 = vmatprep.subr.mxu1 %v6245_v39 }
0x2cd2   :  { %6937 = vmatpush3.msra.mxu1 %v6245_v39 }
0x2cd3   :  { %6938 = vmatprep.subr.mxu1 %v6244_v46 }
0x2cd4   :  { %6939 = vmatpush3.msra.mxu1 %v6244_v46 }
0x2cd5   :  { %6940 = vmatprep.subr.mxu1 %v6243_v47 }
0x2cd6   :  { %6941 = vmatpush3.msra.mxu1 %v6243_v47 }
0x2d87   :  { %v6914_v57 = vpop.f32.mrf.mxu1 }
0x2d88   :  { %v5652_v58 = vadd.f32 %v6914_v57, %v5365_v43 }
0x2d89   :  { %v5642_v59 = vpop.f32.mrf.mxu1 }
0x2d8a   :  { %v5660_v51 = vadd.f32 %v6233_v21, %v5652_v58  ;;  %v5651_v60 = vadd.f32 %v5642_v59, %v5364_v55 }
0x2d8c   :  { %v5659_v61 = vadd.f32 %v6233_v21, %v5651_v60  ;;  %v5662_v42 = vadd.f32 %v5660_v51, %v7925_v35 }
0x2d8e   :  { %v5670_v28 = vsel %vm110_vm0, %v5662_v42, 0.0  ;;  %v5661_v62 = vadd.f32 %v5659_v61, %v7923_v31  ;;  %v6241_v31 = vld [vmem:[%s8166_s15 + $0x38] sm:$0xff] }
0x2d8f   :  { %5671 = vadd.xlane.f32.xlu0 %v5670_v28  ;;  %6915 = vmatprep.subr.mxu0 %v6241_v31 }
0x2d90   :  { %v5667_v63 = vsel %vm110_vm0, %v5661_v62, 0.0  ;;  %6916 = vmatpush3.msra.mxu0 %v6241_v31 }
0x2d91   :  { %5668 = vadd.xlane.f32.xlu1 %v5667_v63  ;;  %6917 = vmatprep.subr.mxu0 %v6240_v9 }
0x2d92   :  { %6918 = vmatpush3.msra.mxu0 %v6240_v9  ;;  %v6260_v9 = vld [vmem:[%s8170_s19 + $0x1] ss:$0 sm:$0xff] }
0x2d93   :  { %6919 = vmatprep.subr.mxu0 %v6239_v8 }
0x2d94   :  { %6920 = vmatpush3.msra.mxu0 %v6239_v8 }
0x2d95   :  { %6921 = vmatprep.subr.mxu0 %v6238_v11 }
0x2d96   :  { %6922 = vmatpush3.msra.mxu0 %v6238_v11 }
0x2e18   :  { %v5672_v0 = vpop.xlane.xlu0 %5671 }
0x2e19   :  { %v5674_v1 = vmul.f32 0.03125, %v5672_v0  ;;  %v5954_v0 = vld [vmem:[#allocation2 + $0x18] sm:$0xff] }
0x2e1a   :  { %v5669_v20 = vpop.xlane.xlu1 %5668  ;;  %6945 = vmatprep.subr.mxu0 %v5954_v0 }
0x2e1b   :  { %v5676_v19 = vsub.f32 %v5662_v42, %v5674_v1  ;;  %v5673_v3 = vmul.f32 0.03125, %v5669_v20  ;;  %v5953_v1 = vld [vmem:[#allocation2 + $0x10] sm:$0xff]  ;;  %v5952_v20 = vld [vmem:[#allocation2 + $0x8] sm:$0xff] }
0x2e1d   :  { %v5675_v4 = vsub.f32 %v5661_v62, %v5673_v3  ;;  %v5678_v6 = vmul.f32 %v5676_v19, %v5676_v19 }
0x2e1f   :  { %v5682_v34 = vsel %vm110_vm0, %v5678_v6, 0.0  ;;  %v5677_v7 = vmul.f32 %v5675_v4, %v5675_v4 }
0x2e20   :  { %5683 = vadd.xlane.f32.xlu0 %v5682_v34 }
0x2e21   :  { %v5679_v35 = vsel %vm110_vm0, %v5677_v7, 0.0 }
0x2e22   :  { %5680 = vadd.xlane.f32.xlu1 %v5679_v35 }
0x2ea9   :  { %v5684_v22 = vpop.xlane.xlu0 %5683 }
0x2eaa   :  { %v5686_v23 = vmul.f32 0.03125, %v5684_v22 }
0x2eab   :  { %v5681_v25 = vpop.xlane.xlu1 %5680 }
0x2eac   :  { %v5688_v10 = vadd.f32 1e-05, %v5686_v23  ;;  %v5685_v27 = vmul.f32 0.03125, %v5681_v25  ;;  %v6262_v25 = vld [vmem:[%s8238_s22] ss:$0 sm:$0xff] }
0x2eae   :  { %7114 = vrsqrt.f32 %v5688_v10  ;;  %v5687_v32 = vadd.f32 1e-05, %v5685_v27 }
0x2eb0   :  { %7116 = vrsqrt.f32 %v5687_v32 }
0x2ebb   :  { %v7115_v33 = vpop.eup %7114 }
0x2ebc   :  { %v5692_v16 = vmul.f32 %v7115_v33, %v5676_v19  ;;  %v5951_v19 = vld [vmem:[#allocation2] sm:$0xff] }
0x2ebd   :  { %v7117_v14 = vpop.eup %7116 }
0x2ebe   :  { %v5691_v37 = vmul.f32 %v7117_v14, %v5675_v4  ;;  %v5700_v26 = vmul.f32 %v6236_v36, %v5692_v16 }
0x2ec0   :  { %v5699_v40 = vmul.f32 %v6236_v36, %v5691_v37  ;;  %v5708_v44 = vadd.f32 %v6237_v29, %v5700_v26 }
0x2ec2   :  { %v5707_v41 = vadd.f32 %v6237_v29, %v5699_v40 }
0x2ec4   :  { %6923 = vmatprep.mubr.msk.f32.mxu0 %vm110_vm0, %v5707_v41 }
0x2ec5   :  { %6924 = vmatmul.mubr.msk.f32.vlgmr.msra.gmra.mxu0 %vm110_vm0, %v5708_v44 }
0x2ec6   :  { %6946 = vmatpush3.msra.mxu0 %v5954_v0 }
0x2ec7   :  { %6947 = vmatprep.subr.mxu0 %v5953_v1 }
0x2ec8   :  { %6948 = vmatpush3.msra.mxu0 %v5953_v1 }
0x2ec9   :  { %6949 = vmatprep.subr.mxu0 %v5952_v20 }
0x2eca   :  { %6950 = vmatpush3.msra.mxu0 %v5952_v20 }
0x2ecb   :  { %6951 = vmatprep.subr.mxu0 %v5951_v19 }
0x2ecc   :  { %6952 = vmatpush3.msra.mxu0 %v5951_v19 }
0x2f85   :  { %v6925_v24 = vpop.f32.mrf.mxu0 }
0x2f86   :  { %v5811_v38 = vadd.f32 %v6925_v24, %v6252_v48 }
0x2f87   :  { %v5805_v2 = vpop.f32.mrf.mxu0 }
0x2f88   :  { %v5806_v30 = vadd.f32 %v6252_v48, %v5805_v2  ;;  %v5815_v49 = vmax.f32 %v5811_v38, 0.0 }
0x2f8a   :  { %v5814_v5 = vmax.f32 %v5806_v30, 0.0 }
0x2f8c   :  { %6942 = vmatprep.mubr.msk.f32.mxu1 %vm2891_vm3, %v5814_v5 }
0x2f8d   :  { %6943 = vmatmul.mubr.msk.f32.vlgmr.msra.gmra.mxu1 %vm2891_vm3, %v5815_v49 }
0x304d   :  { %v6944_v52 = vpop.f32.mrf.mxu1 }
0x304e   :  { %v5900_v53 = vadd.f32 %v6944_v52, %v6255_v50 }
0x304f   :  { %v5894_v43 = vpop.f32.mrf.mxu1 }
0x3050   :  { %v5904_v54 = vadd.f32 %v5900_v53, %v5708_v44  ;;  %v5895_v55 = vadd.f32 %v6255_v50, %v5894_v43 }
0x3052   :  { %v5903_v56 = vadd.f32 %v5895_v55, %v5707_v41  ;;  %v5912_v12 = vsel %vm110_vm0, %v5904_v54, 0.0 }
0x3053   :  { %5913 = vadd.xlane.f32.xlu0 %v5912_v12 }
0x3054   :  { %v5909_v21 = vsel %vm110_vm0, %v5903_v56, 0.0 }
0x3055   :  { %5910 = vadd.xlane.f32.xlu1 %v5909_v21 }
0x30dc   :  { %v5914_v57 = vpop.xlane.xlu0 %5913 }
0x30dd   :  { %v5916_v58 = vmul.f32 0.03125, %v5914_v57 }
0x30de   :  { %v5911_v59 = vpop.xlane.xlu1 %5910 }
0x30df   :  { %v5918_v51 = vsub.f32 %v5904_v54, %v5916_v58  ;;  %v5915_v60 = vmul.f32 0.03125, %v5911_v59 }
0x30e1   :  { %v5917_v61 = vsub.f32 %v5903_v56, %v5915_v60  ;;  %v5920_v42 = vmul.f32 %v5918_v51, %v5918_v51 }
0x30e3   :  { %v5924_v28 = vsel %vm110_vm0, %v5920_v42, 0.0  ;;  %v5919_v62 = vmul.f32 %v5917_v61, %v5917_v61 }
0x30e4   :  { %5925 = vadd.xlane.f32.xlu0 %v5924_v28 }
0x30e5   :  { %v5921_v63 = vsel %vm110_vm0, %v5919_v62, 0.0 }
0x30e6   :  { %5922 = vadd.xlane.f32.xlu1 %v5921_v63 }
0x316d   :  { %v5926_v3 = vpop.xlane.xlu0 %5925 }
0x316e   :  { %v5928_v4 = vmul.f32 0.03125, %v5926_v3 }
0x316f   :  { %v5923_v6 = vpop.xlane.xlu1 %5922 }
0x3170   :  { %v5930_v34 = vadd.f32 1e-05, %v5928_v4  ;;  %v5927_v7 = vmul.f32 0.03125, %v5923_v6 }
0x3172   :  { %7118 = vrsqrt.f32 %v5930_v34  ;;  %v5929_v35 = vadd.f32 1e-05, %v5927_v7 }
0x3174   :  { %7120 = vrsqrt.f32 %v5929_v35 }
0x317f   :  { %v7119_v31 = vpop.eup %7118 }
0x3180   :  { %v5934_v8 = vmul.f32 %v7119_v31, %v5918_v51 }
0x3181   :  { %v7121_v11 = vpop.eup %7120 }
0x3182   :  { %v5933_v18 = vmul.f32 %v7121_v11, %v5917_v61  ;;  %v5942_v13 = vmul.f32 %v6260_v9, %v5934_v8 }
0x3184   :  { %v5941_v17 = vmul.f32 %v6260_v9, %v5933_v18  ;;  %v5950_v23 = vadd.f32 %v6261_v15, %v5942_v13 }
0x3186   :  { %v5949_v22 = vadd.f32 %v6261_v15, %v5941_v17 }
0x3188   :  { %6953 = vmatprep.mubr.msk.f32.mxu0 %vm110_vm0, %v5949_v22 }
0x3189   :  { %6954 = vmatmul.mubr.msk.f32.vlgmr.msra.gmra.mxu0 %vm110_vm0, %v5950_v23 }
0x3249   :  { %v6955_v10 = vpop.f32.mrf.mxu0 }
0x324a   :  { %v6040_v27 = vadd.f32 %v6955_v10, %v6262_v25 }
0x324b   :  { %v6034_v32 = vpop.f32.mrf.mxu0 }
0x324c   :  { %6044 = vst [vmem:[%s8239_s24 + $0x8] sm:$0xff] %v6040_v27  ;;  %v6035_v33 = vadd.f32 %v6262_v25, %v6034_v32 }
0x324e   :  { %6043 = vst [vmem:[%s8239_s24] sm:$0xff] %v6035_v33 }
0x324f   :  { %6049 = vsyncpa [#allocation3], 1 }

</bundles_post_ra>
